<compile_context>
chip_gen: v6e
topology: v6e:2x2x1
jax: 0.10.0
libtpu: 0.0.40
codegen_flags: <defaults>
</compile_context>

<pallas_src>
import numpy as np
import jax
import jax.numpy as jnp
from jax.experimental import pallas as pl
from jax.experimental.pallas import tpu as pltpu

LEAKY_SLOPE = 0.01     # nn.LeakyReLU() default
IN_EPS = 1e-5          # nn.InstanceNorm2d default eps
KSIZE, STRIDE, PAD = 4, 2, 1


# ----------------------------------------------------------------------------
# host-side helpers (init-time constants / trivial glue on the raw input)
# ----------------------------------------------------------------------------
def _im2col_nchw(x, k=KSIZE, s=STRIDE, p=PAD):
    """x: [B, C, H, W] -> patch matrix [B, C*k*k, Ho*Wo], row index c*k*k+kh*k+kw
    (matches the column order of w.reshape(Cout, Cin*k*k))."""
    B, C, H, W = x.shape
    xp = jnp.pad(x, ((0, 0), (0, 0), (p, p), (p, p)))
    Ho = (H + 2 * p - k) // s + 1
    Wo = (W + 2 * p - k) // s + 1
    taps = []
    for kh in range(k):
        for kw in range(k):
            taps.append(xp[:, :, kh:kh + s * Ho:s, kw:kw + s * Wo:s])   # [B,C,Ho,Wo]
    pat = jnp.stack(taps, axis=2)                       # [B, C, k*k, Ho, Wo]
    return pat.reshape(B, C * k * k, Ho * Wo), Ho, Wo


def _make_gather_mats(H, W, k=KSIZE, s=STRIDE, p=PAD, dtype=jnp.bfloat16):
    """0/1 gather matrices G[t] ([H*W, Ho*Wo]) such that (z @ G[t])[:, i*Wo+j]
    selects input pixel (s*i+kh-p, s*j+kw-p) for tap t=kh*k+kw (zero column when
    the tap falls into the padding).  bf16 is exact for 0/1 -> halves the DMA."""
    Ho = (H + 2 * p - k) // s + 1
    Wo = (W + 2 * p - k) // s + 1
    G = np.zeros((k * k, H * W, Ho * Wo), np.float32)
    for kh in range(k):
        for kw in range(k):
            t = kh * k + kw
            for i in range(Ho):
                h = s * i + kh - p
                if h < 0 or h >= H:
                    continue
                for j in range(Wo):
                    w = s * j + kw - p
                    if w < 0 or w >= W:
                        continue
                    G[t, h * W + w, i * Wo + j] = 1.0
    return jnp.asarray(G, dtype), Ho, Wo


# ----------------------------------------------------------------------------
# fused kernel: conv trunk + both FC heads
# ----------------------------------------------------------------------------
def _in_affine_lrelu(y, bias, gamma, beta):
    # y: [C, P] (channels on sublanes, spatial on lanes); InstanceNorm2d stats
    # are per channel over the spatial axis -> lane-axis reduction.
    y = y + bias
    mean = jnp.mean(y, axis=1, keepdims=True)
    d = y - mean
    var = jnp.mean(d * d, axis=1, keepdims=True)          # two-pass, biased
    y = d * jax.lax.rsqrt(var + IN_EPS)
    y = y * gamma + beta
    return jnp.where(y > 0, y, LEAKY_SLOPE * y)


def _conv_layer(y, ws_ref, g_ref, b_ref, gm_ref, bt_ref):
    """y: [Cin, HW] f32.  ws_ref: [16*Cout, Cin] bf16 (rows ordered t*Cout+co).
    g_ref: [16, HW, P'] bf16 0/1 gather matrices.  Returns [Cout, P'] f32."""
    n_taps = g_ref.shape[0]
    cout = ws_ref.shape[0] // n_taps
    # one matmul applies the conv weight for all 16 taps at once
    z = jnp.dot(ws_ref[...], y.astype(jnp.bfloat16),
                preferred_element_type=jnp.float32)                 # [16*Cout, HW]
    zb = z.astype(jnp.bfloat16)
    # 16 gather matmuls (K = HW), sublane-aligned slices, f32 accumulation
    acc = jnp.dot(zb[0:cout, :], g_ref[0], preferred_element_type=jnp.float32)
    for t in range(1, n_taps):
        acc = acc + jnp.dot(zb[t * cout:(t + 1) * cout, :], g_ref[t],
                            preferred_element_type=jnp.float32)     # [Cout, P']
    return _in_affine_lrelu(acc, b_ref[...], gm_ref[...], bt_ref[...])


def _disc_kernel(p1_ref, w1_ref, b1_ref, gm1_ref, bt1_ref,
                 ws2_ref, g2_ref, b2_ref, gm2_ref, bt2_ref,
                 ws3_ref, g3_ref, b3_ref, gm3_ref, bt3_ref,
                 hw1_ref, hb1_ref, hw2_ref, hb2_ref,
                 o_ref, flat_ref):
    # ---- layer 1: conv as one matmul against the host-built patch matrix ----
    y = jnp.dot(w1_ref[...], p1_ref[0], preferred_element_type=jnp.float32)   # [C1, P1]
    y = _in_affine_lrelu(y, b1_ref[...], gm1_ref[...], bt1_ref[...])
    # ---- layers 2 & 3: weight-first conv, everything VMEM-resident ----
    y = _conv_layer(y, ws2_ref, g2_ref, b2_ref, gm2_ref, bt2_ref)             # [C2, P2]
    y = _conv_layer(y, ws3_ref, g3_ref, b3_ref, gm3_ref, bt3_ref)             # [C3, P3]
    # ---- NCHW flatten (c-major, == PyTorch y.view(B,-1)) via VMEM scratch ----
    c3, p3 = y.shape
    for c in range(c3):
        flat_ref[0:1, c * p3:(c + 1) * p3] = y[c:c + 1, :]
    flat = flat_ref[...]                                                      # [1, C3*P3]
    # ---- both FC heads fused: concatenated W1, block-diagonal W2 ----
    h = jnp.dot(flat, hw1_ref[...], preferred_element_type=jnp.float32) + hb1_ref[...]
    h = jnp.where(h > 0, h, LEAKY_SLOPE * h)
    o_ref[0] = jnp.dot(h, hw2_ref[...], preferred_element_type=jnp.float32) + hb2_ref[...]


_CONST_KEYS = ("w1m", "b1", "gm1", "bt1",
               "ws2", "g2", "b2", "gm2", "bt2",
               "ws3", "g3", "b3", "gm3", "bt3",
               "hw1", "hb1", "hw2", "hb2")


def fused_discriminator(p1, pr):
    B, K1, P1 = p1.shape
    c3 = pr["gm3"].shape[0]
    p3 = pr["g3"].shape[2]
    feat = c3 * p3
    assert pr["hw1"].shape[0] == feat
    n_out = pr["hw2"].shape[1]
    consts = [pr[k] for k in _CONST_KEYS]

    def const_spec(a):
        return pl.BlockSpec(a.shape, lambda b, _n=a.ndim: (0,) * _n)

    return pl.pallas_call(
        _disc_kernel,
        out_shape=jax.ShapeDtypeStruct((B, 1, n_out), jnp.float32),
        grid=(B,),
        in_specs=[pl.BlockSpec((1, K1, P1), lambda b: (b, 0, 0))]
                 + [const_spec(a) for a in consts],
        out_specs=pl.BlockSpec((1, 1, n_out), lambda b: (b, 0, 0)),
        scratch_shapes=[pltpu.VMEM((1, feat), jnp.float32)],
        compiler_params=pltpu.CompilerParams(dimension_semantics=("parallel",)),
    )(p1, *consts)


# ----------------------------------------------------------------------------
# Parameter init (synthetic weights in PyTorch layout, pre-transformed once)
# ----------------------------------------------------------------------------
def init_params(key, image_size=32, n_attrs=4, in_channel=8, fc_dim=32, n_layers=3):
    assert n_layers == 3, "fused kernel is specialized to 3 conv layers"
    keys = jax.random.split(key, 2 * n_layers + 8)
    ki = 0
    pr, raw = {}, {"convs": []}

    in_c = 3
    convs = []
    for i in range(n_layers):
        out_c = in_channel * 2 ** i
        w = jax.random.normal(keys[ki], (out_c, in_c, 4, 4), jnp.float32) * 0.05; ki += 1
        b = jax.random.normal(keys[ki], (out_c,), jnp.float32) * 0.05; ki += 1
        convs.append((w, b, in_c, out_c))
        raw["convs"].append((w, b))
        in_c = out_c

    # layer 1: conv-as-matmul weight [C1, Cin*16] (columns = ci*16 + kh*4 + kw)
    w1, b1, _, c1 = convs[0]
    pr["w1m"] = w1.reshape(c1, -1).astype(jnp.bfloat16)
    pr["b1"] = b1.reshape(c1, 1)
    pr["gm1"] = jnp.ones((c1, 1), jnp.float32)     # InstanceNorm2d(affine=True) init
    pr["bt1"] = jnp.zeros((c1, 1), jnp.float32)

    # layers 2,3: tap-stacked weights [16*Cout, Cin] (rows t*Cout+co) + bf16 gathers
    h_in = image_size // 2
    for li, name in ((1, "2"), (2, "3")):
        w, b, cin, cout = convs[li]
        pr["ws" + name] = (jnp.transpose(w, (2, 3, 0, 1))
                           .reshape(16 * cout, cin).astype(jnp.bfloat16))
        pr["b" + name] = b.reshape(cout, 1)
        pr["gm" + name] = jnp.ones((cout, 1), jnp.float32)
        pr["bt" + name] = jnp.zeros((cout, 1), jnp.float32)
        g, ho, _ = _make_gather_mats(h_in, h_in)
        pr["g" + name] = g
        h_in = ho

    # FC heads: W1 concatenated, W2 block-diagonal (kept f32 — tiny)
    feat = image_size // 2 ** n_layers
    F = in_channel * 2 ** (n_layers - 1) * feat * feat

    def linear(k1, k2, din, dout, scale=0.1):
        w = jax.random.normal(k1, (dout, din), jnp.float32) * scale
        b = jax.random.normal(k2, (dout,), jnp.float32) * scale
        return w, b

    w1a, b1a = linear(keys[ki], keys[ki + 1], F, fc_dim); ki += 2
    w2a, b2a = linear(keys[ki], keys[ki + 1], fc_dim, 1); ki += 2
    w1t, b1t = linear(keys[ki], keys[ki + 1], F, fc_dim); ki += 2
    w2t, b2t = linear(keys[ki], keys[ki + 1], fc_dim, n_attrs); ki += 2
    raw["adv"] = (w1a, b1a, w2a, b2a)
    raw["att"] = (w1t, b1t, w2t, b2t)

    pr["hw1"] = jnp.concatenate([w1a.T, w1t.T], axis=1)            # [F, 2*fc_dim]
    pr["hb1"] = jnp.concatenate([b1a, b1t]).reshape(1, -1)
    hw2 = jnp.zeros((2 * fc_dim, 1 + n_attrs), jnp.float32)
    hw2 = hw2.at[:fc_dim, :1].set(w2a.T)
    hw2 = hw2.at[fc_dim:, 1:].set(w2t.T)
    pr["hw2"] = hw2
    pr["hb2"] = jnp.concatenate([b2a, b2t]).reshape(1, -1)
    return pr, raw


# ----------------------------------------------------------------------------
# Forward pass (matches Discriminator.forward semantics)
# ----------------------------------------------------------------------------
def discriminator_forward(params, x_nchw):
    x = x_nchw.astype(jnp.float32)
    p1, _, _ = _im2col_nchw(x)                         # [B, 3*16, (H/2)*(W/2)] glue
    p1 = p1.astype(jnp.bfloat16)
    out = fused_discriminator(p1, params)[:, 0, :]     # [B, 1 + n_attrs]
    return out[:, :1], out[:, 1:]


# ----------------------------------------------------------------------------
# pure-JAX f32 reference (for a loose numerical sanity check)
# ----------------------------------------------------------------------------
def reference_forward(raw, x):
    y = x
    for (w, b) in raw["convs"]:
        y = jax.lax.conv_general_dilated(
            y, w, window_strides=(STRIDE, STRIDE),
            padding=((PAD, PAD), (PAD, PAD)),
            dimension_numbers=("NCHW", "OIHW", "NCHW"),
            precision=jax.lax.Precision.HIGHEST)
        y = y + b[None, :, None, None]
        mean = jnp.mean(y, axis=(2, 3), keepdims=True)
        var = jnp.mean((y - mean) ** 2, axis=(2, 3), keepdims=True)
        y = (y - mean) * jax.lax.rsqrt(var + IN_EPS)   # affine gamma=1, beta=0 at init
        y = jnp.where(y > 0, y, LEAKY_SLOPE * y)
    flat = y.reshape(y.shape[0], -1)

    def head(w1, b1, w2, b2):
        h = jnp.dot(flat, w1.T, precision=jax.lax.Precision.HIGHEST) + b1
        h = jnp.where(h > 0, h, LEAKY_SLOPE * h)
        return jnp.dot(h, w2.T, precision=jax.lax.Precision.HIGHEST) + b2

    return head(*raw["adv"]), head(*raw["att"])


if __name__ == "__main__":
    key = jax.random.PRNGKey(0)
    pkey, xkey = jax.random.split(key)

    # small config consistent with the module: image_size=32, n_layers=3,
    # in_channel=8, fc_dim=32, n_attrs=4 -> feature_size = 32 // 2**3 = 4
    params, raw = init_params(pkey, image_size=32, n_attrs=4, in_channel=8,
                              fc_dim=32, n_layers=3)
    x = jax.random.normal(xkey, (2, 3, 32, 32), jnp.float32)        # NCHW input

    fwd = jax.jit(discriminator_forward)
    logit_adv, logit_att = fwd(params, x)
    jax.block_until_ready((logit_adv, logit_att))

    assert logit_adv.shape == (2, 1), logit_adv.shape
    assert logit_att.shape == (2, 4), logit_att.shape
    assert bool(jnp.all(jnp.isfinite(logit_adv))) and bool(jnp.all(jnp.isfinite(logit_att)))

    # loose sanity check vs f32 reference (bf16 MXU path -> expect ~1e-2 drift)
    ref_adv, ref_att = reference_forward(raw, x)
    out = jnp.concatenate([logit_adv, logit_att], axis=1)
    ref = jnp.concatenate([ref_adv, ref_att], axis=1)
    err = float(jnp.max(jnp.abs(out - ref)))
    scale = float(jnp.max(jnp.abs(ref)))
    assert err <= 0.05 + 0.1 * scale, (err, scale)

    print("KERNEL_OK")
</pallas_src>

<mosaic_0001>
module attributes {stable_mosaic.version = 11 : i64} {
  func.func @_disc_kernel(%arg0: i32, %arg1: memref<1x48x256xbf16, #tpu.memory_space<vmem>>, %arg2: memref<8x48xbf16, #tpu.memory_space<vmem>>, %arg3: memref<8x1xf32, #tpu.memory_space<vmem>>, %arg4: memref<8x1xf32, #tpu.memory_space<vmem>>, %arg5: memref<8x1xf32, #tpu.memory_space<vmem>>, %arg6: memref<256x8xbf16, #tpu.memory_space<vmem>>, %arg7: memref<16x256x64xbf16, #tpu.memory_space<vmem>>, %arg8: memref<16x1xf32, #tpu.memory_space<vmem>>, %arg9: memref<16x1xf32, #tpu.memory_space<vmem>>, %arg10: memref<16x1xf32, #tpu.memory_space<vmem>>, %arg11: memref<512x16xbf16, #tpu.memory_space<vmem>>, %arg12: memref<16x64x16xbf16, #tpu.memory_space<vmem>>, %arg13: memref<32x1xf32, #tpu.memory_space<vmem>>, %arg14: memref<32x1xf32, #tpu.memory_space<vmem>>, %arg15: memref<32x1xf32, #tpu.memory_space<vmem>>, %arg16: memref<512x64xf32, #tpu.memory_space<vmem>>, %arg17: memref<1x64xf32, #tpu.memory_space<vmem>>, %arg18: memref<64x5xf32, #tpu.memory_space<vmem>>, %arg19: memref<1x5xf32, #tpu.memory_space<vmem>>, %arg20: memref<1x1x5xf32, #tpu.memory_space<vmem>>, %arg21: memref<1x512xf32, #tpu.memory_space<vmem>>) attributes {dimension_semantics = [#tpu.dimension_semantics<parallel>], iteration_bounds = array<i64: 2>, scalar_prefetch = 0 : i64, scratch_operands = 1 : i64, tpu.core_type = #tpu.core_type<tc>, window_params = [{transform_indices = @transform_0, window_bounds = array<i64: 1, 48, 256>}, {pipeline_mode = #tpu.pipeline_mode<synchronous>, transform_indices = @transform_1, window_bounds = array<i64: 8, 48>}, {pipeline_mode = #tpu.pipeline_mode<synchronous>, transform_indices = @transform_2, window_bounds = array<i64: 8, 1>}, {pipeline_mode = #tpu.pipeline_mode<synchronous>, transform_indices = @transform_3, window_bounds = array<i64: 8, 1>}, {pipeline_mode = #tpu.pipeline_mode<synchronous>, transform_indices = @transform_4, window_bounds = array<i64: 8, 1>}, {pipeline_mode = #tpu.pipeline_mode<synchronous>, transform_indices = @transform_5, window_bounds = array<i64: 256, 8>}, {pipeline_mode = #tpu.pipeline_mode<synchronous>, transform_indices = @transform_6, window_bounds = array<i64: 16, 256, 64>}, {pipeline_mode = #tpu.pipeline_mode<synchronous>, transform_indices = @transform_7, window_bounds = array<i64: 16, 1>}, {pipeline_mode = #tpu.pipeline_mode<synchronous>, transform_indices = @transform_8, window_bounds = array<i64: 16, 1>}, {pipeline_mode = #tpu.pipeline_mode<synchronous>, transform_indices = @transform_9, window_bounds = array<i64: 16, 1>}, {pipeline_mode = #tpu.pipeline_mode<synchronous>, transform_indices = @transform_10, window_bounds = array<i64: 512, 16>}, {pipeline_mode = #tpu.pipeline_mode<synchronous>, transform_indices = @transform_11, window_bounds = array<i64: 16, 64, 16>}, {pipeline_mode = #tpu.pipeline_mode<synchronous>, transform_indices = @transform_12, window_bounds = array<i64: 32, 1>}, {pipeline_mode = #tpu.pipeline_mode<synchronous>, transform_indices = @transform_13, window_bounds = array<i64: 32, 1>}, {pipeline_mode = #tpu.pipeline_mode<synchronous>, transform_indices = @transform_14, window_bounds = array<i64: 32, 1>}, {pipeline_mode = #tpu.pipeline_mode<synchronous>, transform_indices = @transform_15, window_bounds = array<i64: 512, 64>}, {pipeline_mode = #tpu.pipeline_mode<synchronous>, transform_indices = @transform_16, window_bounds = array<i64: 1, 64>}, {pipeline_mode = #tpu.pipeline_mode<synchronous>, transform_indices = @transform_17, window_bounds = array<i64: 64, 5>}, {pipeline_mode = #tpu.pipeline_mode<synchronous>, transform_indices = @transform_18, window_bounds = array<i64: 1, 5>}, {transform_indices = @transform_19, window_bounds = array<i64: 1, 1, 5>}]} {
    %c0 = arith.constant 0 : index
    %c0_0 = arith.constant 0 : index
    %0 = vector.load %arg2[%c0, %c0_0] : memref<8x48xbf16, #tpu.memory_space<vmem>>, vector<8x48xbf16>
    %c0_1 = arith.constant 0 : index
    %c0_2 = arith.constant 0 : index
    %c0_3 = arith.constant 0 : index
    %1 = vector.load %arg1[%c0_1, %c0_2, %c0_3] : memref<1x48x256xbf16, #tpu.memory_space<vmem>>, vector<1x48x256xbf16>
    %2 = vector.shape_cast %1 : vector<1x48x256xbf16> to vector<48x256xbf16>
    %cst = arith.constant dense<0.000000e+00> : vector<8x256xf32>
    %3 = tpu.matmul %0, %2, %cst {dimension_numbers = #tpu.dot_dimension_numbers<[1], [0], [0], [1], [0, 0, 1, 1], [], []>} : vector<8x48xbf16>, vector<48x256xbf16>, vector<8x256xf32> -> vector<8x256xf32>
    %c0_4 = arith.constant 0 : index
    %c0_5 = arith.constant 0 : index
    %4 = vector.load %arg3[%c0_4, %c0_5] : memref<8x1xf32, #tpu.memory_space<vmem>>, vector<8x1xf32>
    %c0_6 = arith.constant 0 : index
    %c0_7 = arith.constant 0 : index
    %5 = vector.load %arg4[%c0_6, %c0_7] : memref<8x1xf32, #tpu.memory_space<vmem>>, vector<8x1xf32>
    %c0_8 = arith.constant 0 : index
    %c0_9 = arith.constant 0 : index
    %6 = vector.load %arg5[%c0_8, %c0_9] : memref<8x1xf32, #tpu.memory_space<vmem>>, vector<8x1xf32>
    %7 = vector.broadcast %4 : vector<8x1xf32> to vector<8x256xf32>
    %8 = arith.addf %3, %7 : vector<8x256xf32>
    %cst_10 = arith.constant dense<0.000000e+00> : vector<8xf32>
    %9 = vector.multi_reduction <add>, %8, %cst_10 [1] : vector<8x256xf32> to vector<8xf32>
    %10 = vector.shape_cast %9 : vector<8xf32> to vector<8x1xf32>
    %cst_11 = arith.constant 2.560000e+02 : f32
    %11 = vector.broadcast %cst_11 : f32 to vector<8x1xf32>
    %12 = arith.divf %10, %11 : vector<8x1xf32>
    %13 = vector.broadcast %12 : vector<8x1xf32> to vector<8x256xf32>
    %14 = arith.subf %8, %13 : vector<8x256xf32>
    %15 = arith.mulf %14, %14 : vector<8x256xf32>
    %cst_12 = arith.constant dense<0.000000e+00> : vector<8xf32>
    %16 = vector.multi_reduction <add>, %15, %cst_12 [1] : vector<8x256xf32> to vector<8xf32>
    %17 = vector.shape_cast %16 : vector<8xf32> to vector<8x1xf32>
    %cst_13 = arith.constant 2.560000e+02 : f32
    %18 = vector.broadcast %cst_13 : f32 to vector<8x1xf32>
    %19 = arith.divf %17, %18 : vector<8x1xf32>
    %cst_14 = arith.constant 9.99999974E-6 : f32
    %20 = vector.broadcast %cst_14 : f32 to vector<8x1xf32>
    %21 = arith.addf %19, %20 : vector<8x1xf32>
    %22 = math.rsqrt %21 : vector<8x1xf32>
    %23 = vector.broadcast %22 : vector<8x1xf32> to vector<8x256xf32>
    %24 = arith.mulf %14, %23 : vector<8x256xf32>
    %25 = vector.broadcast %5 : vector<8x1xf32> to vector<8x256xf32>
    %26 = arith.mulf %24, %25 : vector<8x256xf32>
    %27 = vector.broadcast %6 : vector<8x1xf32> to vector<8x256xf32>
    %28 = arith.addf %26, %27 : vector<8x256xf32>
    %cst_15 = arith.constant 0.000000e+00 : f32
    %29 = vector.broadcast %cst_15 : f32 to vector<8x256xf32>
    %30 = arith.cmpf ogt, %28, %29 : vector<8x256xf32>
    %cst_16 = arith.constant 0.00999999977 : f32
    %31 = vector.broadcast %cst_16 : f32 to vector<8x256xf32>
    %32 = arith.mulf %31, %28 : vector<8x256xf32>
    %33 = arith.select %30, %28, %32 : vector<8x256xi1>, vector<8x256xf32>
    %c0_17 = arith.constant 0 : index
    %c0_18 = arith.constant 0 : index
    %34 = vector.load %arg6[%c0_17, %c0_18] : memref<256x8xbf16, #tpu.memory_space<vmem>>, vector<256x8xbf16>
    %35 = arith.truncf %33 : vector<8x256xf32> to vector<8x256xbf16>
    %cst_19 = arith.constant dense<0.000000e+00> : vector<256x256xf32>
    %36 = tpu.matmul %34, %35, %cst_19 {dimension_numbers = #tpu.dot_dimension_numbers<[1], [0], [0], [1], [0, 0, 1, 1], [], []>} : vector<256x8xbf16>, vector<8x256xbf16>, vector<256x256xf32> -> vector<256x256xf32>
    %37 = arith.truncf %36 : vector<256x256xf32> to vector<256x256xbf16>
    %38 = vector.extract_strided_slice %37 {offsets = [0, 0], sizes = [16, 256], strides = [1, 1]} : vector<256x256xbf16> to vector<16x256xbf16>
    %c0_20 = arith.constant 0 : index
    %c0_21 = arith.constant 0 : index
    %c0_22 = arith.constant 0 : index
    %39 = vector.load %arg7[%c0_20, %c0_21, %c0_22] : memref<16x256x64xbf16, #tpu.memory_space<vmem>>, vector<1x256x64xbf16>
    %40 = vector.shape_cast %39 : vector<1x256x64xbf16> to vector<256x64xbf16>
    %cst_23 = arith.constant dense<0.000000e+00> : vector<16x64xf32>
    %41 = tpu.matmul %38, %40, %cst_23 {dimension_numbers = #tpu.dot_dimension_numbers<[1], [0], [0], [1], [0, 0, 1, 1], [], []>} : vector<16x256xbf16>, vector<256x64xbf16>, vector<16x64xf32> -> vector<16x64xf32>
    %42 = vector.extract_strided_slice %37 {offsets = [16, 0], sizes = [16, 256], strides = [1, 1]} : vector<256x256xbf16> to vector<16x256xbf16>
    %c1 = arith.constant 1 : index
    %c0_24 = arith.constant 0 : index
    %c0_25 = arith.constant 0 : index
    %43 = vector.load %arg7[%c1, %c0_24, %c0_25] : memref<16x256x64xbf16, #tpu.memory_space<vmem>>, vector<1x256x64xbf16>
    %44 = vector.shape_cast %43 : vector<1x256x64xbf16> to vector<256x64xbf16>
    %cst_26 = arith.constant dense<0.000000e+00> : vector<16x64xf32>
    %45 = tpu.matmul %42, %44, %cst_26 {dimension_numbers = #tpu.dot_dimension_numbers<[1], [0], [0], [1], [0, 0, 1, 1], [], []>} : vector<16x256xbf16>, vector<256x64xbf16>, vector<16x64xf32> -> vector<16x64xf32>
    %46 = arith.addf %41, %45 : vector<16x64xf32>
    %47 = vector.extract_strided_slice %37 {offsets = [32, 0], sizes = [16, 256], strides = [1, 1]} : vector<256x256xbf16> to vector<16x256xbf16>
    %c2 = arith.constant 2 : index
    %c0_27 = arith.constant 0 : index
    %c0_28 = arith.constant 0 : index
    %48 = vector.load %arg7[%c2, %c0_27, %c0_28] : memref<16x256x64xbf16, #tpu.memory_space<vmem>>, vector<1x256x64xbf16>
    %49 = vector.shape_cast %48 : vector<1x256x64xbf16> to vector<256x64xbf16>
    %cst_29 = arith.constant dense<0.000000e+00> : vector<16x64xf32>
    %50 = tpu.matmul %47, %49, %cst_29 {dimension_numbers = #tpu.dot_dimension_numbers<[1], [0], [0], [1], [0, 0, 1, 1], [], []>} : vector<16x256xbf16>, vector<256x64xbf16>, vector<16x64xf32> -> vector<16x64xf32>
    %51 = arith.addf %46, %50 : vector<16x64xf32>
    %52 = vector.extract_strided_slice %37 {offsets = [48, 0], sizes = [16, 256], strides = [1, 1]} : vector<256x256xbf16> to vector<16x256xbf16>
    %c3 = arith.constant 3 : index
    %c0_30 = arith.constant 0 : index
    %c0_31 = arith.constant 0 : index
    %53 = vector.load %arg7[%c3, %c0_30, %c0_31] : memref<16x256x64xbf16, #tpu.memory_space<vmem>>, vector<1x256x64xbf16>
    %54 = vector.shape_cast %53 : vector<1x256x64xbf16> to vector<256x64xbf16>
    %cst_32 = arith.constant dense<0.000000e+00> : vector<16x64xf32>
    %55 = tpu.matmul %52, %54, %cst_32 {dimension_numbers = #tpu.dot_dimension_numbers<[1], [0], [0], [1], [0, 0, 1, 1], [], []>} : vector<16x256xbf16>, vector<256x64xbf16>, vector<16x64xf32> -> vector<16x64xf32>
    %56 = arith.addf %51, %55 : vector<16x64xf32>
    %57 = vector.extract_strided_slice %37 {offsets = [64, 0], sizes = [16, 256], strides = [1, 1]} : vector<256x256xbf16> to vector<16x256xbf16>
    %c4 = arith.constant 4 : index
    %c0_33 = arith.constant 0 : index
    %c0_34 = arith.constant 0 : index
    %58 = vector.load %arg7[%c4, %c0_33, %c0_34] : memref<16x256x64xbf16, #tpu.memory_space<vmem>>, vector<1x256x64xbf16>
    %59 = vector.shape_cast %58 : vector<1x256x64xbf16> to vector<256x64xbf16>
    %cst_35 = arith.constant dense<0.000000e+00> : vector<16x64xf32>
    %60 = tpu.matmul %57, %59, %cst_35 {dimension_numbers = #tpu.dot_dimension_numbers<[1], [0], [0], [1], [0, 0, 1, 1], [], []>} : vector<16x256xbf16>, vector<256x64xbf16>, vector<16x64xf32> -> vector<16x64xf32>
    %61 = arith.addf %56, %60 : vector<16x64xf32>
    %62 = vector.extract_strided_slice %37 {offsets = [80, 0], sizes = [16, 256], strides = [1, 1]} : vector<256x256xbf16> to vector<16x256xbf16>
    %c5 = arith.constant 5 : index
    %c0_36 = arith.constant 0 : index
    %c0_37 = arith.constant 0 : index
    %63 = vector.load %arg7[%c5, %c0_36, %c0_37] : memref<16x256x64xbf16, #tpu.memory_space<vmem>>, vector<1x256x64xbf16>
    %64 = vector.shape_cast %63 : vector<1x256x64xbf16> to vector<256x64xbf16>
    %cst_38 = arith.constant dense<0.000000e+00> : vector<16x64xf32>
    %65 = tpu.matmul %62, %64, %cst_38 {dimension_numbers = #tpu.dot_dimension_numbers<[1], [0], [0], [1], [0, 0, 1, 1], [], []>} : vector<16x256xbf16>, vector<256x64xbf16>, vector<16x64xf32> -> vector<16x64xf32>
    %66 = arith.addf %61, %65 : vector<16x64xf32>
    %67 = vector.extract_strided_slice %37 {offsets = [96, 0], sizes = [16, 256], strides = [1, 1]} : vector<256x256xbf16> to vector<16x256xbf16>
    %c6 = arith.constant 6 : index
    %c0_39 = arith.constant 0 : index
    %c0_40 = arith.constant 0 : index
    %68 = vector.load %arg7[%c6, %c0_39, %c0_40] : memref<16x256x64xbf16, #tpu.memory_space<vmem>>, vector<1x256x64xbf16>
    %69 = vector.shape_cast %68 : vector<1x256x64xbf16> to vector<256x64xbf16>
    %cst_41 = arith.constant dense<0.000000e+00> : vector<16x64xf32>
    %70 = tpu.matmul %67, %69, %cst_41 {dimension_numbers = #tpu.dot_dimension_numbers<[1], [0], [0], [1], [0, 0, 1, 1], [], []>} : vector<16x256xbf16>, vector<256x64xbf16>, vector<16x64xf32> -> vector<16x64xf32>
    %71 = arith.addf %66, %70 : vector<16x64xf32>
    %72 = vector.extract_strided_slice %37 {offsets = [112, 0], sizes = [16, 256], strides = [1, 1]} : vector<256x256xbf16> to vector<16x256xbf16>
    %c7 = arith.constant 7 : index
    %c0_42 = arith.constant 0 : index
    %c0_43 = arith.constant 0 : index
    %73 = vector.load %arg7[%c7, %c0_42, %c0_43] : memref<16x256x64xbf16, #tpu.memory_space<vmem>>, vector<1x256x64xbf16>
    %74 = vector.shape_cast %73 : vector<1x256x64xbf16> to vector<256x64xbf16>
    %cst_44 = arith.constant dense<0.000000e+00> : vector<16x64xf32>
    %75 = tpu.matmul %72, %74, %cst_44 {dimension_numbers = #tpu.dot_dimension_numbers<[1], [0], [0], [1], [0, 0, 1, 1], [], []>} : vector<16x256xbf16>, vector<256x64xbf16>, vector<16x64xf32> -> vector<16x64xf32>
    %76 = arith.addf %71, %75 : vector<16x64xf32>
    %77 = vector.extract_strided_slice %37 {offsets = [128, 0], sizes = [16, 256], strides = [1, 1]} : vector<256x256xbf16> to vector<16x256xbf16>
    %c8 = arith.constant 8 : index
    %c0_45 = arith.constant 0 : index
    %c0_46 = arith.constant 0 : index
    %78 = vector.load %arg7[%c8, %c0_45, %c0_46] : memref<16x256x64xbf16, #tpu.memory_space<vmem>>, vector<1x256x64xbf16>
    %79 = vector.shape_cast %78 : vector<1x256x64xbf16> to vector<256x64xbf16>
    %cst_47 = arith.constant dense<0.000000e+00> : vector<16x64xf32>
    %80 = tpu.matmul %77, %79, %cst_47 {dimension_numbers = #tpu.dot_dimension_numbers<[1], [0], [0], [1], [0, 0, 1, 1], [], []>} : vector<16x256xbf16>, vector<256x64xbf16>, vector<16x64xf32> -> vector<16x64xf32>
    %81 = arith.addf %76, %80 : vector<16x64xf32>
    %82 = vector.extract_strided_slice %37 {offsets = [144, 0], sizes = [16, 256], strides = [1, 1]} : vector<256x256xbf16> to vector<16x256xbf16>
    %c9 = arith.constant 9 : index
    %c0_48 = arith.constant 0 : index
    %c0_49 = arith.constant 0 : index
    %83 = vector.load %arg7[%c9, %c0_48, %c0_49] : memref<16x256x64xbf16, #tpu.memory_space<vmem>>, vector<1x256x64xbf16>
    %84 = vector.shape_cast %83 : vector<1x256x64xbf16> to vector<256x64xbf16>
    %cst_50 = arith.constant dense<0.000000e+00> : vector<16x64xf32>
    %85 = tpu.matmul %82, %84, %cst_50 {dimension_numbers = #tpu.dot_dimension_numbers<[1], [0], [0], [1], [0, 0, 1, 1], [], []>} : vector<16x256xbf16>, vector<256x64xbf16>, vector<16x64xf32> -> vector<16x64xf32>
    %86 = arith.addf %81, %85 : vector<16x64xf32>
    %87 = vector.extract_strided_slice %37 {offsets = [160, 0], sizes = [16, 256], strides = [1, 1]} : vector<256x256xbf16> to vector<16x256xbf16>
    %c10 = arith.constant 10 : index
    %c0_51 = arith.constant 0 : index
    %c0_52 = arith.constant 0 : index
    %88 = vector.load %arg7[%c10, %c0_51, %c0_52] : memref<16x256x64xbf16, #tpu.memory_space<vmem>>, vector<1x256x64xbf16>
    %89 = vector.shape_cast %88 : vector<1x256x64xbf16> to vector<256x64xbf16>
    %cst_53 = arith.constant dense<0.000000e+00> : vector<16x64xf32>
    %90 = tpu.matmul %87, %89, %cst_53 {dimension_numbers = #tpu.dot_dimension_numbers<[1], [0], [0], [1], [0, 0, 1, 1], [], []>} : vector<16x256xbf16>, vector<256x64xbf16>, vector<16x64xf32> -> vector<16x64xf32>
    %91 = arith.addf %86, %90 : vector<16x64xf32>
    %92 = vector.extract_strided_slice %37 {offsets = [176, 0], sizes = [16, 256], strides = [1, 1]} : vector<256x256xbf16> to vector<16x256xbf16>
    %c11 = arith.constant 11 : index
    %c0_54 = arith.constant 0 : index
    %c0_55 = arith.constant 0 : index
    %93 = vector.load %arg7[%c11, %c0_54, %c0_55] : memref<16x256x64xbf16, #tpu.memory_space<vmem>>, vector<1x256x64xbf16>
    %94 = vector.shape_cast %93 : vector<1x256x64xbf16> to vector<256x64xbf16>
    %cst_56 = arith.constant dense<0.000000e+00> : vector<16x64xf32>
    %95 = tpu.matmul %92, %94, %cst_56 {dimension_numbers = #tpu.dot_dimension_numbers<[1], [0], [0], [1], [0, 0, 1, 1], [], []>} : vector<16x256xbf16>, vector<256x64xbf16>, vector<16x64xf32> -> vector<16x64xf32>
    %96 = arith.addf %91, %95 : vector<16x64xf32>
    %97 = vector.extract_strided_slice %37 {offsets = [192, 0], sizes = [16, 256], strides = [1, 1]} : vector<256x256xbf16> to vector<16x256xbf16>
    %c12 = arith.constant 12 : index
    %c0_57 = arith.constant 0 : index
    %c0_58 = arith.constant 0 : index
    %98 = vector.load %arg7[%c12, %c0_57, %c0_58] : memref<16x256x64xbf16, #tpu.memory_space<vmem>>, vector<1x256x64xbf16>
    %99 = vector.shape_cast %98 : vector<1x256x64xbf16> to vector<256x64xbf16>
    %cst_59 = arith.constant dense<0.000000e+00> : vector<16x64xf32>
    %100 = tpu.matmul %97, %99, %cst_59 {dimension_numbers = #tpu.dot_dimension_numbers<[1], [0], [0], [1], [0, 0, 1, 1], [], []>} : vector<16x256xbf16>, vector<256x64xbf16>, vector<16x64xf32> -> vector<16x64xf32>
    %101 = arith.addf %96, %100 : vector<16x64xf32>
    %102 = vector.extract_strided_slice %37 {offsets = [208, 0], sizes = [16, 256], strides = [1, 1]} : vector<256x256xbf16> to vector<16x256xbf16>
    %c13 = arith.constant 13 : index
    %c0_60 = arith.constant 0 : index
    %c0_61 = arith.constant 0 : index
    %103 = vector.load %arg7[%c13, %c0_60, %c0_61] : memref<16x256x64xbf16, #tpu.memory_space<vmem>>, vector<1x256x64xbf16>
    %104 = vector.shape_cast %103 : vector<1x256x64xbf16> to vector<256x64xbf16>
    %cst_62 = arith.constant dense<0.000000e+00> : vector<16x64xf32>
    %105 = tpu.matmul %102, %104, %cst_62 {dimension_numbers = #tpu.dot_dimension_numbers<[1], [0], [0], [1], [0, 0, 1, 1], [], []>} : vector<16x256xbf16>, vector<256x64xbf16>, vector<16x64xf32> -> vector<16x64xf32>
    %106 = arith.addf %101, %105 : vector<16x64xf32>
    %107 = vector.extract_strided_slice %37 {offsets = [224, 0], sizes = [16, 256], strides = [1, 1]} : vector<256x256xbf16> to vector<16x256xbf16>
    %c14 = arith.constant 14 : index
    %c0_63 = arith.constant 0 : index
    %c0_64 = arith.constant 0 : index
    %108 = vector.load %arg7[%c14, %c0_63, %c0_64] : memref<16x256x64xbf16, #tpu.memory_space<vmem>>, vector<1x256x64xbf16>
    %109 = vector.shape_cast %108 : vector<1x256x64xbf16> to vector<256x64xbf16>
    %cst_65 = arith.constant dense<0.000000e+00> : vector<16x64xf32>
    %110 = tpu.matmul %107, %109, %cst_65 {dimension_numbers = #tpu.dot_dimension_numbers<[1], [0], [0], [1], [0, 0, 1, 1], [], []>} : vector<16x256xbf16>, vector<256x64xbf16>, vector<16x64xf32> -> vector<16x64xf32>
    %111 = arith.addf %106, %110 : vector<16x64xf32>
    %112 = vector.extract_strided_slice %37 {offsets = [240, 0], sizes = [16, 256], strides = [1, 1]} : vector<256x256xbf16> to vector<16x256xbf16>
    %c15 = arith.constant 15 : index
    %c0_66 = arith.constant 0 : index
    %c0_67 = arith.constant 0 : index
    %113 = vector.load %arg7[%c15, %c0_66, %c0_67] : memref<16x256x64xbf16, #tpu.memory_space<vmem>>, vector<1x256x64xbf16>
    %114 = vector.shape_cast %113 : vector<1x256x64xbf16> to vector<256x64xbf16>
    %cst_68 = arith.constant dense<0.000000e+00> : vector<16x64xf32>
    %115 = tpu.matmul %112, %114, %cst_68 {dimension_numbers = #tpu.dot_dimension_numbers<[1], [0], [0], [1], [0, 0, 1, 1], [], []>} : vector<16x256xbf16>, vector<256x64xbf16>, vector<16x64xf32> -> vector<16x64xf32>
    %116 = arith.addf %111, %115 : vector<16x64xf32>
    %c0_69 = arith.constant 0 : index
    %c0_70 = arith.constant 0 : index
    %117 = vector.load %arg8[%c0_69, %c0_70] : memref<16x1xf32, #tpu.memory_space<vmem>>, vector<16x1xf32>
    %c0_71 = arith.constant 0 : index
    %c0_72 = arith.constant 0 : index
    %118 = vector.load %arg9[%c0_71, %c0_72] : memref<16x1xf32, #tpu.memory_space<vmem>>, vector<16x1xf32>
    %c0_73 = arith.constant 0 : index
    %c0_74 = arith.constant 0 : index
    %119 = vector.load %arg10[%c0_73, %c0_74] : memref<16x1xf32, #tpu.memory_space<vmem>>, vector<16x1xf32>
    %120 = vector.broadcast %117 : vector<16x1xf32> to vector<16x64xf32>
    %121 = arith.addf %116, %120 : vector<16x64xf32>
    %cst_75 = arith.constant dense<0.000000e+00> : vector<16xf32>
    %122 = vector.multi_reduction <add>, %121, %cst_75 [1] : vector<16x64xf32> to vector<16xf32>
    %123 = vector.shape_cast %122 : vector<16xf32> to vector<16x1xf32>
    %cst_76 = arith.constant 6.400000e+01 : f32
    %124 = vector.broadcast %cst_76 : f32 to vector<16x1xf32>
    %125 = arith.divf %123, %124 : vector<16x1xf32>
    %126 = vector.broadcast %125 : vector<16x1xf32> to vector<16x64xf32>
    %127 = arith.subf %121, %126 : vector<16x64xf32>
    %128 = arith.mulf %127, %127 : vector<16x64xf32>
    %cst_77 = arith.constant dense<0.000000e+00> : vector<16xf32>
    %129 = vector.multi_reduction <add>, %128, %cst_77 [1] : vector<16x64xf32> to vector<16xf32>
    %130 = vector.shape_cast %129 : vector<16xf32> to vector<16x1xf32>
    %cst_78 = arith.constant 6.400000e+01 : f32
    %131 = vector.broadcast %cst_78 : f32 to vector<16x1xf32>
    %132 = arith.divf %130, %131 : vector<16x1xf32>
    %cst_79 = arith.constant 9.99999974E-6 : f32
    %133 = vector.broadcast %cst_79 : f32 to vector<16x1xf32>
    %134 = arith.addf %132, %133 : vector<16x1xf32>
    %135 = math.rsqrt %134 : vector<16x1xf32>
    %136 = vector.broadcast %135 : vector<16x1xf32> to vector<16x64xf32>
    %137 = arith.mulf %127, %136 : vector<16x64xf32>
    %138 = vector.broadcast %118 : vector<16x1xf32> to vector<16x64xf32>
    %139 = arith.mulf %137, %138 : vector<16x64xf32>
    %140 = vector.broadcast %119 : vector<16x1xf32> to vector<16x64xf32>
    %141 = arith.addf %139, %140 : vector<16x64xf32>
    %cst_80 = arith.constant 0.000000e+00 : f32
    %142 = vector.broadcast %cst_80 : f32 to vector<16x64xf32>
    %143 = arith.cmpf ogt, %141, %142 : vector<16x64xf32>
    %cst_81 = arith.constant 0.00999999977 : f32
    %144 = vector.broadcast %cst_81 : f32 to vector<16x64xf32>
    %145 = arith.mulf %144, %141 : vector<16x64xf32>
    %146 = arith.select %143, %141, %145 : vector<16x64xi1>, vector<16x64xf32>
    %c0_82 = arith.constant 0 : index
    %c0_83 = arith.constant 0 : index
    %147 = vector.load %arg11[%c0_82, %c0_83] : memref<512x16xbf16, #tpu.memory_space<vmem>>, vector<512x16xbf16>
    %148 = arith.truncf %146 : vector<16x64xf32> to vector<16x64xbf16>
    %cst_84 = arith.constant dense<0.000000e+00> : vector<512x64xf32>
    %149 = tpu.matmul %147, %148, %cst_84 {dimension_numbers = #tpu.dot_dimension_numbers<[1], [0], [0], [1], [0, 0, 1, 1], [], []>} : vector<512x16xbf16>, vector<16x64xbf16>, vector<512x64xf32> -> vector<512x64xf32>
    %150 = arith.truncf %149 : vector<512x64xf32> to vector<512x64xbf16>
    %151 = vector.extract_strided_slice %150 {offsets = [0, 0], sizes = [32, 64], strides = [1, 1]} : vector<512x64xbf16> to vector<32x64xbf16>
    %c0_85 = arith.constant 0 : index
    %c0_86 = arith.constant 0 : index
    %c0_87 = arith.constant 0 : index
    %152 = vector.load %arg12[%c0_85, %c0_86, %c0_87] : memref<16x64x16xbf16, #tpu.memory_space<vmem>>, vector<1x64x16xbf16>
    %153 = vector.shape_cast %152 : vector<1x64x16xbf16> to vector<64x16xbf16>
    %cst_88 = arith.constant dense<0.000000e+00> : vector<32x16xf32>
    %154 = tpu.matmul %151, %153, %cst_88 {dimension_numbers = #tpu.dot_dimension_numbers<[1], [0], [0], [1], [0, 0, 1, 1], [], []>} : vector<32x64xbf16>, vector<64x16xbf16>, vector<32x16xf32> -> vector<32x16xf32>
    %155 = vector.extract_strided_slice %150 {offsets = [32, 0], sizes = [32, 64], strides = [1, 1]} : vector<512x64xbf16> to vector<32x64xbf16>
    %c1_89 = arith.constant 1 : index
    %c0_90 = arith.constant 0 : index
    %c0_91 = arith.constant 0 : index
    %156 = vector.load %arg12[%c1_89, %c0_90, %c0_91] : memref<16x64x16xbf16, #tpu.memory_space<vmem>>, vector<1x64x16xbf16>
    %157 = vector.shape_cast %156 : vector<1x64x16xbf16> to vector<64x16xbf16>
    %cst_92 = arith.constant dense<0.000000e+00> : vector<32x16xf32>
    %158 = tpu.matmul %155, %157, %cst_92 {dimension_numbers = #tpu.dot_dimension_numbers<[1], [0], [0], [1], [0, 0, 1, 1], [], []>} : vector<32x64xbf16>, vector<64x16xbf16>, vector<32x16xf32> -> vector<32x16xf32>
    %159 = arith.addf %154, %158 : vector<32x16xf32>
    %160 = vector.extract_strided_slice %150 {offsets = [64, 0], sizes = [32, 64], strides = [1, 1]} : vector<512x64xbf16> to vector<32x64xbf16>
    %c2_93 = arith.constant 2 : index
    %c0_94 = arith.constant 0 : index
    %c0_95 = arith.constant 0 : index
    %161 = vector.load %arg12[%c2_93, %c0_94, %c0_95] : memref<16x64x16xbf16, #tpu.memory_space<vmem>>, vector<1x64x16xbf16>
    %162 = vector.shape_cast %161 : vector<1x64x16xbf16> to vector<64x16xbf16>
    %cst_96 = arith.constant dense<0.000000e+00> : vector<32x16xf32>
    %163 = tpu.matmul %160, %162, %cst_96 {dimension_numbers = #tpu.dot_dimension_numbers<[1], [0], [0], [1], [0, 0, 1, 1], [], []>} : vector<32x64xbf16>, vector<64x16xbf16>, vector<32x16xf32> -> vector<32x16xf32>
    %164 = arith.addf %159, %163 : vector<32x16xf32>
    %165 = vector.extract_strided_slice %150 {offsets = [96, 0], sizes = [32, 64], strides = [1, 1]} : vector<512x64xbf16> to vector<32x64xbf16>
    %c3_97 = arith.constant 3 : index
    %c0_98 = arith.constant 0 : index
    %c0_99 = arith.constant 0 : index
    %166 = vector.load %arg12[%c3_97, %c0_98, %c0_99] : memref<16x64x16xbf16, #tpu.memory_space<vmem>>, vector<1x64x16xbf16>
    %167 = vector.shape_cast %166 : vector<1x64x16xbf16> to vector<64x16xbf16>
    %cst_100 = arith.constant dense<0.000000e+00> : vector<32x16xf32>
    %168 = tpu.matmul %165, %167, %cst_100 {dimension_numbers = #tpu.dot_dimension_numbers<[1], [0], [0], [1], [0, 0, 1, 1], [], []>} : vector<32x64xbf16>, vector<64x16xbf16>, vector<32x16xf32> -> vector<32x16xf32>
    %169 = arith.addf %164, %168 : vector<32x16xf32>
    %170 = vector.extract_strided_slice %150 {offsets = [128, 0], sizes = [32, 64], strides = [1, 1]} : vector<512x64xbf16> to vector<32x64xbf16>
    %c4_101 = arith.constant 4 : index
    %c0_102 = arith.constant 0 : index
    %c0_103 = arith.constant 0 : index
    %171 = vector.load %arg12[%c4_101, %c0_102, %c0_103] : memref<16x64x16xbf16, #tpu.memory_space<vmem>>, vector<1x64x16xbf16>
    %172 = vector.shape_cast %171 : vector<1x64x16xbf16> to vector<64x16xbf16>
    %cst_104 = arith.constant dense<0.000000e+00> : vector<32x16xf32>
    %173 = tpu.matmul %170, %172, %cst_104 {dimension_numbers = #tpu.dot_dimension_numbers<[1], [0], [0], [1], [0, 0, 1, 1], [], []>} : vector<32x64xbf16>, vector<64x16xbf16>, vector<32x16xf32> -> vector<32x16xf32>
    %174 = arith.addf %169, %173 : vector<32x16xf32>
    %175 = vector.extract_strided_slice %150 {offsets = [160, 0], sizes = [32, 64], strides = [1, 1]} : vector<512x64xbf16> to vector<32x64xbf16>
    %c5_105 = arith.constant 5 : index
    %c0_106 = arith.constant 0 : index
    %c0_107 = arith.constant 0 : index
    %176 = vector.load %arg12[%c5_105, %c0_106, %c0_107] : memref<16x64x16xbf16, #tpu.memory_space<vmem>>, vector<1x64x16xbf16>
    %177 = vector.shape_cast %176 : vector<1x64x16xbf16> to vector<64x16xbf16>
    %cst_108 = arith.constant dense<0.000000e+00> : vector<32x16xf32>
    %178 = tpu.matmul %175, %177, %cst_108 {dimension_numbers = #tpu.dot_dimension_numbers<[1], [0], [0], [1], [0, 0, 1, 1], [], []>} : vector<32x64xbf16>, vector<64x16xbf16>, vector<32x16xf32> -> vector<32x16xf32>
    %179 = arith.addf %174, %178 : vector<32x16xf32>
    %180 = vector.extract_strided_slice %150 {offsets = [192, 0], sizes = [32, 64], strides = [1, 1]} : vector<512x64xbf16> to vector<32x64xbf16>
    %c6_109 = arith.constant 6 : index
    %c0_110 = arith.constant 0 : index
    %c0_111 = arith.constant 0 : index
    %181 = vector.load %arg12[%c6_109, %c0_110, %c0_111] : memref<16x64x16xbf16, #tpu.memory_space<vmem>>, vector<1x64x16xbf16>
    %182 = vector.shape_cast %181 : vector<1x64x16xbf16> to vector<64x16xbf16>
    %cst_112 = arith.constant dense<0.000000e+00> : vector<32x16xf32>
    %183 = tpu.matmul %180, %182, %cst_112 {dimension_numbers = #tpu.dot_dimension_numbers<[1], [0], [0], [1], [0, 0, 1, 1], [], []>} : vector<32x64xbf16>, vector<64x16xbf16>, vector<32x16xf32> -> vector<32x16xf32>
    %184 = arith.addf %179, %183 : vector<32x16xf32>
    %185 = vector.extract_strided_slice %150 {offsets = [224, 0], sizes = [32, 64], strides = [1, 1]} : vector<512x64xbf16> to vector<32x64xbf16>
    %c7_113 = arith.constant 7 : index
    %c0_114 = arith.constant 0 : index
    %c0_115 = arith.constant 0 : index
    %186 = vector.load %arg12[%c7_113, %c0_114, %c0_115] : memref<16x64x16xbf16, #tpu.memory_space<vmem>>, vector<1x64x16xbf16>
    %187 = vector.shape_cast %186 : vector<1x64x16xbf16> to vector<64x16xbf16>
    %cst_116 = arith.constant dense<0.000000e+00> : vector<32x16xf32>
    %188 = tpu.matmul %185, %187, %cst_116 {dimension_numbers = #tpu.dot_dimension_numbers<[1], [0], [0], [1], [0, 0, 1, 1], [], []>} : vector<32x64xbf16>, vector<64x16xbf16>, vector<32x16xf32> -> vector<32x16xf32>
    %189 = arith.addf %184, %188 : vector<32x16xf32>
    %190 = vector.extract_strided_slice %150 {offsets = [256, 0], sizes = [32, 64], strides = [1, 1]} : vector<512x64xbf16> to vector<32x64xbf16>
    %c8_117 = arith.constant 8 : index
    %c0_118 = arith.constant 0 : index
    %c0_119 = arith.constant 0 : index
    %191 = vector.load %arg12[%c8_117, %c0_118, %c0_119] : memref<16x64x16xbf16, #tpu.memory_space<vmem>>, vector<1x64x16xbf16>
    %192 = vector.shape_cast %191 : vector<1x64x16xbf16> to vector<64x16xbf16>
    %cst_120 = arith.constant dense<0.000000e+00> : vector<32x16xf32>
    %193 = tpu.matmul %190, %192, %cst_120 {dimension_numbers = #tpu.dot_dimension_numbers<[1], [0], [0], [1], [0, 0, 1, 1], [], []>} : vector<32x64xbf16>, vector<64x16xbf16>, vector<32x16xf32> -> vector<32x16xf32>
    %194 = arith.addf %189, %193 : vector<32x16xf32>
    %195 = vector.extract_strided_slice %150 {offsets = [288, 0], sizes = [32, 64], strides = [1, 1]} : vector<512x64xbf16> to vector<32x64xbf16>
    %c9_121 = arith.constant 9 : index
    %c0_122 = arith.constant 0 : index
    %c0_123 = arith.constant 0 : index
    %196 = vector.load %arg12[%c9_121, %c0_122, %c0_123] : memref<16x64x16xbf16, #tpu.memory_space<vmem>>, vector<1x64x16xbf16>
    %197 = vector.shape_cast %196 : vector<1x64x16xbf16> to vector<64x16xbf16>
    %cst_124 = arith.constant dense<0.000000e+00> : vector<32x16xf32>
    %198 = tpu.matmul %195, %197, %cst_124 {dimension_numbers = #tpu.dot_dimension_numbers<[1], [0], [0], [1], [0, 0, 1, 1], [], []>} : vector<32x64xbf16>, vector<64x16xbf16>, vector<32x16xf32> -> vector<32x16xf32>
    %199 = arith.addf %194, %198 : vector<32x16xf32>
    %200 = vector.extract_strided_slice %150 {offsets = [320, 0], sizes = [32, 64], strides = [1, 1]} : vector<512x64xbf16> to vector<32x64xbf16>
    %c10_125 = arith.constant 10 : index
    %c0_126 = arith.constant 0 : index
    %c0_127 = arith.constant 0 : index
    %201 = vector.load %arg12[%c10_125, %c0_126, %c0_127] : memref<16x64x16xbf16, #tpu.memory_space<vmem>>, vector<1x64x16xbf16>
    %202 = vector.shape_cast %201 : vector<1x64x16xbf16> to vector<64x16xbf16>
    %cst_128 = arith.constant dense<0.000000e+00> : vector<32x16xf32>
    %203 = tpu.matmul %200, %202, %cst_128 {dimension_numbers = #tpu.dot_dimension_numbers<[1], [0], [0], [1], [0, 0, 1, 1], [], []>} : vector<32x64xbf16>, vector<64x16xbf16>, vector<32x16xf32> -> vector<32x16xf32>
    %204 = arith.addf %199, %203 : vector<32x16xf32>
    %205 = vector.extract_strided_slice %150 {offsets = [352, 0], sizes = [32, 64], strides = [1, 1]} : vector<512x64xbf16> to vector<32x64xbf16>
    %c11_129 = arith.constant 11 : index
    %c0_130 = arith.constant 0 : index
    %c0_131 = arith.constant 0 : index
    %206 = vector.load %arg12[%c11_129, %c0_130, %c0_131] : memref<16x64x16xbf16, #tpu.memory_space<vmem>>, vector<1x64x16xbf16>
    %207 = vector.shape_cast %206 : vector<1x64x16xbf16> to vector<64x16xbf16>
    %cst_132 = arith.constant dense<0.000000e+00> : vector<32x16xf32>
    %208 = tpu.matmul %205, %207, %cst_132 {dimension_numbers = #tpu.dot_dimension_numbers<[1], [0], [0], [1], [0, 0, 1, 1], [], []>} : vector<32x64xbf16>, vector<64x16xbf16>, vector<32x16xf32> -> vector<32x16xf32>
    %209 = arith.addf %204, %208 : vector<32x16xf32>
    %210 = vector.extract_strided_slice %150 {offsets = [384, 0], sizes = [32, 64], strides = [1, 1]} : vector<512x64xbf16> to vector<32x64xbf16>
    %c12_133 = arith.constant 12 : index
    %c0_134 = arith.constant 0 : index
    %c0_135 = arith.constant 0 : index
    %211 = vector.load %arg12[%c12_133, %c0_134, %c0_135] : memref<16x64x16xbf16, #tpu.memory_space<vmem>>, vector<1x64x16xbf16>
    %212 = vector.shape_cast %211 : vector<1x64x16xbf16> to vector<64x16xbf16>
    %cst_136 = arith.constant dense<0.000000e+00> : vector<32x16xf32>
    %213 = tpu.matmul %210, %212, %cst_136 {dimension_numbers = #tpu.dot_dimension_numbers<[1], [0], [0], [1], [0, 0, 1, 1], [], []>} : vector<32x64xbf16>, vector<64x16xbf16>, vector<32x16xf32> -> vector<32x16xf32>
    %214 = arith.addf %209, %213 : vector<32x16xf32>
    %215 = vector.extract_strided_slice %150 {offsets = [416, 0], sizes = [32, 64], strides = [1, 1]} : vector<512x64xbf16> to vector<32x64xbf16>
    %c13_137 = arith.constant 13 : index
    %c0_138 = arith.constant 0 : index
    %c0_139 = arith.constant 0 : index
    %216 = vector.load %arg12[%c13_137, %c0_138, %c0_139] : memref<16x64x16xbf16, #tpu.memory_space<vmem>>, vector<1x64x16xbf16>
    %217 = vector.shape_cast %216 : vector<1x64x16xbf16> to vector<64x16xbf16>
    %cst_140 = arith.constant dense<0.000000e+00> : vector<32x16xf32>
    %218 = tpu.matmul %215, %217, %cst_140 {dimension_numbers = #tpu.dot_dimension_numbers<[1], [0], [0], [1], [0, 0, 1, 1], [], []>} : vector<32x64xbf16>, vector<64x16xbf16>, vector<32x16xf32> -> vector<32x16xf32>
    %219 = arith.addf %214, %218 : vector<32x16xf32>
    %220 = vector.extract_strided_slice %150 {offsets = [448, 0], sizes = [32, 64], strides = [1, 1]} : vector<512x64xbf16> to vector<32x64xbf16>
    %c14_141 = arith.constant 14 : index
    %c0_142 = arith.constant 0 : index
    %c0_143 = arith.constant 0 : index
    %221 = vector.load %arg12[%c14_141, %c0_142, %c0_143] : memref<16x64x16xbf16, #tpu.memory_space<vmem>>, vector<1x64x16xbf16>
    %222 = vector.shape_cast %221 : vector<1x64x16xbf16> to vector<64x16xbf16>
    %cst_144 = arith.constant dense<0.000000e+00> : vector<32x16xf32>
    %223 = tpu.matmul %220, %222, %cst_144 {dimension_numbers = #tpu.dot_dimension_numbers<[1], [0], [0], [1], [0, 0, 1, 1], [], []>} : vector<32x64xbf16>, vector<64x16xbf16>, vector<32x16xf32> -> vector<32x16xf32>
    %224 = arith.addf %219, %223 : vector<32x16xf32>
    %225 = vector.extract_strided_slice %150 {offsets = [480, 0], sizes = [32, 64], strides = [1, 1]} : vector<512x64xbf16> to vector<32x64xbf16>
    %c15_145 = arith.constant 15 : index
    %c0_146 = arith.constant 0 : index
    %c0_147 = arith.constant 0 : index
    %226 = vector.load %arg12[%c15_145, %c0_146, %c0_147] : memref<16x64x16xbf16, #tpu.memory_space<vmem>>, vector<1x64x16xbf16>
    %227 = vector.shape_cast %226 : vector<1x64x16xbf16> to vector<64x16xbf16>
    %cst_148 = arith.constant dense<0.000000e+00> : vector<32x16xf32>
    %228 = tpu.matmul %225, %227, %cst_148 {dimension_numbers = #tpu.dot_dimension_numbers<[1], [0], [0], [1], [0, 0, 1, 1], [], []>} : vector<32x64xbf16>, vector<64x16xbf16>, vector<32x16xf32> -> vector<32x16xf32>
    %229 = arith.addf %224, %228 : vector<32x16xf32>
    %c0_149 = arith.constant 0 : index
    %c0_150 = arith.constant 0 : index
    %230 = vector.load %arg13[%c0_149, %c0_150] : memref<32x1xf32, #tpu.memory_space<vmem>>, vector<32x1xf32>
    %c0_151 = arith.constant 0 : index
    %c0_152 = arith.constant 0 : index
    %231 = vector.load %arg14[%c0_151, %c0_152] : memref<32x1xf32, #tpu.memory_space<vmem>>, vector<32x1xf32>
    %c0_153 = arith.constant 0 : index
    %c0_154 = arith.constant 0 : index
    %232 = vector.load %arg15[%c0_153, %c0_154] : memref<32x1xf32, #tpu.memory_space<vmem>>, vector<32x1xf32>
    %233 = vector.broadcast %230 : vector<32x1xf32> to vector<32x16xf32>
    %234 = arith.addf %229, %233 : vector<32x16xf32>
    %cst_155 = arith.constant dense<0.000000e+00> : vector<32xf32>
    %235 = vector.multi_reduction <add>, %234, %cst_155 [1] : vector<32x16xf32> to vector<32xf32>
    %236 = vector.shape_cast %235 : vector<32xf32> to vector<32x1xf32>
    %cst_156 = arith.constant 1.600000e+01 : f32
    %237 = vector.broadcast %cst_156 : f32 to vector<32x1xf32>
    %238 = arith.divf %236, %237 : vector<32x1xf32>
    %239 = vector.broadcast %238 : vector<32x1xf32> to vector<32x16xf32>
    %240 = arith.subf %234, %239 : vector<32x16xf32>
    %241 = arith.mulf %240, %240 : vector<32x16xf32>
    %cst_157 = arith.constant dense<0.000000e+00> : vector<32xf32>
    %242 = vector.multi_reduction <add>, %241, %cst_157 [1] : vector<32x16xf32> to vector<32xf32>
    %243 = vector.shape_cast %242 : vector<32xf32> to vector<32x1xf32>
    %cst_158 = arith.constant 1.600000e+01 : f32
    %244 = vector.broadcast %cst_158 : f32 to vector<32x1xf32>
    %245 = arith.divf %243, %244 : vector<32x1xf32>
    %cst_159 = arith.constant 9.99999974E-6 : f32
    %246 = vector.broadcast %cst_159 : f32 to vector<32x1xf32>
    %247 = arith.addf %245, %246 : vector<32x1xf32>
    %248 = math.rsqrt %247 : vector<32x1xf32>
    %249 = vector.broadcast %248 : vector<32x1xf32> to vector<32x16xf32>
    %250 = arith.mulf %240, %249 : vector<32x16xf32>
    %251 = vector.broadcast %231 : vector<32x1xf32> to vector<32x16xf32>
    %252 = arith.mulf %250, %251 : vector<32x16xf32>
    %253 = vector.broadcast %232 : vector<32x1xf32> to vector<32x16xf32>
    %254 = arith.addf %252, %253 : vector<32x16xf32>
    %cst_160 = arith.constant 0.000000e+00 : f32
    %255 = vector.broadcast %cst_160 : f32 to vector<32x16xf32>
    %256 = arith.cmpf ogt, %254, %255 : vector<32x16xf32>
    %cst_161 = arith.constant 0.00999999977 : f32
    %257 = vector.broadcast %cst_161 : f32 to vector<32x16xf32>
    %258 = arith.mulf %257, %254 : vector<32x16xf32>
    %259 = arith.select %256, %254, %258 : vector<32x16xi1>, vector<32x16xf32>
    %260 = vector.extract_strided_slice %259 {offsets = [0, 0], sizes = [1, 16], strides = [1, 1]} : vector<32x16xf32> to vector<1x16xf32>
    %c0_162 = arith.constant 0 : index
    %c0_163 = arith.constant 0 : index
    %261 = vector.load %arg21[%c0_162, %c0_163] : memref<1x512xf32, #tpu.memory_space<vmem>>, vector<1x16xf32>
    tpu.vector_store %arg21[%c0_162, %c0_163], %260 {strides = array<i32>} : memref<1x512xf32, #tpu.memory_space<vmem>>, vector<1x16xf32>,
    %262 = vector.extract_strided_slice %259 {offsets = [1, 0], sizes = [1, 16], strides = [1, 1]} : vector<32x16xf32> to vector<1x16xf32>
    %c0_164 = arith.constant 0 : index
    %c16 = arith.constant 16 : index
    %263 = vector.load %arg21[%c0_164, %c16] : memref<1x512xf32, #tpu.memory_space<vmem>>, vector<1x16xf32>
    tpu.vector_store %arg21[%c0_164, %c16], %262 {strides = array<i32>} : memref<1x512xf32, #tpu.memory_space<vmem>>, vector<1x16xf32>,
    %264 = vector.extract_strided_slice %259 {offsets = [2, 0], sizes = [1, 16], strides = [1, 1]} : vector<32x16xf32> to vector<1x16xf32>
    %c0_165 = arith.constant 0 : index
    %c32 = arith.constant 32 : index
    %265 = vector.load %arg21[%c0_165, %c32] : memref<1x512xf32, #tpu.memory_space<vmem>>, vector<1x16xf32>
    tpu.vector_store %arg21[%c0_165, %c32], %264 {strides = array<i32>} : memref<1x512xf32, #tpu.memory_space<vmem>>, vector<1x16xf32>,
    %266 = vector.extract_strided_slice %259 {offsets = [3, 0], sizes = [1, 16], strides = [1, 1]} : vector<32x16xf32> to vector<1x16xf32>
    %c0_166 = arith.constant 0 : index
    %c48 = arith.constant 48 : index
    %267 = vector.load %arg21[%c0_166, %c48] : memref<1x512xf32, #tpu.memory_space<vmem>>, vector<1x16xf32>
    tpu.vector_store %arg21[%c0_166, %c48], %266 {strides = array<i32>} : memref<1x512xf32, #tpu.memory_space<vmem>>, vector<1x16xf32>,
    %268 = vector.extract_strided_slice %259 {offsets = [4, 0], sizes = [1, 16], strides = [1, 1]} : vector<32x16xf32> to vector<1x16xf32>
    %c0_167 = arith.constant 0 : index
    %c64 = arith.constant 64 : index
    %269 = vector.load %arg21[%c0_167, %c64] : memref<1x512xf32, #tpu.memory_space<vmem>>, vector<1x16xf32>
    tpu.vector_store %arg21[%c0_167, %c64], %268 {strides = array<i32>} : memref<1x512xf32, #tpu.memory_space<vmem>>, vector<1x16xf32>,
    %270 = vector.extract_strided_slice %259 {offsets = [5, 0], sizes = [1, 16], strides = [1, 1]} : vector<32x16xf32> to vector<1x16xf32>
    %c0_168 = arith.constant 0 : index
    %c80 = arith.constant 80 : index
    %271 = vector.load %arg21[%c0_168, %c80] : memref<1x512xf32, #tpu.memory_space<vmem>>, vector<1x16xf32>
    tpu.vector_store %arg21[%c0_168, %c80], %270 {strides = array<i32>} : memref<1x512xf32, #tpu.memory_space<vmem>>, vector<1x16xf32>,
    %272 = vector.extract_strided_slice %259 {offsets = [6, 0], sizes = [1, 16], strides = [1, 1]} : vector<32x16xf32> to vector<1x16xf32>
    %c0_169 = arith.constant 0 : index
    %c96 = arith.constant 96 : index
    %273 = vector.load %arg21[%c0_169, %c96] : memref<1x512xf32, #tpu.memory_space<vmem>>, vector<1x16xf32>
    tpu.vector_store %arg21[%c0_169, %c96], %272 {strides = array<i32>} : memref<1x512xf32, #tpu.memory_space<vmem>>, vector<1x16xf32>,
    %274 = vector.extract_strided_slice %259 {offsets = [7, 0], sizes = [1, 16], strides = [1, 1]} : vector<32x16xf32> to vector<1x16xf32>
    %c0_170 = arith.constant 0 : index
    %c112 = arith.constant 112 : index
    %275 = vector.load %arg21[%c0_170, %c112] : memref<1x512xf32, #tpu.memory_space<vmem>>, vector<1x16xf32>
    tpu.vector_store %arg21[%c0_170, %c112], %274 {strides = array<i32>} : memref<1x512xf32, #tpu.memory_space<vmem>>, vector<1x16xf32>,
    %276 = vector.extract_strided_slice %259 {offsets = [8, 0], sizes = [1, 16], strides = [1, 1]} : vector<32x16xf32> to vector<1x16xf32>
    %c0_171 = arith.constant 0 : index
    %c128 = arith.constant 128 : index
    %277 = vector.load %arg21[%c0_171, %c128] : memref<1x512xf32, #tpu.memory_space<vmem>>, vector<1x16xf32>
    tpu.vector_store %arg21[%c0_171, %c128], %276 {strides = array<i32>} : memref<1x512xf32, #tpu.memory_space<vmem>>, vector<1x16xf32>,
    %278 = vector.extract_strided_slice %259 {offsets = [9, 0], sizes = [1, 16], strides = [1, 1]} : vector<32x16xf32> to vector<1x16xf32>
    %c0_172 = arith.constant 0 : index
    %c144 = arith.constant 144 : index
    %279 = vector.load %arg21[%c0_172, %c144] : memref<1x512xf32, #tpu.memory_space<vmem>>, vector<1x16xf32>
    tpu.vector_store %arg21[%c0_172, %c144], %278 {strides = array<i32>} : memref<1x512xf32, #tpu.memory_space<vmem>>, vector<1x16xf32>,
    %280 = vector.extract_strided_slice %259 {offsets = [10, 0], sizes = [1, 16], strides = [1, 1]} : vector<32x16xf32> to vector<1x16xf32>
    %c0_173 = arith.constant 0 : index
    %c160 = arith.constant 160 : index
    %281 = vector.load %arg21[%c0_173, %c160] : memref<1x512xf32, #tpu.memory_space<vmem>>, vector<1x16xf32>
    tpu.vector_store %arg21[%c0_173, %c160], %280 {strides = array<i32>} : memref<1x512xf32, #tpu.memory_space<vmem>>, vector<1x16xf32>,
    %282 = vector.extract_strided_slice %259 {offsets = [11, 0], sizes = [1, 16], strides = [1, 1]} : vector<32x16xf32> to vector<1x16xf32>
    %c0_174 = arith.constant 0 : index
    %c176 = arith.constant 176 : index
    %283 = vector.load %arg21[%c0_174, %c176] : memref<1x512xf32, #tpu.memory_space<vmem>>, vector<1x16xf32>
    tpu.vector_store %arg21[%c0_174, %c176], %282 {strides = array<i32>} : memref<1x512xf32, #tpu.memory_space<vmem>>, vector<1x16xf32>,
    %284 = vector.extract_strided_slice %259 {offsets = [12, 0], sizes = [1, 16], strides = [1, 1]} : vector<32x16xf32> to vector<1x16xf32>
    %c0_175 = arith.constant 0 : index
    %c192 = arith.constant 192 : index
    %285 = vector.load %arg21[%c0_175, %c192] : memref<1x512xf32, #tpu.memory_space<vmem>>, vector<1x16xf32>
    tpu.vector_store %arg21[%c0_175, %c192], %284 {strides = array<i32>} : memref<1x512xf32, #tpu.memory_space<vmem>>, vector<1x16xf32>,
    %286 = vector.extract_strided_slice %259 {offsets = [13, 0], sizes = [1, 16], strides = [1, 1]} : vector<32x16xf32> to vector<1x16xf32>
    %c0_176 = arith.constant 0 : index
    %c208 = arith.constant 208 : index
    %287 = vector.load %arg21[%c0_176, %c208] : memref<1x512xf32, #tpu.memory_space<vmem>>, vector<1x16xf32>
    tpu.vector_store %arg21[%c0_176, %c208], %286 {strides = array<i32>} : memref<1x512xf32, #tpu.memory_space<vmem>>, vector<1x16xf32>,
    %288 = vector.extract_strided_slice %259 {offsets = [14, 0], sizes = [1, 16], strides = [1, 1]} : vector<32x16xf32> to vector<1x16xf32>
    %c0_177 = arith.constant 0 : index
    %c224 = arith.constant 224 : index
    %289 = vector.load %arg21[%c0_177, %c224] : memref<1x512xf32, #tpu.memory_space<vmem>>, vector<1x16xf32>
    tpu.vector_store %arg21[%c0_177, %c224], %288 {strides = array<i32>} : memref<1x512xf32, #tpu.memory_space<vmem>>, vector<1x16xf32>,
    %290 = vector.extract_strided_slice %259 {offsets = [15, 0], sizes = [1, 16], strides = [1, 1]} : vector<32x16xf32> to vector<1x16xf32>
    %c0_178 = arith.constant 0 : index
    %c240 = arith.constant 240 : index
    %291 = vector.load %arg21[%c0_178, %c240] : memref<1x512xf32, #tpu.memory_space<vmem>>, vector<1x16xf32>
    tpu.vector_store %arg21[%c0_178, %c240], %290 {strides = array<i32>} : memref<1x512xf32, #tpu.memory_space<vmem>>, vector<1x16xf32>,
    %292 = vector.extract_strided_slice %259 {offsets = [16, 0], sizes = [1, 16], strides = [1, 1]} : vector<32x16xf32> to vector<1x16xf32>
    %c0_179 = arith.constant 0 : index
    %c256 = arith.constant 256 : index
    %293 = vector.load %arg21[%c0_179, %c256] : memref<1x512xf32, #tpu.memory_space<vmem>>, vector<1x16xf32>
    tpu.vector_store %arg21[%c0_179, %c256], %292 {strides = array<i32>} : memref<1x512xf32, #tpu.memory_space<vmem>>, vector<1x16xf32>,
    %294 = vector.extract_strided_slice %259 {offsets = [17, 0], sizes = [1, 16], strides = [1, 1]} : vector<32x16xf32> to vector<1x16xf32>
    %c0_180 = arith.constant 0 : index
    %c272 = arith.constant 272 : index
    %295 = vector.load %arg21[%c0_180, %c272] : memref<1x512xf32, #tpu.memory_space<vmem>>, vector<1x16xf32>
    tpu.vector_store %arg21[%c0_180, %c272], %294 {strides = array<i32>} : memref<1x512xf32, #tpu.memory_space<vmem>>, vector<1x16xf32>,
    %296 = vector.extract_strided_slice %259 {offsets = [18, 0], sizes = [1, 16], strides = [1, 1]} : vector<32x16xf32> to vector<1x16xf32>
    %c0_181 = arith.constant 0 : index
    %c288 = arith.constant 288 : index
    %297 = vector.load %arg21[%c0_181, %c288] : memref<1x512xf32, #tpu.memory_space<vmem>>, vector<1x16xf32>
    tpu.vector_store %arg21[%c0_181, %c288], %296 {strides = array<i32>} : memref<1x512xf32, #tpu.memory_space<vmem>>, vector<1x16xf32>,
    %298 = vector.extract_strided_slice %259 {offsets = [19, 0], sizes = [1, 16], strides = [1, 1]} : vector<32x16xf32> to vector<1x16xf32>
    %c0_182 = arith.constant 0 : index
    %c304 = arith.constant 304 : index
    %299 = vector.load %arg21[%c0_182, %c304] : memref<1x512xf32, #tpu.memory_space<vmem>>, vector<1x16xf32>
    tpu.vector_store %arg21[%c0_182, %c304], %298 {strides = array<i32>} : memref<1x512xf32, #tpu.memory_space<vmem>>, vector<1x16xf32>,
    %300 = vector.extract_strided_slice %259 {offsets = [20, 0], sizes = [1, 16], strides = [1, 1]} : vector<32x16xf32> to vector<1x16xf32>
    %c0_183 = arith.constant 0 : index
    %c320 = arith.constant 320 : index
    %301 = vector.load %arg21[%c0_183, %c320] : memref<1x512xf32, #tpu.memory_space<vmem>>, vector<1x16xf32>
    tpu.vector_store %arg21[%c0_183, %c320], %300 {strides = array<i32>} : memref<1x512xf32, #tpu.memory_space<vmem>>, vector<1x16xf32>,
    %302 = vector.extract_strided_slice %259 {offsets = [21, 0], sizes = [1, 16], strides = [1, 1]} : vector<32x16xf32> to vector<1x16xf32>
    %c0_184 = arith.constant 0 : index
    %c336 = arith.constant 336 : index
    %303 = vector.load %arg21[%c0_184, %c336] : memref<1x512xf32, #tpu.memory_space<vmem>>, vector<1x16xf32>
    tpu.vector_store %arg21[%c0_184, %c336], %302 {strides = array<i32>} : memref<1x512xf32, #tpu.memory_space<vmem>>, vector<1x16xf32>,
    %304 = vector.extract_strided_slice %259 {offsets = [22, 0], sizes = [1, 16], strides = [1, 1]} : vector<32x16xf32> to vector<1x16xf32>
    %c0_185 = arith.constant 0 : index
    %c352 = arith.constant 352 : index
    %305 = vector.load %arg21[%c0_185, %c352] : memref<1x512xf32, #tpu.memory_space<vmem>>, vector<1x16xf32>
    tpu.vector_store %arg21[%c0_185, %c352], %304 {strides = array<i32>} : memref<1x512xf32, #tpu.memory_space<vmem>>, vector<1x16xf32>,
    %306 = vector.extract_strided_slice %259 {offsets = [23, 0], sizes = [1, 16], strides = [1, 1]} : vector<32x16xf32> to vector<1x16xf32>
    %c0_186 = arith.constant 0 : index
    %c368 = arith.constant 368 : index
    %307 = vector.load %arg21[%c0_186, %c368] : memref<1x512xf32, #tpu.memory_space<vmem>>, vector<1x16xf32>
    tpu.vector_store %arg21[%c0_186, %c368], %306 {strides = array<i32>} : memref<1x512xf32, #tpu.memory_space<vmem>>, vector<1x16xf32>,
    %308 = vector.extract_strided_slice %259 {offsets = [24, 0], sizes = [1, 16], strides = [1, 1]} : vector<32x16xf32> to vector<1x16xf32>
    %c0_187 = arith.constant 0 : index
    %c384 = arith.constant 384 : index
    %309 = vector.load %arg21[%c0_187, %c384] : memref<1x512xf32, #tpu.memory_space<vmem>>, vector<1x16xf32>
    tpu.vector_store %arg21[%c0_187, %c384], %308 {strides = array<i32>} : memref<1x512xf32, #tpu.memory_space<vmem>>, vector<1x16xf32>,
    %310 = vector.extract_strided_slice %259 {offsets = [25, 0], sizes = [1, 16], strides = [1, 1]} : vector<32x16xf32> to vector<1x16xf32>
    %c0_188 = arith.constant 0 : index
    %c400 = arith.constant 400 : index
    %311 = vector.load %arg21[%c0_188, %c400] : memref<1x512xf32, #tpu.memory_space<vmem>>, vector<1x16xf32>
    tpu.vector_store %arg21[%c0_188, %c400], %310 {strides = array<i32>} : memref<1x512xf32, #tpu.memory_space<vmem>>, vector<1x16xf32>,
    %312 = vector.extract_strided_slice %259 {offsets = [26, 0], sizes = [1, 16], strides = [1, 1]} : vector<32x16xf32> to vector<1x16xf32>
    %c0_189 = arith.constant 0 : index
    %c416 = arith.constant 416 : index
    %313 = vector.load %arg21[%c0_189, %c416] : memref<1x512xf32, #tpu.memory_space<vmem>>, vector<1x16xf32>
    tpu.vector_store %arg21[%c0_189, %c416], %312 {strides = array<i32>} : memref<1x512xf32, #tpu.memory_space<vmem>>, vector<1x16xf32>,
    %314 = vector.extract_strided_slice %259 {offsets = [27, 0], sizes = [1, 16], strides = [1, 1]} : vector<32x16xf32> to vector<1x16xf32>
    %c0_190 = arith.constant 0 : index
    %c432 = arith.constant 432 : index
    %315 = vector.load %arg21[%c0_190, %c432] : memref<1x512xf32, #tpu.memory_space<vmem>>, vector<1x16xf32>
    tpu.vector_store %arg21[%c0_190, %c432], %314 {strides = array<i32>} : memref<1x512xf32, #tpu.memory_space<vmem>>, vector<1x16xf32>,
    %316 = vector.extract_strided_slice %259 {offsets = [28, 0], sizes = [1, 16], strides = [1, 1]} : vector<32x16xf32> to vector<1x16xf32>
    %c0_191 = arith.constant 0 : index
    %c448 = arith.constant 448 : index
    %317 = vector.load %arg21[%c0_191, %c448] : memref<1x512xf32, #tpu.memory_space<vmem>>, vector<1x16xf32>
    tpu.vector_store %arg21[%c0_191, %c448], %316 {strides = array<i32>} : memref<1x512xf32, #tpu.memory_space<vmem>>, vector<1x16xf32>,
    %318 = vector.extract_strided_slice %259 {offsets = [29, 0], sizes = [1, 16], strides = [1, 1]} : vector<32x16xf32> to vector<1x16xf32>
    %c0_192 = arith.constant 0 : index
    %c464 = arith.constant 464 : index
    %319 = vector.load %arg21[%c0_192, %c464] : memref<1x512xf32, #tpu.memory_space<vmem>>, vector<1x16xf32>
    tpu.vector_store %arg21[%c0_192, %c464], %318 {strides = array<i32>} : memref<1x512xf32, #tpu.memory_space<vmem>>, vector<1x16xf32>,
    %320 = vector.extract_strided_slice %259 {offsets = [30, 0], sizes = [1, 16], strides = [1, 1]} : vector<32x16xf32> to vector<1x16xf32>
    %c0_193 = arith.constant 0 : index
    %c480 = arith.constant 480 : index
    %321 = vector.load %arg21[%c0_193, %c480] : memref<1x512xf32, #tpu.memory_space<vmem>>, vector<1x16xf32>
    tpu.vector_store %arg21[%c0_193, %c480], %320 {strides = array<i32>} : memref<1x512xf32, #tpu.memory_space<vmem>>, vector<1x16xf32>,
    %322 = vector.extract_strided_slice %259 {offsets = [31, 0], sizes = [1, 16], strides = [1, 1]} : vector<32x16xf32> to vector<1x16xf32>
    %c0_194 = arith.constant 0 : index
    %c496 = arith.constant 496 : index
    %323 = vector.load %arg21[%c0_194, %c496] : memref<1x512xf32, #tpu.memory_space<vmem>>, vector<1x16xf32>
    tpu.vector_store %arg21[%c0_194, %c496], %322 {strides = array<i32>} : memref<1x512xf32, #tpu.memory_space<vmem>>, vector<1x16xf32>,
    %c0_195 = arith.constant 0 : index
    %c0_196 = arith.constant 0 : index
    %324 = vector.load %arg21[%c0_195, %c0_196] : memref<1x512xf32, #tpu.memory_space<vmem>>, vector<1x512xf32>
    %c0_197 = arith.constant 0 : index
    %c0_198 = arith.constant 0 : index
    %325 = vector.load %arg16[%c0_197, %c0_198] : memref<512x64xf32, #tpu.memory_space<vmem>>, vector<512x64xf32>
    %cst_199 = arith.constant dense<0.000000e+00> : vector<1x64xf32>
    %326 = tpu.matmul %324, %325, %cst_199 {dimension_numbers = #tpu.dot_dimension_numbers<[1], [0], [0], [1], [0, 0, 1, 1], [], []>} : vector<1x512xf32>, vector<512x64xf32>, vector<1x64xf32> -> vector<1x64xf32>
    %c0_200 = arith.constant 0 : index
    %c0_201 = arith.constant 0 : index
    %327 = vector.load %arg17[%c0_200, %c0_201] : memref<1x64xf32, #tpu.memory_space<vmem>>, vector<1x64xf32>
    %328 = arith.addf %326, %327 : vector<1x64xf32>
    %cst_202 = arith.constant 0.000000e+00 : f32
    %329 = vector.broadcast %cst_202 : f32 to vector<1x64xf32>
    %330 = arith.cmpf ogt, %328, %329 : vector<1x64xf32>
    %cst_203 = arith.constant 0.00999999977 : f32
    %331 = vector.broadcast %cst_203 : f32 to vector<1x64xf32>
    %332 = arith.mulf %331, %328 : vector<1x64xf32>
    %333 = arith.select %330, %328, %332 : vector<1x64xi1>, vector<1x64xf32>
    %c0_204 = arith.constant 0 : index
    %c0_205 = arith.constant 0 : index
    %334 = vector.load %arg18[%c0_204, %c0_205] : memref<64x5xf32, #tpu.memory_space<vmem>>, vector<64x5xf32>
    %cst_206 = arith.constant dense<0.000000e+00> : vector<1x5xf32>
    %335 = tpu.matmul %333, %334, %cst_206 {dimension_numbers = #tpu.dot_dimension_numbers<[1], [0], [0], [1], [0, 0, 1, 1], [], []>} : vector<1x64xf32>, vector<64x5xf32>, vector<1x5xf32> -> vector<1x5xf32>
    %c0_207 = arith.constant 0 : index
    %c0_208 = arith.constant 0 : index
    %336 = vector.load %arg19[%c0_207, %c0_208] : memref<1x5xf32, #tpu.memory_space<vmem>>, vector<1x5xf32>
    %337 = arith.addf %335, %336 : vector<1x5xf32>
    %c0_209 = arith.constant 0 : index
    %c0_210 = arith.constant 0 : index
    %c0_211 = arith.constant 0 : index
    %338 = vector.load %arg20[%c0_209, %c0_210, %c0_211] : memref<1x1x5xf32, #tpu.memory_space<vmem>>, vector<1x1x5xf32>
    %339 = vector.shape_cast %338 : vector<1x1x5xf32> to vector<1x5xf32>
    %340 = vector.shape_cast %337 : vector<1x5xf32> to vector<1x1x5xf32>
    tpu.vector_store %arg20[%c0_209, %c0_210, %c0_211], %340 {strides = array<i32>} : memref<1x1x5xf32, #tpu.memory_space<vmem>>, vector<1x1x5xf32>,
    return
  }
  func.func @transform_0(%arg0: i32) -> (i32, i32, i32) {
    %c0_i32 = arith.constant 0 : i32
    %c0_i32_0 = arith.constant 0 : i32
    %c0_i32_1 = arith.constant 0 : i32
    return %arg0, %c0_i32, %c0_i32_0 : i32, i32, i32
  }
  func.func @transform_1(%arg0: i32) -> (i32, i32) {
    %c0_i32 = arith.constant 0 : i32
    %c0_i32_0 = arith.constant 0 : i32
    %c0_i32_1 = arith.constant 0 : i32
    return %c0_i32, %c0_i32_0 : i32, i32
  }
  func.func @transform_2(%arg0: i32) -> (i32, i32) {
    %c0_i32 = arith.constant 0 : i32
    %c0_i32_0 = arith.constant 0 : i32
    %c0_i32_1 = arith.constant 0 : i32
    return %c0_i32, %c0_i32_0 : i32, i32
  }
  func.func @transform_3(%arg0: i32) -> (i32, i32) {
    %c0_i32 = arith.constant 0 : i32
    %c0_i32_0 = arith.constant 0 : i32
    %c0_i32_1 = arith.constant 0 : i32
    return %c0_i32, %c0_i32_0 : i32, i32
  }
  func.func @transform_4(%arg0: i32) -> (i32, i32) {
    %c0_i32 = arith.constant 0 : i32
    %c0_i32_0 = arith.constant 0 : i32
    %c0_i32_1 = arith.constant 0 : i32
    return %c0_i32, %c0_i32_0 : i32, i32
  }
  func.func @transform_5(%arg0: i32) -> (i32, i32) {
    %c0_i32 = arith.constant 0 : i32
    %c0_i32_0 = arith.constant 0 : i32
    %c0_i32_1 = arith.constant 0 : i32
    return %c0_i32, %c0_i32_0 : i32, i32
  }
  func.func @transform_6(%arg0: i32) -> (i32, i32, i32) {
    %c0_i32 = arith.constant 0 : i32
    %c0_i32_0 = arith.constant 0 : i32
    %c0_i32_1 = arith.constant 0 : i32
    %c0_i32_2 = arith.constant 0 : i32
    return %c0_i32, %c0_i32_0, %c0_i32_1 : i32, i32, i32
  }
  func.func @transform_7(%arg0: i32) -> (i32, i32) {
    %c0_i32 = arith.constant 0 : i32
    %c0_i32_0 = arith.constant 0 : i32
    %c0_i32_1 = arith.constant 0 : i32
    return %c0_i32, %c0_i32_0 : i32, i32
  }
  func.func @transform_8(%arg0: i32) -> (i32, i32) {
    %c0_i32 = arith.constant 0 : i32
    %c0_i32_0 = arith.constant 0 : i32
    %c0_i32_1 = arith.constant 0 : i32
    return %c0_i32, %c0_i32_0 : i32, i32
  }
  func.func @transform_9(%arg0: i32) -> (i32, i32) {
    %c0_i32 = arith.constant 0 : i32
    %c0_i32_0 = arith.constant 0 : i32
    %c0_i32_1 = arith.constant 0 : i32
    return %c0_i32, %c0_i32_0 : i32, i32
  }
  func.func @transform_10(%arg0: i32) -> (i32, i32) {
    %c0_i32 = arith.constant 0 : i32
    %c0_i32_0 = arith.constant 0 : i32
    %c0_i32_1 = arith.constant 0 : i32
    return %c0_i32, %c0_i32_0 : i32, i32
  }
  func.func @transform_11(%arg0: i32) -> (i32, i32, i32) {
    %c0_i32 = arith.constant 0 : i32
    %c0_i32_0 = arith.constant 0 : i32
    %c0_i32_1 = arith.constant 0 : i32
    %c0_i32_2 = arith.constant 0 : i32
    return %c0_i32, %c0_i32_0, %c0_i32_1 : i32, i32, i32
  }
  func.func @transform_12(%arg0: i32) -> (i32, i32) {
    %c0_i32 = arith.constant 0 : i32
    %c0_i32_0 = arith.constant 0 : i32
    %c0_i32_1 = arith.constant 0 : i32
    return %c0_i32, %c0_i32_0 : i32, i32
  }
  func.func @transform_13(%arg0: i32) -> (i32, i32) {
    %c0_i32 = arith.constant 0 : i32
    %c0_i32_0 = arith.constant 0 : i32
    %c0_i32_1 = arith.constant 0 : i32
    return %c0_i32, %c0_i32_0 : i32, i32
  }
  func.func @transform_14(%arg0: i32) -> (i32, i32) {
    %c0_i32 = arith.constant 0 : i32
    %c0_i32_0 = arith.constant 0 : i32
    %c0_i32_1 = arith.constant 0 : i32
    return %c0_i32, %c0_i32_0 : i32, i32
  }
  func.func @transform_15(%arg0: i32) -> (i32, i32) {
    %c0_i32 = arith.constant 0 : i32
    %c0_i32_0 = arith.constant 0 : i32
    %c0_i32_1 = arith.constant 0 : i32
    return %c0_i32, %c0_i32_0 : i32, i32
  }
  func.func @transform_16(%arg0: i32) -> (i32, i32) {
    %c0_i32 = arith.constant 0 : i32
    %c0_i32_0 = arith.constant 0 : i32
    %c0_i32_1 = arith.constant 0 : i32
    return %c0_i32, %c0_i32_0 : i32, i32
  }
  func.func @transform_17(%arg0: i32) -> (i32, i32) {
    %c0_i32 = arith.constant 0 : i32
    %c0_i32_0 = arith.constant 0 : i32
    %c0_i32_1 = arith.constant 0 : i32
    return %c0_i32, %c0_i32_0 : i32, i32
  }
  func.func @transform_18(%arg0: i32) -> (i32, i32) {
    %c0_i32 = arith.constant 0 : i32
    %c0_i32_0 = arith.constant 0 : i32
    %c0_i32_1 = arith.constant 0 : i32
    return %c0_i32, %c0_i32_0 : i32, i32
  }
  func.func @transform_19(%arg0: i32) -> (i32, i32, i32) {
    %c0_i32 = arith.constant 0 : i32
    %c0_i32_0 = arith.constant 0 : i32
    %c0_i32_1 = arith.constant 0 : i32
    return %arg0, %c0_i32, %c0_i32_0 : i32, i32, i32
  }
}

</mosaic_0001>

<bundles_post_ra>
// kernel: discriminator_forward.1
= control target key start
LH: loop header
LB: loop body
LE: loop exit
PB: predicated region body
PF: predicated region fallthrough
CT: control target
= control target key end

     0   :  { %s11316_s0 = inlined_call_operand.vmem [shape: bf16[2,48,256], index: 0, kind: input, shape index: {}]   ;;  %s11317_s1 = inlined_call_operand.vmem [shape: bf16[8,48], index: 1, kind: input, shape index: {}]   ;;  %s11318_s2 = inlined_call_operand.vmem [shape: f32[8,1], index: 2, kind: input, shape index: {}]   ;;  %s11319_s3 = inlined_call_operand.vmem [shape: f32[8,1], index: 3, kind: input, shape index: {}]   ;;  %s11320_s4 = inlined_call_operand.vmem [shape: f32[8,1], index: 4, kind: input, shape index: {}]   ;;  %s11321_s5 = inlined_call_operand.vmem [shape: bf16[256,8], index: 5, kind: input, shape index: {}]   ;;  %s11322_s6 = inlined_call_operand.vmem [shape: bf16[16,256,64], index: 6, kind: input, shape index: {}]   ;;  %s11323_s7 = inlined_call_operand.vmem [shape: f32[16,1], index: 7, kind: input, shape index: {}]   ;;  %s11324_s8 = inlined_call_operand.vmem [shape: f32[16,1], index: 8, kind: input, shape index: {}]   ;;  %s11325_s9 = inlined_call_operand.vmem [shape: f32[16,1], index: 9, kind: input, shape index: {}]   ;;  %s11326_s10 = inlined_call_operand.vmem [shape: bf16[512,16], index: 10, kind: input, shape index: {}]   ;;  %s11327_s11 = inlined_call_operand.vmem [shape: bf16[16,64,16], index: 11, kind: input, shape index: {}]   ;;  %s11328_s12 = inlined_call_operand.vmem [shape: f32[32,1], index: 12, kind: input, shape index: {}]   ;;  %s11329_s13 = inlined_call_operand.vmem [shape: f32[32,1], index: 13, kind: input, shape index: {}]   ;;  %s11330_s14 = inlined_call_operand.vmem [shape: f32[32,1], index: 14, kind: input, shape index: {}]   ;;  %s11331_s15 = inlined_call_operand.vmem [shape: f32[512,64], index: 15, kind: input, shape index: {}]   ;;  %s11332_s16 = inlined_call_operand.vmem [shape: f32[1,64], index: 16, kind: input, shape index: {}]   ;;  %s11333_s17 = inlined_call_operand.vmem [shape: f32[64,5], index: 17, kind: input, shape index: {}]   ;;  %s11334_s18 = inlined_call_operand.vmem [shape: f32[1,5], index: 18, kind: input, shape index: {}]   ;;  %s11335_s19 = inlined_call_operand.vmem [shape: f32[2,1,5], index: 19, kind: output, shape index: {}]  }
   0x1   :  { %11336 = sst [smem:[#allocation3_spill]] %s11316_s0  ;;  %s9336_s0 = smov 0  }
   0x2   :  { %11337 = sst [smem:[#allocation4_spill]] %s11317_s1 }
   0x3   :  { %11338 = sst [smem:[#allocation5_spill]] %s11318_s2 }
   0x4   :  { %11339 = sst [smem:[#allocation6_spill]] %s11319_s3 }
   0x5 LB: > { %s6902_s30 = sadd.s32 4294967295, %s9223_s0   ;;  %p6906_p0 = scmp.ge.s32.totalorder %s9223_s0, 1  ;;  %s9223_s0 = sphi %s9336_s0, %s29_s0  }
   0x6   : > { %p537_p1 = scmp.lt.s32.totalorder %s9223_s0, 3 }
   0x8   : > { %p538_p2 = pnand %p6906_p0, %p537_p1 }
   0x9   : > { %p591_p3 = scmp.lt.s32.totalorder (!%p538_p2), %s6902_s30, 1  ;;  %s11340_s1 = sld [smem:[#allocation5_spill]] (!%p538_p2) }
   0xa   : > { %541 = sbr.rel (%p538_p2) target bundleno = 3010 (0xbc2), region = 96  ;;  %s11341_s24 = sld [smem:[#allocation3_spill]] (!%p538_p2) }
   0xb   : > { %s11342_s27 = sld [smem:[#allocation4_spill]] (!%p538_p2)  ;;  %s9227_s3 = smov (!%p538_p2), 16  }
   0xc   : > { %s11343_s20 = sld [smem:[#allocation6_spill]] (!%p538_p2)  ;;  %s9228_s26 = smov (!%p538_p2), 32  }
   0xf   : > { %v607_v0 = vld [vmem:[%s11340_s1] sm:$0xff]  ;;  %v9225_v1 = vmov 0   ;;  %s11359_s30 = smov (!%p591_p3, %s6902_s30), 1  ;;  %vm645_vm0 = vcmask 392192   ;;  %v3870_v27 = vld [vmem:[%s11323_s7 + $0x8] sm:$0xff]  ;;  %v8849_v28 = vld [vmem:[%s11322_s6 + $0xf8] sm:$0xff]  }
  0x10   : > { %681 = vmatprep.mubr.bf16.mxu0 %v9225_v1  ;;  %8824 = vset.pattern.permute.xlu0 %v9225_v1  ;;  %s8804_s22 = smul.u32 48, %s11359_s30  ;;  %v609_v25 = vld [vmem:[%s11320_s4] sm:$0xff]  ;;  %v8850_v29 = vld [vmem:[%s11322_s6 + $0xb8] sm:$0xff]   ;;  %v8852_v30 = vld [vmem:[%s11322_s6 + $0xf0] sm:$0xff]   ;;  %vm890_vm3 = vcmask 1043456   ;;  %vm841_vm4 = vcmask 64512   ;;  %s598_s21 = scalar_lea.vmem %s11335_s19, %s11359_s30 }
  0x11   : > { %612 = vperm.xlu0 %8824, %v607_v0   ;;  %8825 = vset.pattern.permute.xlu1 %v9225_v1  ;;  %v600_v8 = vld [vmem:[%s11342_s27] sm:$0xf]  ;;  %v8853_v31 = vld [vmem:[%s11322_s6 + $0xb0] sm:$0xff]   ;;  %v8855_v32 = vld [vmem:[%s11322_s6 + $0xe8] sm:$0xff]   ;;  %vm3887_vm5 = vcmask 523264   ;;  %vm4170_vm6 = vcmask 130048  }
  0x12   : > { %929 = vmatprep.mubr.bf16.mxu1 %v9225_v1  ;;  %s595_s25 = scalar_lea.vmem %s11341_s24, %s8804_s22  ;;  %v608_v9 = vld [vmem:[%s11343_s20] sm:$0xff]  ;;  %v8857_v33 = vld [vmem:[%s11322_s6 + $0xa8] sm:$0xff]   ;;  %v8844_v54 = vld [vmem:[%s11322_s6 + $0x1f8] sm:$0xff]   ;;  %s9229_s27 = smov 64  }
  0x13   : > { %v8826_v2 = vld [vmem:[%s595_s25 + $0x24] ss:$8 sps:$4 sm:$0xff]   ;;  %v8828_v3 = vld [vmem:[%s595_s25 + $0x20] ss:$8 sps:$4 sm:$0xff]   ;;  %v8829_v4 = vld [vmem:[%s595_s25 + $0x14] ss:$8 sps:$4 sm:$0xff]   ;;  %709 = vperm.xlu1 %8825, %v608_v9  }
  0x14   : > { %659 = vmatprep.subr.bf16.mxu0 %v8826_v2  ;;  %v8831_v5 = vld [vmem:[%s595_s25 + $0x10] ss:$8 sps:$4 sm:$0xff]   ;;  %v8832_v6 = vld [vmem:[%s595_s25 + $0x4] ss:$8 sps:$4 sm:$0xff]   ;;  %v8834_v7 = vld [vmem:[%s595_s25] ss:$8 sps:$4 sm:$0xff]  }
  0x15   : > { %660 = vmatpush1.bf16.msra.mxu0 %v8828_v3  ;;  %v3869_v26 = vld [vmem:[%s11323_s7] sm:$0xff]  ;;  %v8845_v57 = vld [vmem:[%s11322_s6 + $0x1b8] sm:$0xff]   ;;  %v8847_v58 = vld [vmem:[%s11322_s6 + $0x1f0] sm:$0xff]   ;;  %s9230_s1 = smov 48   ;;  %s9232_s22 = smov 96  }
  0x16   : > { %661 = vmatprep.subr.bf16.mxu0 %v8829_v4  ;;  %v8859_v34 = vld [vmem:[%s11322_s6 + $0xe0] sm:$0xff]   ;;  %v8848_v59 = vld [vmem:[%s11322_s6 + $0x1b0] sm:$0xff]   ;;  %v8854_v60 = vld [vmem:[%s11322_s6 + $0x1e8] sm:$0xff]  }
  0x17   : > { %v8860_v35 = vld [vmem:[%s11322_s6 + $0xa0] sm:$0xff]   ;;  %v8836_v61 = vld [vmem:[%s11321_s5 + $0x8] sm:$0xff]   ;;  %v8837_v63 = vld [vmem:[%s11321_s5 + $0x10] sm:$0xff]  }
  0x18   : > { %v8835_v56 = vld [vmem:[%s11321_s5] sm:$0xff]   ;;  %v8856_v62 = vld [vmem:[%s11322_s6 + $0x1a8] sm:$0xff]   ;;  %v8838_v0 = vld [vmem:[%s11321_s5 + $0x18] sm:$0xff]  }
  0x19   : > { %662 = vmatpush1.bf16.msra.mxu0 %v8831_v5  ;;  %v8839_v2 = vld [vmem:[%s11321_s5 + $0x20] sm:$0xff]   ;;  %v8840_v3 = vld [vmem:[%s11321_s5 + $0x28] sm:$0xff]   ;;  %v8841_v4 = vld [vmem:[%s11321_s5 + $0x30] sm:$0xff]  }
  0x1a   : > { %663 = vmatprep.subr.bf16.mxu0 %v8832_v6  ;;  %v8842_v5 = vld [vmem:[%s11321_s5 + $0x38] sm:$0xff]   ;;  %v8843_v6 = vld [vmem:[%s11321_s5 + $0x40] sm:$0xff]   ;;  %v8863_v9 = vld [vmem:[%s11322_s6 + $0xd0] sm:$0xff]  }
  0x1d   : > { %664 = vmatpush1.bf16.msra.mxu0 %v8834_v7  ;;  %v8861_v7 = vld [vmem:[%s11322_s6 + $0xd8] sm:$0xff]  }
  0x1e   : > { %7967 = vmatprep.subr.bf16.mxu0 %v8849_v28  ;;  %v8898_v28 = vld [vmem:[%s11322_s6 + $0x1c8] sm:$0xff]  }
  0x20   : > { %6914 = vmatmul.mubr.msk.bf16.vlgmr.msra.gmra.mxu0 %vm645_vm0, %v600_v8  ;;  %v8862_v8 = vld [vmem:[%s11322_s6 + $0x98] sm:$0xff]  }
  0x21   : > { %7968 = vmatpush3.bf16.msra.mxu0 %v8850_v29  ;;  %v8900_v29 = vld [vmem:[%s11322_s6 + $0x188] sm:$0xff]  }
  0x22   : > { %7969 = vmatprep.subr.bf16.mxu0 %v8852_v30  ;;  %v8902_v30 = vld [vmem:[%s11321_s5 + $0x78] sm:$0xff]  }
  0x25   : > { %7970 = vmatpush3.bf16.msra.mxu0 %v8853_v31  ;;  %v8908_v31 = vld [vmem:[%s11322_s6 + $0x180] sm:$0xff]  }
  0x26   : > { %7971 = vmatprep.subr.bf16.mxu0 %v8855_v32  ;;  %v8911_v32 = vld [vmem:[%s11322_s6 + $0x2f8] sm:$0xff]  }
  0x29   : > { %7972 = vmatpush3.bf16.msra.mxu0 %v8857_v33 }
  0x2a   : > { %7973 = vmatprep.subr.bf16.mxu0 %v8859_v34 }
  0x2d   : > { %7974 = vmatpush3.bf16.msra.mxu0 %v8860_v35 }
  0x2e   : > { %7975 = vmatprep.subr.bf16.mxu0 %v8861_v7  ;;  %v8888_v7 = vld [vmem:[%s11322_s6 + $0x48] sm:$0xff]  }
  0x31   : > { %7976 = vmatpush3.bf16.msra.mxu0 %v8862_v8  ;;  %v8919_v8 = vld [vmem:[%s11322_s6 + $0x2e8] sm:$0xff]  }
  0x32   : > { %7977 = vmatprep.subr.bf16.mxu0 %v8863_v9 }
  0x8c   : > { %v613_v10 = vpop.permute.xlu0 %612 }
  0x8e   : > { %v710_v36 = vpop.permute.xlu1 %709 }
  0xe0   : > { %v683_v11 = vpop.f32.mrf.mxu0 }
  0xe1   : > { %v684_v13 = vadd.f32 %v683_v11, %v613_v10  ;;  %v8864_v11 = vld [vmem:[%s11322_s6 + $0x90] sm:$0xff]  }
  0xe2   : > { %v685_v12 = vpop.f32.mrf.mxu0  ;;  %7978 = vmatpush3.bf16.msra.mxu0 %v8864_v11 }
  0xe3   : > { %v686_v14 = vadd.f32 %v685_v12, %v613_v10  ;;  %v8846_v10 = vld [vmem:[%s11321_s5 + $0x48] sm:$0xff]  }
  0xe4   : > { %v687_v15 = vpop.f32.mrf.mxu0  ;;  %v8866_v12 = vld [vmem:[%s11322_s6 + $0xc8] sm:$0xff]  }
  0xe5   : > { %v690_v16 = vadd.f32 %v686_v14, %v684_v13  ;;  %v8868_v15 = vld [vmem:[%s11322_s6 + $0x88] sm:$0xff]   ;;  %7979 = vmatprep.subr.bf16.mxu0 %v8866_v12 }
  0xe6   : > { %v688_v17 = vpop.f32.mrf.mxu0  ;;  %7980 = vmatpush3.bf16.msra.mxu0 %v8868_v15  ;;  %v8890_v12 = vld [vmem:[%s11322_s6 + $0x8] sm:$0xff]   ;;  %v8923_v15 = vld [vmem:[%s11322_s6 + $0x2e0] sm:$0xff]  }
  0xe7   : > { %691 = vadd.xlane.f32.xlu0 %v690_v16  ;;  %v8869_v16 = vld [vmem:[%s11322_s6 + $0xc0] sm:$0xff]   ;;  %v8851_v17 = vld [vmem:[%s11321_s5 + $0x50] sm:$0xff]  }
  0xe8   : > { %7981 = vmatprep.subr.bf16.mxu0 %v8869_v16 }
 0x170   : > { %v692_v18 = vpop.xlane.xlu0 %691 }
 0x171   : > { %v694_v19 = vmul.f32 0.00390625, %v692_v18  ;;  %v8870_v18 = vld [vmem:[%s11322_s6 + $0x80] sm:$0xff]  }
 0x172   : > { %7982 = vmatpush3.bf16.msra.mxu0 %v8870_v18  ;;  %v8892_v18 = vld [vmem:[%s11322_s6] sm:$0xff]  }
 0x173   : > { %v695_v20 = vsub.f32 %v684_v13, %v694_v19  ;;  %v696_v21 = vsub.f32 %v686_v14, %v694_v19  ;;  %v8865_v13 = vld [vmem:[%s11322_s6 + $0x1e0] sm:$0xff]   ;;  %v8871_v19 = vld [vmem:[%s11322_s6 + $0x78] sm:$0xff]  }
 0x174   : > { %v8867_v14 = vld [vmem:[%s11322_s6 + $0x1a0] sm:$0xff]   ;;  %7989 = vmatprep.subr.bf16.mxu0 %v8871_v19 }
 0x175   : > { %v697_v22 = vmul.f32 %v695_v20, %v695_v20  ;;  %v698_v23 = vmul.f32 %v696_v21, %v696_v21  ;;  %v8924_v19 = vld [vmem:[%s11322_s6 + $0x2a0] sm:$0xff]  }
 0x177   : > { %v699_v24 = vadd.f32 %v698_v23, %v697_v22  ;;  %v8878_v22 = vld [vmem:[%s11322_s6 + $0x198] sm:$0xff]   ;;  %v8873_v23 = vld [vmem:[%s11321_s5 + $0x60] sm:$0xff]  }
 0x179   : > { %700 = vadd.xlane.f32.xlu1 %v699_v24  ;;  %v8880_v24 = vld [vmem:[%s11321_s5 + $0x68] sm:$0xff]  }
 0x18a   : > { %716 = vperm.xlu1 %8825, %v609_v25   ;;  %v8887_v25 = vld [vmem:[%s11322_s6 + $0x1d0] sm:$0xff]  }
 0x18e   : > { %3877 = vperm.xlu1 %8825, %v3869_v26   ;;  %v8889_v26 = vld [vmem:[%s11322_s6 + $0x190] sm:$0xff]  }
 0x192   : > { %3882 = vperm.xlu1 %8825, %v3870_v27   ;;  %v8895_v27 = vld [vmem:[%s11321_s5 + $0x70] sm:$0xff]  }
 0x202   : > { %v701_v37 = vpop.xlane.xlu1 %700 }
 0x203   : > { %v702_v38 = vmul.f32 0.00390625, %v701_v37 }
 0x205   : > { %v703_v39 = vadd.f32 1e-05, %v702_v38 }
 0x206   : > { %v717_v45 = vpop.permute.xlu1 %716 }
 0x207   : > { %9203 = vrsqrt.f32 %v703_v39 }
 0x214   : > { %v9204_v40 = vpop.eup %9203 }
 0x215   : > { %v705_v41 = vmul.f32 %v9204_v40, %v695_v20  ;;  %v706_v42 = vmul.f32 %v9204_v40, %v696_v21  ;;  %v8858_v20 = vld [vmem:[%s11321_s5 + $0x58] sm:$0xff]  }
 0x216   : > { %v8876_v21 = vld [vmem:[%s11322_s6 + $0x1d8] sm:$0xff]  }
 0x217   : > { %v712_v43 = vmul.f32 %v710_v36, %v705_v41  ;;  %v713_v44 = vmul.f32 %v710_v36, %v706_v42  ;;  %v8872_v42 = vld [vmem:[%s11322_s6 + $0x38] sm:$0xff]  }
 0x219   : > { %v719_v46 = vadd.f32 %v717_v45, %v712_v43  ;;  %v720_v47 = vadd.f32 %v717_v45, %v713_v44  ;;  %v8874_v44 = vld [vmem:[%s11322_s6 + $0x70] sm:$0xff]  }
 0x21b   : > { %v723_v48 = vmul.f32 0.01, %v719_v46  ;;  %vm722_vm1 = vcmp.gt.f32.partialorder %v720_v47, 0.0  ;;  %v724_v49 = vmul.f32 0.01, %v720_v47  ;;  %vm721_vm2 = vcmp.gt.f32.partialorder %v719_v46, 0.0 }
 0x21d   : > { %v726_v50 = vsel %vm722_vm1, %v720_v47, %v724_v49  ;;  %v725_v51 = vsel %vm721_vm2, %v719_v46, %v723_v48  ;;  %v8875_v48 = vld [vmem:[%s11322_s6 + $0x30] sm:$0xff]   ;;  %v8877_v49 = vld [vmem:[%s11322_s6 + $0x68] sm:$0xff]  }
 0x21e   : > { %v760_v52 = vpack.c.bf16 %v726_v50, %v726_v50  ;;  %v759_v53 = vpack.c.bf16 %v725_v51, %v725_v51 }
 0x220   : > { %6931 = vmatprep.subr.msk.bf16.mxu1 %vm890_vm3, %v760_v52  ;;  %v892_v55 = vsel %vm890_vm3, %v759_v53, 0  ;;  %v8879_v52 = vld [vmem:[%s11322_s6 + $0x28] sm:$0xff]   ;;  %v8881_v53 = vld [vmem:[%s11322_s6 + $0x60] sm:$0xff]  }
 0x221   : > { %912 = vmatpush1.bf16.msra.mxu1 %v892_v55 }
 0x222   : > { %8033 = vmatprep.subr.bf16.mxu1 %v8844_v54 }
 0x224   : > { %6932 = vmatmul.mubr.msk.bf16.vlgmr.msra.gmra.mxu1 %vm841_vm4, %v8835_v56  ;;  %v8882_v56 = vld [vmem:[%s11322_s6 + $0x20] sm:$0xff]  }
 0x225   : > { %939 = vmatprep.mubr.bf16.mxu1 %v9225_v1  ;;  %8034 = vmatpush3.bf16.msra.mxu1 %v8845_v57  ;;  %v8883_v57 = vld [vmem:[%s11322_s6 + $0x58] sm:$0xff]  }
 0x226   : > { %8035 = vmatprep.subr.bf16.mxu1 %v8847_v58 }
 0x229   : > { %8036 = vmatpush3.bf16.msra.mxu1 %v8848_v59 }
 0x22a   : > { %8037 = vmatprep.subr.bf16.mxu1 %v8854_v60 }
 0x22c   : > { %6933 = vmatmul.mubr.msk.bf16.gmra.mxu1 %vm841_vm4, %v8836_v61  ;;  %v8884_v61 = vld [vmem:[%s11322_s6 + $0x18] sm:$0xff]  }
 0x22d   : > { %949 = vmatprep.mubr.bf16.mxu1 %v9225_v1  ;;  %8038 = vmatpush3.bf16.msra.mxu1 %v8856_v62 }
 0x22e   : > { %8039 = vmatprep.subr.bf16.mxu1 %v8865_v13  ;;  %v8920_v13 = vld [vmem:[%s11322_s6 + $0x2a8] sm:$0xff]  }
 0x231   : > { %8040 = vmatpush3.bf16.msra.mxu1 %v8867_v14  ;;  %v8891_v14 = vld [vmem:[%s11322_s6 + $0x40] sm:$0xff]  }
 0x232   : > { %8041 = vmatprep.subr.bf16.mxu1 %v8876_v21  ;;  %v8927_v21 = vld [vmem:[%s11322_s6 + $0x2d8] sm:$0xff]  }
 0x234   : > { %6934 = vmatmul.mubr.msk.bf16.gmra.mxu1 %vm841_vm4, %v8837_v63  ;;  %v8912_v63 = vld [vmem:[%s11322_s6 + $0x2b8] sm:$0xff]  }
 0x235   : > { %959 = vmatprep.mubr.bf16.mxu1 %v9225_v1  ;;  %8042 = vmatpush3.bf16.msra.mxu1 %v8878_v22 }
 0x236   : > { %8043 = vmatprep.subr.bf16.mxu1 %v8887_v25 }
 0x239   : > { %8044 = vmatpush3.bf16.msra.mxu1 %v8889_v26 }
 0x23a   : > { %8045 = vmatprep.subr.bf16.mxu1 %v8898_v28  ;;  %v8896_v28 = vld [vmem:[%s11322_s6 + $0x170] sm:$0xff]  }
 0x23c   : > { %6935 = vmatmul.mubr.msk.bf16.gmra.mxu1 %vm841_vm4, %v8838_v0  ;;  %v8885_v0 = vld [vmem:[%s11322_s6 + $0x50] sm:$0xff]  }
 0x23d   : > { %969 = vmatprep.mubr.bf16.mxu1 %v9225_v1  ;;  %8046 = vmatpush3.bf16.msra.mxu1 %v8900_v29  ;;  %v8928_v29 = vld [vmem:[%s11322_s6 + $0x298] sm:$0xff]  }
 0x244   : > { %6936 = vmatmul.mubr.msk.bf16.gmra.mxu1 %vm841_vm4, %v8839_v2  ;;  %v8915_v2 = vld [vmem:[%s11322_s6 + $0x2f0] sm:$0xff]  }
 0x245   : > { %979 = vmatprep.mubr.bf16.mxu1 %v9225_v1 }
 0x24c   : > { %6937 = vmatmul.mubr.msk.bf16.gmra.mxu1 %vm841_vm4, %v8840_v3 }
 0x24d   : > { %989 = vmatprep.mubr.bf16.mxu1 %v9225_v1 }
 0x254   : > { %6938 = vmatmul.mubr.msk.bf16.gmra.mxu1 %vm841_vm4, %v8841_v4 }
 0x255   : > { %999 = vmatprep.mubr.bf16.mxu1 %v9225_v1 }
 0x25c   : > { %6939 = vmatmul.mubr.msk.bf16.gmra.mxu1 %vm841_vm4, %v8842_v5  ;;  %v8886_v5 = vld [vmem:[%s11322_s6 + $0x10] sm:$0xff]  }
 0x25d   : > { %1009 = vmatprep.mubr.bf16.mxu1 %v9225_v1 }
 0x264   : > { %6940 = vmatmul.mubr.msk.bf16.gmra.mxu1 %vm841_vm4, %v8843_v6  ;;  %v8916_v6 = vld [vmem:[%s11322_s6 + $0x2b0] sm:$0xff]  }
 0x265   : > { %1019 = vmatprep.mubr.bf16.mxu1 %v9225_v1 }
 0x26c   : > { %6941 = vmatmul.mubr.msk.bf16.gmra.mxu1 %vm841_vm4, %v8846_v10 }
 0x26d   : > { %1029 = vmatprep.mubr.bf16.mxu1 %v9225_v1 }
 0x274   : > { %6942 = vmatmul.mubr.msk.bf16.gmra.mxu1 %vm841_vm4, %v8851_v17 }
 0x275   : > { %1039 = vmatprep.mubr.bf16.mxu1 %v9225_v1 }
 0x27c   : > { %6943 = vmatmul.mubr.msk.bf16.gmra.mxu1 %vm841_vm4, %v8858_v20  ;;  %v8893_v20 = vld [vmem:[%s11322_s6 + $0x178] sm:$0xff]  }
 0x27d   : > { %1049 = vmatprep.mubr.bf16.mxu1 %v9225_v1 }
 0x284   : > { %6944 = vmatmul.mubr.msk.bf16.gmra.mxu1 %vm841_vm4, %v8873_v23 }
 0x285   : > { %1059 = vmatprep.mubr.bf16.mxu1 %v9225_v1 }
 0x28c   : > { %6945 = vmatmul.mubr.msk.bf16.gmra.mxu1 %vm841_vm4, %v8880_v24  ;;  %v8894_v24 = vld [vmem:[%s11322_s6 + $0x138] sm:$0xff]  }
 0x28d   : > { %1069 = vmatprep.mubr.bf16.mxu1 %v9225_v1 }
 0x294   : > { %6946 = vmatmul.mubr.msk.bf16.gmra.mxu1 %vm841_vm4, %v8895_v27 }
 0x295   : > { %1079 = vmatprep.mubr.bf16.mxu1 %v9225_v1  ;;  %v8907_v1 = vld [vmem:[%s11322_s6 + $0x1c0] sm:$0xff]  }
 0x296   : > { %8047 = vmatprep.subr.bf16.mxu1 %v8907_v1  ;;  %v8931_v1 = vld [vmem:[%s11322_s6 + $0x2d0] sm:$0xff]  }
 0x297   : > { %8048 = vmatpush3.bf16.msra.mxu1 %v8908_v31 }
 0x298   : > { %8077 = vmatprep.subr.bf16.mxu1 %v8911_v32  ;;  %v8897_v32 = vld [vmem:[%s11322_s6 + $0x130] sm:$0xff]  }
 0x29c   : > { %6947 = vmatmul.mubr.msk.bf16.gmra.mxu1 %vm841_vm4, %v8902_v30 }
 0x2e4   : > { %v9553_v33 = vpop.f32.mrf.mxu1 }
 0x2e6   : > { %v933_v34 = vpop.f32.mrf.mxu1 }
 0x2e8   : > { %v9555_v35 = vpop.f32.mrf.mxu1 }
 0x2e9   : > { %v1090_v27 = vpack.c.bf16 %v9555_v35, %v9553_v33  ;;  %v8899_v33 = vld [vmem:[%s11322_s6 + $0x168] sm:$0xff]  }
 0x2ea   : > { %v937_v36 = vpop.f32.mrf.mxu1 }
 0x2eb   : > { %v1091_v46 = vpack.c.bf16 %v937_v36, %v933_v34  ;;  %v8932_v34 = vld [vmem:[%s11322_s6 + $0x290] sm:$0xff]   ;;  %v8935_v36 = vld [vmem:[%s11322_s6 + $0x2c8] sm:$0xff]  }
 0x2ec   : > { %v941_v37 = vpop.f32.mrf.mxu1 }
 0x2ee   : > { %v943_v38 = vpop.f32.mrf.mxu1 }
 0x2f0   : > { %v945_v39 = vpop.f32.mrf.mxu1 }
 0x2f1   : > { %v1092_v43 = vpack.c.bf16 %v945_v39, %v941_v37  ;;  %v8901_v39 = vld [vmem:[%s11322_s6 + $0x128] sm:$0xff]  }
 0x2f2   : > { %v947_v40 = vpop.f32.mrf.mxu1 }
 0x2f3   : > { %v1093_v41 = vpack.c.bf16 %v947_v40, %v943_v38  ;;  %v8903_v40 = vld [vmem:[%s11322_s6 + $0x160] sm:$0xff]  }
 0x2f4   : > { %v9563_v45 = vpop.f32.mrf.mxu1 }
 0x2f5   : > { %1315 = vmatprep.mubr.bf16.mxu0 %v1093_v41  ;;  %v8936_v41 = vld [vmem:[%s11322_s6 + $0x288] sm:$0xff]  }
 0x2f6   : > { %1316 = vmatmul.mubr.bf16.vlgmr.msra.gmra.mxu0 %v1092_v43  ;;  %v9565_v47 = vpop.f32.mrf.mxu1  ;;  %v8939_v43 = vld [vmem:[%s11322_s6 + $0x2c0] sm:$0xff]  }
 0x2f7   : > { %7990 = vmatpush3.bf16.msra.mxu0 %v8872_v42  ;;  %1452 = vmatprep.mubr.bf16.mxu0 %v1091_v46  ;;  %v8904_v46 = vld [vmem:[%s11322_s6 + $0x120] sm:$0xff]  }
 0x2f8   : > { %7991 = vmatprep.subr.bf16.mxu0 %v8874_v44  ;;  %v9573_v50 = vpop.f32.mrf.mxu1 }
 0x2fa   : > { %v9575_v51 = vpop.f32.mrf.mxu1 }
 0x2fb   : > { %7992 = vmatpush3.bf16.msra.mxu0 %v8875_v48  ;;  %v1095_v25 = vpack.c.bf16 %v9575_v51, %v9565_v47  ;;  %v8905_v47 = vld [vmem:[%s11322_s6 + $0x158] sm:$0xff]   ;;  %v8940_v48 = vld [vmem:[%s11322_s6 + $0x280] sm:$0xff]  }
 0x2fc   : > { %7993 = vmatprep.subr.bf16.mxu0 %v8877_v49  ;;  %v961_v54 = vpop.f32.mrf.mxu1  ;;  %v8943_v51 = vld [vmem:[%s11322_s6 + $0x3f8] sm:$0xff]  }
 0x2fe   : > { %v963_v55 = vpop.f32.mrf.mxu1 }
 0x2ff   : > { %7994 = vmatpush3.bf16.msra.mxu0 %v8879_v52 }
 0x300   : > { %7995 = vmatprep.subr.bf16.mxu0 %v8881_v53  ;;  %v965_v58 = vpop.f32.mrf.mxu1  ;;  %v8906_v53 = vld [vmem:[%s11322_s6 + $0x118] sm:$0xff]  }
 0x301   : > { %v1096_v59 = vpack.c.bf16 %v965_v58, %v961_v54  ;;  %v8947_v58 = vld [vmem:[%s11322_s6 + $0x3f0] sm:$0xff]  }
 0x302   : > { %v967_v60 = vpop.f32.mrf.mxu1 }
 0x303   : > { %7996 = vmatpush3.bf16.msra.mxu0 %v8882_v56  ;;  %v1097_v62 = vpack.c.bf16 %v967_v60, %v963_v55  ;;  %v8909_v55 = vld [vmem:[%s11322_s6 + $0x150] sm:$0xff]   ;;  %v8944_v56 = vld [vmem:[%s11322_s6 + $0x3b8] sm:$0xff]  }
 0x304   : > { %7997 = vmatprep.subr.bf16.mxu0 %v8883_v57  ;;  %v9601_v3 = vpop.f32.mrf.mxu1 }
 0x305   : > { %1794 = vmatprep.mubr.bf16.mxu1 %v1097_v62  ;;  %v8913_v62 = vld [vmem:[%s11322_s6 + $0x148] sm:$0xff]  }
 0x306   : > { %1795 = vmatmul.mubr.bf16.vlgmr.msra.gmra.mxu1 %v1096_v59  ;;  %v9603_v4 = vpop.f32.mrf.mxu1 }
 0x307   : > { %7998 = vmatpush3.bf16.msra.mxu0 %v8884_v61  ;;  %8078 = vmatpush3.bf16.msra.mxu1 %v8912_v63  ;;  %v8910_v61 = vld [vmem:[%s11322_s6 + $0x110] sm:$0xff]  }
 0x308   : > { %7999 = vmatprep.subr.bf16.mxu0 %v8885_v0  ;;  %8079 = vmatprep.subr.bf16.mxu1 %v8915_v2  ;;  %v9617_v9 = vpop.f32.mrf.mxu1  ;;  %v8948_v63 = vld [vmem:[%s11322_s6 + $0x3b0] sm:$0xff]   ;;  %v8951_v2 = vld [vmem:[%s11322_s6 + $0x3e8] sm:$0xff]  }
 0x309   : > { %v1098_v10 = vpack.c.bf16 %v9617_v9, %v9601_v3  ;;  %v8999_v3 = vld [vmem:[%s11322_s6 + $0x4c8] sm:$0xff]  }
 0x30a   : > { %v9621_v11 = vpop.f32.mrf.mxu1 }
 0x30b   : > { %8000 = vmatpush3.bf16.msra.mxu0 %v8886_v5  ;;  %8080 = vmatpush3.bf16.msra.mxu1 %v8916_v6 }
 0x30c   : > { %8001 = vmatprep.subr.bf16.mxu0 %v8888_v7  ;;  %8081 = vmatprep.subr.bf16.mxu1 %v8919_v8  ;;  %v9635_v16 = vpop.f32.mrf.mxu1  ;;  %v8914_v7 = vld [vmem:[%s11322_s6 + $0x108] sm:$0xff]   ;;  %v8917_v8 = vld [vmem:[%s11322_s6 + $0x140] sm:$0xff]  }
 0x30e   : > { %v983_v17 = vpop.f32.mrf.mxu1 }
 0x30f   : > { %8002 = vmatpush3.bf16.msra.mxu0 %v8890_v12  ;;  %8082 = vmatpush3.bf16.msra.mxu1 %v8920_v13  ;;  %v8952_v12 = vld [vmem:[%s11322_s6 + $0x3a8] sm:$0xff]  }
 0x310   : > { %8003 = vmatprep.subr.bf16.mxu0 %v8891_v14  ;;  %8083 = vmatprep.subr.bf16.mxu1 %v8923_v15  ;;  %v9649_v22 = vpop.f32.mrf.mxu1  ;;  %v8955_v14 = vld [vmem:[%s11322_s6 + $0x3e0] sm:$0xff]  }
 0x311   : > { %v1100_v54 = vpack.c.bf16 %v9649_v22, %v9635_v16  ;;  %v8918_v16 = vld [vmem:[%s11322_s6 + $0x100] sm:$0xff]   ;;  %v8922_v22 = vld [vmem:[%s11322_s6 + $0x238] sm:$0xff]  }
 0x312   : > { %v987_v23 = vpop.f32.mrf.mxu1 }
 0x313   : > { %8004 = vmatpush3.bf16.msra.mxu0 %v8892_v18  ;;  %8084 = vmatpush3.bf16.msra.mxu1 %v8924_v19  ;;  %v1101_v26 = vpack.c.bf16 %v987_v23, %v983_v17  ;;  %v8921_v17 = vld [vmem:[%s11322_s6 + $0x278] sm:$0xff]   ;;  %v8956_v18 = vld [vmem:[%s11322_s6 + $0x3a0] sm:$0xff]   ;;  %v1099_v23 = vpack.c.bf16 %v9621_v11, %v9603_v4  ;;  %v8963_v4 = vld [vmem:[%s11322_s6 + $0x3d0] sm:$0xff]  }
 0x314   : > { %8011 = vmatprep.subr.bf16.mxu0 %v8893_v20  ;;  %8085 = vmatprep.subr.bf16.mxu1 %v8927_v21  ;;  %v9664_v30 = vpop.f32.mrf.mxu1  ;;  %v8959_v20 = vld [vmem:[%s11322_s6 + $0x3d8] sm:$0xff]  }
 0x315   : > { %2138 = vmatprep.mubr.bf16.mxu1 %v1101_v26  ;;  %v8960_v26 = vld [vmem:[%s11322_s6 + $0x398] sm:$0xff]  }
 0x316   : > { %1453 = vmatmul.mubr.bf16.vlgmr.msra.gmra.mxu0 %v1090_v27  ;;  %v9669_v31 = vpop.f32.mrf.mxu1 }
 0x317   : > { %8012 = vmatpush3.bf16.msra.mxu0 %v8894_v24  ;;  %1622 = vmatprep.mubr.bf16.mxu0 %v1095_v25  ;;  %v1094_v24 = vpack.c.bf16 %v9573_v50, %v9563_v45  ;;  %v8925_v25 = vld [vmem:[%s11322_s6 + $0x270] sm:$0xff]   ;;  %v8929_v50 = vld [vmem:[%s11322_s6 + $0x268] sm:$0xff]  }
 0x318   : > { %8013 = vmatprep.subr.bf16.mxu0 %v8896_v28  ;;  %8086 = vmatpush3.bf16.msra.mxu1 %v8928_v29  ;;  %v9680_v35 = vpop.f32.mrf.mxu1  ;;  %v8926_v45 = vld [vmem:[%s11322_s6 + $0x230] sm:$0xff]  }
 0x319   : > { %8087 = vmatprep.subr.bf16.mxu1 %v8931_v1  ;;  %v1102_v37 = vpack.c.bf16 %v9680_v35, %v9664_v30  ;;  %v8964_v28 = vld [vmem:[%s11322_s6 + $0x390] sm:$0xff]   ;;  %v8967_v1 = vld [vmem:[%s11322_s6 + $0x3c8] sm:$0xff]  }
 0x31a   : > { %v9687_v38 = vpop.f32.mrf.mxu1  ;;  %v9031_v30 = vld [vmem:[%s11322_s6 + $0x5c8] sm:$0xff]  }
 0x31b   : > { %8014 = vmatpush3.bf16.msra.mxu0 %v8897_v32  ;;  %v8994_v35 = vld [vmem:[%s11322_s6 + $0x428] sm:$0xff]  }
 0x31c   : > { %8015 = vmatprep.subr.bf16.mxu0 %v8899_v33  ;;  %8088 = vmatpush3.bf16.msra.mxu1 %v8932_v34  ;;  %v9698_v42 = vpop.f32.mrf.mxu1  ;;  %v8930_v34 = vld [vmem:[%s11322_s6 + $0x228] sm:$0xff]  }
 0x31d   : > { %8089 = vmatprep.subr.bf16.mxu1 %v8935_v36  ;;  %v8933_v36 = vld [vmem:[%s11322_s6 + $0x260] sm:$0xff]  }
 0x31e   : > { %v1003_v44 = vpop.f32.mrf.mxu1 }
 0x31f   : > { %8016 = vmatpush3.bf16.msra.mxu0 %v8901_v39  ;;  %v8968_v39 = vld [vmem:[%s11322_s6 + $0x388] sm:$0xff]  }
 0x320   : > { %8017 = vmatprep.subr.bf16.mxu0 %v8903_v40  ;;  %8090 = vmatpush3.bf16.msra.mxu1 %v8936_v41  ;;  %v9712_v49 = vpop.f32.mrf.mxu1  ;;  %v8971_v41 = vld [vmem:[%s11322_s6 + $0x3c0] sm:$0xff]  }
 0x321   : > { %8091 = vmatprep.subr.bf16.mxu1 %v8939_v43 }
 0x322   : > { %v1007_v52 = vpop.f32.mrf.mxu1 }
 0x323   : > { %8018 = vmatpush3.bf16.msra.mxu0 %v8904_v46  ;;  %v1105_v59 = vpack.c.bf16 %v1007_v52, %v1003_v44  ;;  %v8934_v44 = vld [vmem:[%s11322_s6 + $0x220] sm:$0xff]   ;;  %v8937_v46 = vld [vmem:[%s11322_s6 + $0x258] sm:$0xff]  }
 0x324   : > { %8019 = vmatprep.subr.bf16.mxu0 %v8905_v47  ;;  %8092 = vmatpush3.bf16.msra.mxu1 %v8940_v48  ;;  %v9728_v57 = vpop.f32.mrf.mxu1  ;;  %v8972_v47 = vld [vmem:[%s11322_s6 + $0x380] sm:$0xff]  }
 0x325   : > { %8121 = vmatprep.subr.bf16.mxu1 %v8943_v51  ;;  %v8975_v51 = vld [vmem:[%s11322_s6 + $0x4f8] sm:$0xff]  }
 0x326   : > { %v9733_v60 = vpop.f32.mrf.mxu1 }
 0x327   : > { %8020 = vmatpush3.bf16.msra.mxu0 %v8906_v53  ;;  %2139 = vmatmul.mubr.bf16.vlgmr.msra.gmra.mxu1 %v1100_v54  ;;  %v8938_v53 = vld [vmem:[%s11322_s6 + $0x218] sm:$0xff]   ;;  %v1104_v54 = vpack.c.bf16 %v9712_v49, %v9698_v42 }
 0x328   : > { %8021 = vmatprep.subr.bf16.mxu0 %v8909_v55  ;;  %8122 = vmatpush3.bf16.msra.mxu1 %v8944_v56  ;;  %v9744_v0 = vpop.f32.mrf.mxu1  ;;  %v8941_v55 = vld [vmem:[%s11322_s6 + $0x250] sm:$0xff]   ;;  %v8976_v56 = vld [vmem:[%s11322_s6 + $0x4b8] sm:$0xff]  }
 0x329   : > { %8123 = vmatprep.subr.bf16.mxu1 %v8947_v58  ;;  %2482 = vmatprep.mubr.bf16.mxu1 %v1105_v59  ;;  %v1106_v5 = vpack.c.bf16 %v9744_v0, %v9728_v57  ;;  %v8979_v59 = vld [vmem:[%s11322_s6 + $0x4f0] sm:$0xff]   ;;  %v9063_v57 = vld [vmem:[%s11322_s6 + $0x6c8] sm:$0xff]  }
 0x32a   : > { %v9751_v6 = vpop.f32.mrf.mxu1 }
 0x32b   : > { %8022 = vmatpush3.bf16.msra.mxu0 %v8910_v61  ;;  %v8942_v61 = vld [vmem:[%s11322_s6 + $0x210] sm:$0xff]  }
 0x32c   : > { %8023 = vmatprep.subr.bf16.mxu0 %v8913_v62  ;;  %8124 = vmatpush3.bf16.msra.mxu1 %v8948_v63  ;;  %v9762_v13 = vpop.f32.mrf.mxu1  ;;  %v8945_v62 = vld [vmem:[%s11322_s6 + $0x248] sm:$0xff]   ;;  %v8980_v63 = vld [vmem:[%s11322_s6 + $0x4b0] sm:$0xff]  }
 0x32d   : > { %8125 = vmatprep.subr.bf16.mxu1 %v8951_v2 }
 0x32e   : > { %v9767_v15 = vpop.f32.mrf.mxu1 }
 0x32f   : > { %8024 = vmatpush3.bf16.msra.mxu0 %v8914_v7  ;;  %v8983_v7 = vld [vmem:[%s11322_s6 + $0x4e8] sm:$0xff]  }
 0x330   : > { %8025 = vmatprep.subr.bf16.mxu0 %v8917_v8  ;;  %8126 = vmatpush3.bf16.msra.mxu1 %v8952_v12  ;;  %v9778_v19 = vpop.f32.mrf.mxu1 }
 0x331   : > { %8127 = vmatprep.subr.bf16.mxu1 %v8955_v14  ;;  %v8946_v14 = vld [vmem:[%s11322_s6 + $0x208] sm:$0xff]  }
 0x332   : > { %v9783_v21 = vpop.f32.mrf.mxu1 }
 0x333   : > { %8026 = vmatpush3.bf16.msra.mxu0 %v8918_v16  ;;  %v1109_v42 = vpack.c.bf16 %v9783_v21, %v9767_v15  ;;  %v8949_v15 = vld [vmem:[%s11322_s6 + $0x240] sm:$0xff]   ;;  %v8984_v16 = vld [vmem:[%s11322_s6 + $0x4a8] sm:$0xff]  }
 0x334   : > { %8055 = vmatprep.subr.bf16.mxu0 %v8921_v17  ;;  %8128 = vmatpush3.bf16.msra.mxu1 %v8956_v18  ;;  %v9798_v27 = vpop.f32.mrf.mxu1  ;;  %v8987_v18 = vld [vmem:[%s11322_s6 + $0x4e0] sm:$0xff]  }
 0x335   : > { %8129 = vmatprep.subr.bf16.mxu1 %v8959_v20  ;;  %v8950_v20 = vld [vmem:[%s11322_s6 + $0x200] sm:$0xff]  }
 0x336   : > { %1623 = vmatmul.mubr.bf16.vlgmr.msra.gmra.mxu0 %v1094_v24  ;;  %v9803_v11 = vpop.f32.mrf.mxu1  ;;  %v8991_v24 = vld [vmem:[%s11322_s6 + $0x4d8] sm:$0xff]  }
 0x337   : > { %8056 = vmatpush3.bf16.msra.mxu0 %v8922_v22  ;;  %1966 = vmatprep.mubr.bf16.mxu0 %v1099_v23  ;;  %v8953_v22 = vld [vmem:[%s11322_s6 + $0x378] sm:$0xff]   ;;  %v8988_v23 = vld [vmem:[%s11322_s6 + $0x4a0] sm:$0xff]  }
 0x338   : > { %8057 = vmatprep.subr.bf16.mxu0 %v8925_v25  ;;  %8130 = vmatpush3.bf16.msra.mxu1 %v8960_v26  ;;  %v9814_v29 = vpop.f32.mrf.mxu1  ;;  %v8954_v25 = vld [vmem:[%s11322_s6 + $0x338] sm:$0xff]   ;;  %v1103_v26 = vpack.c.bf16 %v9687_v38, %v9669_v31  ;;  %v8958_v31 = vld [vmem:[%s11322_s6 + $0x330] sm:$0xff]  }
 0x339   : > { %8131 = vmatprep.subr.bf16.mxu1 %v8963_v4  ;;  %v1110_v32 = vpack.c.bf16 %v9814_v29, %v9798_v27  ;;  %v9095_v27 = vld [vmem:[%s11322_s6 + $0x7c8] sm:$0xff]  }
 0x33a   : > { %v9821_v33 = vpop.f32.mrf.mxu1  ;;  %v9058_v29 = vld [vmem:[%s11322_s6 + $0x628] sm:$0xff]  }
 0x33b   : > { %8058 = vmatpush3.bf16.msra.mxu0 %v8926_v45  ;;  %v8957_v45 = vld [vmem:[%s11322_s6 + $0x370] sm:$0xff]  }
 0x33c   : > { %8059 = vmatprep.subr.bf16.mxu0 %v8929_v50  ;;  %8132 = vmatpush3.bf16.msra.mxu1 %v8964_v28  ;;  %v9832_v40 = vpop.f32.mrf.mxu1  ;;  %v8992_v50 = vld [vmem:[%s11322_s6 + $0x498] sm:$0xff]   ;;  %v8995_v28 = vld [vmem:[%s11322_s6 + $0x4d0] sm:$0xff]  }
 0x33d   : > { %8133 = vmatprep.subr.bf16.mxu1 %v8967_v1  ;;  %v8961_v1 = vld [vmem:[%s11322_s6 + $0x368] sm:$0xff]  }
 0x33e   : > { %v9837_v43 = vpop.f32.mrf.mxu1 }
 0x33f   : > { %8060 = vmatpush3.bf16.msra.mxu0 %v8930_v34  ;;  %v8996_v34 = vld [vmem:[%s11322_s6 + $0x490] sm:$0xff]  }
 0x340   : > { %8061 = vmatprep.subr.bf16.mxu0 %v8933_v36  ;;  %8134 = vmatpush3.bf16.msra.mxu1 %v8968_v39  ;;  %v9848_v48 = vpop.f32.mrf.mxu1  ;;  %v8965_v39 = vld [vmem:[%s11322_s6 + $0x360] sm:$0xff]  }
 0x341   : > { %8135 = vmatprep.subr.bf16.mxu1 %v8971_v41  ;;  %v9000_v41 = vld [vmem:[%s11322_s6 + $0x488] sm:$0xff]  }
 0x342   : > { %v9853_v52 = vpop.f32.mrf.mxu1 }
 0x343   : > { %8062 = vmatpush3.bf16.msra.mxu0 %v8934_v44  ;;  %v9003_v44 = vld [vmem:[%s11322_s6 + $0x4c0] sm:$0xff]  }
 0x344   : > { %8063 = vmatprep.subr.bf16.mxu0 %v8937_v46  ;;  %8136 = vmatpush3.bf16.msra.mxu1 %v8972_v47  ;;  %v9866_v58 = vpop.f32.mrf.mxu1  ;;  %v8966_v47 = vld [vmem:[%s11322_s6 + $0x320] sm:$0xff]  }
 0x345   : > { %8165 = vmatprep.subr.bf16.mxu1 %v8975_v51 }
 0x346   : > { %v9873_v49 = vpop.f32.mrf.mxu1 }
 0x347   : > { %8064 = vmatpush3.bf16.msra.mxu0 %v8938_v53  ;;  %2483 = vmatmul.mubr.bf16.vlgmr.msra.gmra.mxu1 %v1104_v54  ;;  %v8969_v53 = vld [vmem:[%s11322_s6 + $0x358] sm:$0xff]   ;;  %v9004_v54 = vld [vmem:[%s11322_s6 + $0x480] sm:$0xff]  }
 0x348   : > { %8065 = vmatprep.subr.bf16.mxu0 %v8941_v55  ;;  %8166 = vmatpush3.bf16.msra.mxu1 %v8976_v56  ;;  %v9884_v2 = vpop.f32.mrf.mxu1  ;;  %v9007_v55 = vld [vmem:[%s11322_s6 + $0x5f8] sm:$0xff]  }
 0x349   : > { %8167 = vmatprep.subr.bf16.mxu1 %v8979_v59  ;;  %2826 = vmatprep.mubr.bf16.mxu1 %v1109_v42  ;;  %v1114_v8 = vpack.c.bf16 %v9884_v2, %v9866_v58  ;;  %v8970_v56 = vld [vmem:[%s11322_s6 + $0x318] sm:$0xff]   ;;  %v1108_v59 = vpack.c.bf16 %v9778_v19, %v9762_v13  ;;  %v8973_v42 = vld [vmem:[%s11322_s6 + $0x350] sm:$0xff]   ;;  %v8977_v19 = vld [vmem:[%s11322_s6 + $0x348] sm:$0xff]  }
 0x34a   : > { %v9891_v12 = vpop.f32.mrf.mxu1  ;;  %v8974_v13 = vld [vmem:[%s11322_s6 + $0x310] sm:$0xff]   ;;  %v9093_v58 = vld [vmem:[%s11322_s6 + $0x760] sm:$0xff]  }
 0x34b   : > { %8066 = vmatpush3.bf16.msra.mxu0 %v8942_v61  ;;  %v9008_v61 = vld [vmem:[%s11322_s6 + $0x5b8] sm:$0xff]   ;;  %v9094_v2 = vld [vmem:[%s11322_s6 + $0x720] sm:$0xff]  }
 0x34c   : > { %8067 = vmatprep.subr.bf16.mxu0 %v8945_v62  ;;  %8168 = vmatpush3.bf16.msra.mxu1 %v8980_v63  ;;  %v9902_v17 = vpop.f32.mrf.mxu1  ;;  %v9011_v62 = vld [vmem:[%s11322_s6 + $0x5f0] sm:$0xff]   ;;  %v1113_v63 = vpack.c.bf16 %v9853_v52, %v9837_v43  ;;  %v9015_v43 = vld [vmem:[%s11322_s6 + $0x5e8] sm:$0xff]  }
 0x34d   : > { %8169 = vmatprep.subr.bf16.mxu1 %v8983_v7  ;;  %v9012_v7 = vld [vmem:[%s11322_s6 + $0x5b0] sm:$0xff]   ;;  %v8978_v52 = vld [vmem:[%s11322_s6 + $0x308] sm:$0xff]  }
 0x34e   : > { %v9910_v21 = vpop.f32.mrf.mxu1 }
 0x34f   : > { %8068 = vmatpush3.bf16.msra.mxu0 %v8946_v14  ;;  %v8981_v14 = vld [vmem:[%s11322_s6 + $0x340] sm:$0xff]  }
 0x350   : > { %8069 = vmatprep.subr.bf16.mxu0 %v8949_v15  ;;  %8170 = vmatpush3.bf16.msra.mxu1 %v8984_v16  ;;  %v9926_v4 = vpop.f32.mrf.mxu1  ;;  %v9016_v15 = vld [vmem:[%s11322_s6 + $0x5a8] sm:$0xff]   ;;  %v9019_v16 = vld [vmem:[%s11322_s6 + $0x5e0] sm:$0xff]  }
 0x351   : > { %8171 = vmatprep.subr.bf16.mxu1 %v8987_v18  ;;  %v8982_v18 = vld [vmem:[%s11322_s6 + $0x300] sm:$0xff]  }
 0x352   : > { %v9943_v38 = vpop.f32.mrf.mxu1 }
 0x353   : > { %8070 = vmatpush3.bf16.msra.mxu0 %v8950_v20  ;;  %v8985_v20 = vld [vmem:[%s11322_s6 + $0x478] sm:$0xff]  }
 0x354   : > { %8099 = vmatprep.subr.bf16.mxu0 %v8953_v22  ;;  %8172 = vmatpush3.bf16.msra.mxu1 %v8988_v23  ;;  %v9954_v9 = vpop.f32.mrf.mxu1  ;;  %v9020_v22 = vld [vmem:[%s11322_s6 + $0x5a0] sm:$0xff]   ;;  %v9023_v23 = vld [vmem:[%s11322_s6 + $0x5d8] sm:$0xff]  }
 0x355   : > { %8173 = vmatprep.subr.bf16.mxu1 %v8991_v24  ;;  %v8986_v24 = vld [vmem:[%s11322_s6 + $0x438] sm:$0xff]  }
 0x356   : > { %1967 = vmatmul.mubr.bf16.vlgmr.msra.gmra.mxu0 %v1098_v10  ;;  %v8962_v10 = vld [vmem:[%s11322_s6 + $0x328] sm:$0xff]   ;;  %v9959_v36 = vpop.f32.mrf.mxu1 }
 0x357   : > { %8100 = vmatpush3.bf16.msra.mxu0 %v8954_v25  ;;  %2310 = vmatprep.mubr.bf16.mxu0 %v1103_v26  ;;  %v1107_v25 = vpack.c.bf16 %v9751_v6, %v9733_v60  ;;  %v8989_v26 = vld [vmem:[%s11322_s6 + $0x470] sm:$0xff]   ;;  %v8993_v6 = vld [vmem:[%s11322_s6 + $0x468] sm:$0xff]  }
 0x358   : > { %8101 = vmatprep.subr.bf16.mxu0 %v8957_v45  ;;  %8174 = vmatpush3.bf16.msra.mxu1 %v8992_v50  ;;  %v9970_v46 = vpop.f32.mrf.mxu1  ;;  %v9024_v45 = vld [vmem:[%s11322_s6 + $0x598] sm:$0xff]   ;;  %v9027_v50 = vld [vmem:[%s11322_s6 + $0x5d0] sm:$0xff]  }
 0x359   : > { %8175 = vmatprep.subr.bf16.mxu1 %v8995_v28  ;;  %v1118_v51 = vpack.c.bf16 %v9970_v46, %v9954_v9  ;;  %v8990_v60 = vld [vmem:[%s11322_s6 + $0x430] sm:$0xff]  }
 0x35a   : > { %v9028_v28 = vld [vmem:[%s11322_s6 + $0x590] sm:$0xff]  }
 0x35b   : > { %8102 = vmatpush3.bf16.msra.mxu0 %v8958_v31  ;;  %v9032_v31 = vld [vmem:[%s11322_s6 + $0x588] sm:$0xff]  }
 0x35c   : > { %8103 = vmatprep.subr.bf16.mxu0 %v8961_v1  ;;  %8176 = vmatpush3.bf16.msra.mxu1 %v8996_v34  ;;  %v9035_v1 = vld [vmem:[%s11322_s6 + $0x5c0] sm:$0xff]  }
 0x35d   : > { %8177 = vmatprep.subr.bf16.mxu1 %v8999_v3  ;;  %v8998_v34 = vld [vmem:[%s11322_s6 + $0x420] sm:$0xff]   ;;  %v9001_v3 = vld [vmem:[%s11322_s6 + $0x458] sm:$0xff]  }
 0x35f   : > { %8104 = vmatpush3.bf16.msra.mxu0 %v8962_v10  ;;  %v9036_v10 = vld [vmem:[%s11322_s6 + $0x580] sm:$0xff]  }
 0x360   : > { %8105 = vmatprep.subr.bf16.mxu0 %v8965_v39  ;;  %8178 = vmatpush3.bf16.msra.mxu1 %v9000_v41  ;;  %v9039_v39 = vld [vmem:[%s11322_s6 + $0x6f8] sm:$0xff]  }
 0x361   : > { %8179 = vmatprep.subr.bf16.mxu1 %v9003_v44  ;;  %v9002_v41 = vld [vmem:[%s11322_s6 + $0x418] sm:$0xff]   ;;  %v1112_v44 = vpack.c.bf16 %v9848_v48, %v9832_v40  ;;  %v9006_v40 = vld [vmem:[%s11322_s6 + $0x410] sm:$0xff]   ;;  %v9009_v48 = vld [vmem:[%s11322_s6 + $0x448] sm:$0xff]  }
 0x363   : > { %8106 = vmatpush3.bf16.msra.mxu0 %v8966_v47  ;;  %v9005_v47 = vld [vmem:[%s11322_s6 + $0x450] sm:$0xff]  }
 0x364   : > { %8107 = vmatprep.subr.bf16.mxu0 %v8969_v53  ;;  %8180 = vmatpush3.bf16.msra.mxu1 %v9004_v54  ;;  %v9040_v53 = vld [vmem:[%s11322_s6 + $0x6b8] sm:$0xff]   ;;  %v9043_v54 = vld [vmem:[%s11322_s6 + $0x6f0] sm:$0xff]  }
 0x365   : > { %8209 = vmatprep.subr.bf16.mxu1 %v9007_v55  ;;  %v1117_v55 = vpack.c.bf16 %v9943_v38, %v9910_v21  ;;  %v9047_v21 = vld [vmem:[%s11322_s6 + $0x6e8] sm:$0xff]  }
 0x366   : > { %v9010_v38 = vld [vmem:[%s11322_s6 + $0x408] sm:$0xff]  }
 0x367   : > { %8108 = vmatpush3.bf16.msra.mxu0 %v8970_v56  ;;  %2827 = vmatmul.mubr.bf16.vlgmr.msra.gmra.mxu1 %v1108_v59  ;;  %v9044_v56 = vld [vmem:[%s11322_s6 + $0x6b0] sm:$0xff]   ;;  %v9013_v59 = vld [vmem:[%s11322_s6 + $0x440] sm:$0xff]  }
 0x368   : > { %8109 = vmatprep.subr.bf16.mxu0 %v8973_v42  ;;  %8210 = vmatpush3.bf16.msra.mxu1 %v9008_v61  ;;  %v9048_v42 = vld [vmem:[%s11322_s6 + $0x6a8] sm:$0xff]   ;;  %v9051_v61 = vld [vmem:[%s11322_s6 + $0x6e0] sm:$0xff]  }
 0x369   : > { %8211 = vmatprep.subr.bf16.mxu1 %v9011_v62  ;;  %3170 = vmatprep.mubr.bf16.mxu1 %v1113_v63  ;;  %v9014_v62 = vld [vmem:[%s11322_s6 + $0x400] sm:$0xff]   ;;  %v9017_v63 = vld [vmem:[%s11322_s6 + $0x578] sm:$0xff]  }
 0x36b   : > { %8110 = vmatpush3.bf16.msra.mxu0 %v8974_v13  ;;  %v9052_v13 = vld [vmem:[%s11322_s6 + $0x6a0] sm:$0xff]  }
 0x36c   : > { %8111 = vmatprep.subr.bf16.mxu0 %v8977_v19  ;;  %8212 = vmatpush3.bf16.msra.mxu1 %v9012_v7  ;;  %v9055_v19 = vld [vmem:[%s11322_s6 + $0x6d8] sm:$0xff]   ;;  %v10143_v7 = vpop.f32.mrf.mxu1 }
 0x36d   : > { %8213 = vmatprep.subr.bf16.mxu1 %v9015_v43  ;;  %v9018_v43 = vld [vmem:[%s11322_s6 + $0x538] sm:$0xff]  }
 0x36f   : > { %8112 = vmatpush3.bf16.msra.mxu0 %v8978_v52  ;;  %v1111_v52 = vpack.c.bf16 %v9821_v33, %v9803_v11  ;;  %v10162_v11 = vpop.f32.mrf.mxu1  ;;  %v9022_v33 = vld [vmem:[%s11322_s6 + $0x530] sm:$0xff]  }
 0x370   : > { %8113 = vmatprep.subr.bf16.mxu0 %v8981_v14  ;;  %8214 = vmatpush3.bf16.msra.mxu1 %v9016_v15  ;;  %v9021_v14 = vld [vmem:[%s11322_s6 + $0x570] sm:$0xff]   ;;  %v9056_v15 = vld [vmem:[%s11322_s6 + $0x698] sm:$0xff]  }
 0x371   : > { %8215 = vmatprep.subr.bf16.mxu1 %v9019_v16  ;;  %v9059_v16 = vld [vmem:[%s11322_s6 + $0x6d0] sm:$0xff]   ;;  %v1083_v0 = vpop.f32.mrf.mxu1 }
 0x373   : > { %8114 = vmatpush3.bf16.msra.mxu0 %v8982_v18  ;;  %v9025_v18 = vld [vmem:[%s11322_s6 + $0x568] sm:$0xff]  }
 0x374   : > { %8143 = vmatprep.subr.bf16.mxu0 %v8985_v20  ;;  %8216 = vmatpush3.bf16.msra.mxu1 %v9020_v22  ;;  %v9060_v20 = vld [vmem:[%s11322_s6 + $0x690] sm:$0xff]   ;;  %v9029_v22 = vld [vmem:[%s11322_s6 + $0x560] sm:$0xff]  }
 0x375   : > { %8217 = vmatprep.subr.bf16.mxu1 %v9023_v23  ;;  %v9064_v23 = vld [vmem:[%s11322_s6 + $0x688] sm:$0xff]  }
 0x376   : > { %2311 = vmatmul.mubr.bf16.vlgmr.msra.gmra.mxu0 %v1102_v37  ;;  %v8997_v37 = vld [vmem:[%s11322_s6 + $0x460] sm:$0xff]  }
 0x377   : > { %8144 = vmatpush3.bf16.msra.mxu0 %v8986_v24  ;;  %2654 = vmatprep.mubr.bf16.mxu0 %v1107_v25  ;;  %v9067_v24 = vld [vmem:[%s11322_s6 + $0x6c0] sm:$0xff]   ;;  %v10188_v25 = vpop.f32.mrf.mxu1 }
 0x378   : > { %8145 = vmatprep.subr.bf16.mxu0 %v8989_v26  ;;  %8218 = vmatpush3.bf16.msra.mxu1 %v9024_v45  ;;  %v9030_v26 = vld [vmem:[%s11322_s6 + $0x520] sm:$0xff]   ;;  %v9033_v45 = vld [vmem:[%s11322_s6 + $0x558] sm:$0xff]  }
 0x379   : > { %8219 = vmatprep.subr.bf16.mxu1 %v9027_v50  ;;  %v9068_v50 = vld [vmem:[%s11322_s6 + $0x680] sm:$0xff]  }
 0x37b   : > { %8146 = vmatpush3.bf16.msra.mxu0 %v8990_v60  ;;  %v9071_v60 = vld [vmem:[%s11322_s6 + $0x7f8] sm:$0xff]  }
 0x37c   : > { %8147 = vmatprep.subr.bf16.mxu0 %v8993_v6  ;;  %8220 = vmatpush3.bf16.msra.mxu1 %v9028_v28  ;;  %v1087_v6 = vpop.f32.mrf.mxu1  ;;  %v9034_v28 = vld [vmem:[%s11322_s6 + $0x518] sm:$0xff]  }
 0x37d   : > { %8221 = vmatprep.subr.bf16.mxu1 %v9031_v30  ;;  %v1116_v30 = vpack.c.bf16 %v9926_v4, %v9902_v17  ;;  %v9038_v17 = vld [vmem:[%s11322_s6 + $0x510] sm:$0xff]   ;;  %v9041_v4 = vld [vmem:[%s11322_s6 + $0x548] sm:$0xff]  }
 0x37f   : > { %8148 = vmatpush3.bf16.msra.mxu0 %v8994_v35  ;;  %v9037_v35 = vld [vmem:[%s11322_s6 + $0x550] sm:$0xff]  }
 0x380   : > { %8149 = vmatprep.subr.bf16.mxu0 %v8997_v37  ;;  %8222 = vmatpush3.bf16.msra.mxu1 %v9032_v31  ;;  %v9072_v37 = vld [vmem:[%s11322_s6 + $0x7b8] sm:$0xff]   ;;  %v9075_v31 = vld [vmem:[%s11322_s6 + $0x7f0] sm:$0xff]  }
 0x381   : > { %8223 = vmatprep.subr.bf16.mxu1 %v9035_v1  ;;  %v1121_v1 = vpack.c.bf16 %v1087_v6, %v1083_v0  ;;  %v9085_v0 = vld [vmem:[%s11322_s6 + $0x770] sm:$0xff]  }
 0x383   : > { %8150 = vmatpush3.bf16.msra.mxu0 %v8998_v34  ;;  %v9076_v34 = vld [vmem:[%s11322_s6 + $0x7b0] sm:$0xff]  }
 0x384   : > { %8151 = vmatprep.subr.bf16.mxu0 %v9001_v3  ;;  %8224 = vmatpush3.bf16.msra.mxu1 %v9036_v10  ;;  %v9079_v3 = vld [vmem:[%s11322_s6 + $0x7e8] sm:$0xff]  }
 0x385   : > { %8253 = vmatprep.subr.bf16.mxu1 %v9039_v39  ;;  %v9042_v10 = vld [vmem:[%s11322_s6 + $0x508] sm:$0xff]   ;;  %v9045_v39 = vld [vmem:[%s11322_s6 + $0x540] sm:$0xff]  }
 0x387   : > { %8152 = vmatpush3.bf16.msra.mxu0 %v9002_v41  ;;  %3171 = vmatmul.mubr.bf16.vlgmr.msra.gmra.mxu1 %v1112_v44  ;;  %v9080_v41 = vld [vmem:[%s11322_s6 + $0x7a8] sm:$0xff]   ;;  %v9083_v44 = vld [vmem:[%s11322_s6 + $0x7e0] sm:$0xff]  }
 0x388   : > { %8153 = vmatprep.subr.bf16.mxu0 %v9005_v47  ;;  %8254 = vmatpush3.bf16.msra.mxu1 %v9040_v53  ;;  %v9046_v47 = vld [vmem:[%s11322_s6 + $0x500] sm:$0xff]   ;;  %v9049_v53 = vld [vmem:[%s11322_s6 + $0x678] sm:$0xff]  }
 0x389   : > { %8255 = vmatprep.subr.bf16.mxu1 %v9043_v54  ;;  %3514 = vmatprep.mubr.bf16.mxu1 %v1117_v55  ;;  %v9084_v54 = vld [vmem:[%s11322_s6 + $0x7a0] sm:$0xff]   ;;  %v9087_v55 = vld [vmem:[%s11322_s6 + $0x7d8] sm:$0xff]  }
 0x38b   : > { %8154 = vmatpush3.bf16.msra.mxu0 %v9006_v40  ;;  %v9050_v40 = vld [vmem:[%s11322_s6 + $0x638] sm:$0xff]  }
 0x38c   : > { %8155 = vmatprep.subr.bf16.mxu0 %v9009_v48  ;;  %8256 = vmatpush3.bf16.msra.mxu1 %v9044_v56  ;;  %v1115_v48 = vpack.c.bf16 %v9891_v12, %v9873_v49  ;;  %v9053_v56 = vld [vmem:[%s11322_s6 + $0x670] sm:$0xff]   ;;  %v9057_v12 = vld [vmem:[%s11322_s6 + $0x668] sm:$0xff]  }
 0x38d   : > { %8257 = vmatprep.subr.bf16.mxu1 %v9047_v21  ;;  %v9088_v21 = vld [vmem:[%s11322_s6 + $0x798] sm:$0xff]   ;;  %v9054_v49 = vld [vmem:[%s11322_s6 + $0x630] sm:$0xff]  }
 0x38f   : > { %8156 = vmatpush3.bf16.msra.mxu0 %v9010_v38  ;;  %v9091_v38 = vld [vmem:[%s11322_s6 + $0x7d0] sm:$0xff]  }
 0x390   : > { %8157 = vmatprep.subr.bf16.mxu0 %v9013_v59  ;;  %8258 = vmatpush3.bf16.msra.mxu1 %v9048_v42  ;;  %v9092_v59 = vld [vmem:[%s11322_s6 + $0x790] sm:$0xff]   ;;  %v9096_v42 = vld [vmem:[%s11322_s6 + $0x788] sm:$0xff]  }
 0x391   : > { %8259 = vmatprep.subr.bf16.mxu1 %v9051_v61  ;;  %v9099_v61 = vld [vmem:[%s11322_s6 + $0x7c0] sm:$0xff]  }
 0x393   : > { %8158 = vmatpush3.bf16.msra.mxu0 %v9014_v62  ;;  %v9062_v62 = vld [vmem:[%s11322_s6 + $0x620] sm:$0xff]  }
 0x394   : > { %8187 = vmatprep.subr.bf16.mxu0 %v9017_v63  ;;  %8260 = vmatpush3.bf16.msra.mxu1 %v9052_v13  ;;  %v9065_v63 = vld [vmem:[%s11322_s6 + $0x658] sm:$0xff]   ;;  %v9100_v13 = vld [vmem:[%s11322_s6 + $0x780] sm:$0xff]  }
 0x395   : > { %8261 = vmatprep.subr.bf16.mxu1 %v9055_v19  ;;  %v9066_v19 = vld [vmem:[%s11322_s6 + $0x618] sm:$0xff]  }
 0x396   : > { %2655 = vmatmul.mubr.bf16.vlgmr.msra.gmra.mxu0 %v1106_v5  ;;  %v9026_v5 = vld [vmem:[%s11322_s6 + $0x528] sm:$0xff]  }
 0x397   : > { %8188 = vmatpush3.bf16.msra.mxu0 %v9018_v43  ;;  %2998 = vmatprep.mubr.bf16.mxu0 %v1111_v52  ;;  %v1120_v43 = vpack.c.bf16 %v10188_v25, %v10162_v11  ;;  %v9069_v52 = vld [vmem:[%s11322_s6 + $0x650] sm:$0xff]   ;;  %v9077_v11 = vld [vmem:[%s11322_s6 + $0x640] sm:$0xff]   ;;  %v9103_v25 = vld [vmem:[%s11322_s6 + $0x748] sm:$0xff]  }
 0x398   : > { %8189 = vmatprep.subr.bf16.mxu0 %v9021_v14  ;;  %8262 = vmatpush3.bf16.msra.mxu1 %v9056_v15  ;;  %v9070_v14 = vld [vmem:[%s11322_s6 + $0x610] sm:$0xff]   ;;  %v9073_v15 = vld [vmem:[%s11322_s6 + $0x648] sm:$0xff]  }
 0x399   : > { %8263 = vmatprep.subr.bf16.mxu1 %v9059_v16  ;;  %v9074_v16 = vld [vmem:[%s11322_s6 + $0x608] sm:$0xff]  }
 0x39b   : > { %8190 = vmatpush3.bf16.msra.mxu0 %v9022_v33  ;;  %v9078_v33 = vld [vmem:[%s11322_s6 + $0x600] sm:$0xff]  }
 0x39c   : > { %8191 = vmatprep.subr.bf16.mxu0 %v9025_v18  ;;  %8264 = vmatpush3.bf16.msra.mxu1 %v9060_v20  ;;  %v9081_v18 = vld [vmem:[%s11322_s6 + $0x778] sm:$0xff]  }
 0x39d   : > { %8265 = vmatprep.subr.bf16.mxu1 %v9063_v57  ;;  %v9082_v20 = vld [vmem:[%s11322_s6 + $0x738] sm:$0xff]   ;;  %v1119_v57 = vpack.c.bf16 %v10143_v7, %v9959_v36  ;;  %v9089_v36 = vld [vmem:[%s11322_s6 + $0x768] sm:$0xff]  }
 0x39e   : > { %v9090_v7 = vld [vmem:[%s11322_s6 + $0x728] sm:$0xff]  }
 0x39f   : > { %8192 = vmatpush3.bf16.msra.mxu0 %v9026_v5  ;;  %v9086_v5 = vld [vmem:[%s11322_s6 + $0x730] sm:$0xff]  }
 0x3a0   : > { %8193 = vmatprep.subr.bf16.mxu0 %v9029_v22  ;;  %8266 = vmatpush3.bf16.msra.mxu1 %v9064_v23  ;;  %v9098_v22 = vld [vmem:[%s11322_s6 + $0x718] sm:$0xff]   ;;  %v9101_v23 = vld [vmem:[%s11322_s6 + $0x750] sm:$0xff]  }
 0x3a1   : > { %8267 = vmatprep.subr.bf16.mxu1 %v9067_v24  ;;  %v9102_v24 = vld [vmem:[%s11322_s6 + $0x710] sm:$0xff]  }
 0x3a3   : > { %8194 = vmatpush3.bf16.msra.mxu0 %v9030_v26  ;;  %v9104_v26 = vld [vmem:[%s11322_s6 + $0x708] sm:$0xff]  }
 0x3a4   : > { %8195 = vmatprep.subr.bf16.mxu0 %v9033_v45  ;;  %8268 = vmatpush3.bf16.msra.mxu1 %v9068_v50  ;;  %v9105_v45 = vld [vmem:[%s11322_s6 + $0x740] sm:$0xff]  }
 0x3a5   : > { %8297 = vmatprep.subr.bf16.mxu1 %v9071_v60  ;;  %v9106_v50 = vld [vmem:[%s11322_s6 + $0x700] sm:$0xff]  }
 0x3a7   : > { %8196 = vmatpush3.bf16.msra.mxu0 %v9034_v28  ;;  %3515 = vmatmul.mubr.bf16.vlgmr.msra.gmra.mxu1 %v1116_v30 }
 0x3a8   : > { %8197 = vmatprep.subr.bf16.mxu0 %v9037_v35  ;;  %8298 = vmatpush3.bf16.msra.mxu1 %v9072_v37 }
 0x3a9   : > { %8299 = vmatprep.subr.bf16.mxu1 %v9075_v31  ;;  %3858 = vmatprep.mubr.bf16.mxu1 %v1121_v1 }
 0x3ab   : > { %8198 = vmatpush3.bf16.msra.mxu0 %v9038_v17 }
 0x3ac   : > { %8199 = vmatprep.subr.bf16.mxu0 %v9041_v4  ;;  %8300 = vmatpush3.bf16.msra.mxu1 %v9076_v34 }
 0x3ad   : > { %8301 = vmatprep.subr.bf16.mxu1 %v9079_v3 }
 0x3af   : > { %8200 = vmatpush3.bf16.msra.mxu0 %v9042_v10 }
 0x3b0   : > { %8201 = vmatprep.subr.bf16.mxu0 %v9045_v39  ;;  %8302 = vmatpush3.bf16.msra.mxu1 %v9080_v41 }
 0x3b1   : > { %8303 = vmatprep.subr.bf16.mxu1 %v9083_v44 }
 0x3b3   : > { %8202 = vmatpush3.bf16.msra.mxu0 %v9046_v47 }
 0x3b4   : > { %8231 = vmatprep.subr.bf16.mxu0 %v9049_v53  ;;  %8304 = vmatpush3.bf16.msra.mxu1 %v9084_v54 }
 0x3b5   : > { %8305 = vmatprep.subr.bf16.mxu1 %v9087_v55 }
 0x3b6   : > { %2999 = vmatmul.mubr.bf16.vlgmr.msra.gmra.mxu0 %v1110_v32  ;;  %v9061_v32 = vld [vmem:[%s11322_s6 + $0x660] sm:$0xff]   ;;  %v7983_v60 = vpop.f32.mrf.mxu0 }
 0x3b7   : > { %8232 = vmatpush3.bf16.msra.mxu0 %v9050_v40  ;;  %3342 = vmatprep.mubr.bf16.mxu0 %v1115_v48 }
 0x3b8   : > { %8233 = vmatprep.subr.bf16.mxu0 %v9053_v56  ;;  %8306 = vmatpush3.bf16.msra.mxu1 %v9088_v21  ;;  %v7984_v6 = vpop.f32.mrf.mxu0 }
 0x3b9   : > { %8307 = vmatprep.subr.bf16.mxu1 %v9091_v38 }
 0x3ba   : > { %v7986_v28 = vpop.f32.mrf.mxu0 }
 0x3bb   : > { %8234 = vmatpush3.bf16.msra.mxu0 %v9054_v49 }
 0x3bc   : > { %8235 = vmatprep.subr.bf16.mxu0 %v9057_v12  ;;  %8308 = vmatpush3.bf16.msra.mxu1 %v9092_v59  ;;  %v7987_v30 = vpop.f32.mrf.mxu0 }
 0x3bd   : > { %8309 = vmatprep.subr.bf16.mxu1 %v9095_v27 }
 0x3bf   : > { %8236 = vmatpush3.bf16.msra.mxu0 %v9058_v29 }
 0x3c0   : > { %8237 = vmatprep.subr.bf16.mxu0 %v9061_v32  ;;  %8310 = vmatpush3.bf16.msra.mxu1 %v9096_v42 }
 0x3c1   : > { %8311 = vmatprep.subr.bf16.mxu1 %v9099_v61 }
 0x3c3   : > { %8238 = vmatpush3.bf16.msra.mxu0 %v9062_v62 }
 0x3c4   : > { %8239 = vmatprep.subr.bf16.mxu0 %v9065_v63  ;;  %8312 = vmatpush3.bf16.msra.mxu1 %v9100_v13 }
 0x3c6   : > { %v8049_v1 = vpop.f32.mrf.mxu1 }
 0x3c7   : > { %8240 = vmatpush3.bf16.msra.mxu0 %v9066_v19  ;;  %3859 = vmatmul.mubr.bf16.vlgmr.msra.gmra.mxu1 %v1120_v43  ;;  %v7985_v43 = vadd.f32 %v7984_v6, %v7983_v60 }
 0x3c8   : > { %8241 = vmatprep.subr.bf16.mxu0 %v9069_v52  ;;  %v8050_v4 = vpop.f32.mrf.mxu1 }
 0x3ca   : > { %v8052_v3 = vpop.f32.mrf.mxu1 }
 0x3cb   : > { %8242 = vmatpush3.bf16.msra.mxu0 %v9070_v14 }
 0x3cc   : > { %8243 = vmatprep.subr.bf16.mxu0 %v9073_v15  ;;  %v8053_v39 = vpop.f32.mrf.mxu1 }
 0x3cf   : > { %8244 = vmatpush3.bf16.msra.mxu0 %v9074_v16 }
 0x3d0   : > { %8245 = vmatprep.subr.bf16.mxu0 %v9077_v11 }
 0x3d3   : > { %8246 = vmatpush3.bf16.msra.mxu0 %v9078_v33  ;;  %v7988_v33 = vadd.f32 %v7987_v30, %v7986_v28 }
 0x3d4   : > { %8275 = vmatprep.subr.bf16.mxu0 %v9081_v18 }
 0x3d6   : > { %3343 = vmatmul.mubr.bf16.vlgmr.msra.gmra.mxu0 %v1114_v8  ;;  %v9097_v8 = vld [vmem:[%s11322_s6 + $0x758] sm:$0xff]   ;;  %v8005_v35 = vpop.f32.mrf.mxu0 }
 0x3d7   : > { %8276 = vmatpush3.bf16.msra.mxu0 %v9082_v20  ;;  %3686 = vmatprep.mubr.bf16.mxu0 %v1119_v57 }
 0x3d8   : > { %8277 = vmatprep.subr.bf16.mxu0 %v9085_v0  ;;  %v8006_v37 = vpop.f32.mrf.mxu0 }
 0x3d9   : > { %v8007_v63 = vadd.f32 %v8006_v37, %v8005_v35 }
 0x3da   : > { %v8008_v31 = vpop.f32.mrf.mxu0 }
 0x3db   : > { %8278 = vmatpush3.bf16.msra.mxu0 %v9086_v5  ;;  %v1455_v15 = vadd.f32 %v8007_v63, %v7985_v43 }
 0x3dc   : > { %8279 = vmatprep.subr.bf16.mxu0 %v9089_v36  ;;  %v8009_v17 = vpop.f32.mrf.mxu0  ;;  %v8051_v36 = vadd.f32 %v8050_v4, %v8049_v1 }
 0x3dd   : > { %v8010_v16 = vadd.f32 %v8009_v17, %v8008_v31 }
 0x3df   : > { %8280 = vmatpush3.bf16.msra.mxu0 %v9090_v7  ;;  %v1458_v5 = vadd.f32 %v8010_v16, %v7988_v33 }
 0x3e0   : > { %8281 = vmatprep.subr.bf16.mxu0 %v9093_v58 }
 0x3e3   : > { %8282 = vmatpush3.bf16.msra.mxu0 %v9094_v2 }
 0x3e4   : > { %8283 = vmatprep.subr.bf16.mxu0 %v9097_v8 }
 0x3e7   : > { %8284 = vmatpush3.bf16.msra.mxu0 %v9098_v22  ;;  %v8093_v44 = vpop.f32.mrf.mxu1 }
 0x3e8   : > { %8285 = vmatprep.subr.bf16.mxu0 %v9101_v23  ;;  %v8054_v23 = vadd.f32 %v8053_v39, %v8052_v3 }
 0x3e9   : > { %v8094_v53 = vpop.f32.mrf.mxu1 }
 0x3eb   : > { %8286 = vmatpush3.bf16.msra.mxu0 %v9102_v24  ;;  %v8096_v46 = vpop.f32.mrf.mxu1 }
 0x3ec   : > { %8287 = vmatprep.subr.bf16.mxu0 %v9103_v25 }
 0x3ed   : > { %v8097_v54 = vpop.f32.mrf.mxu1 }
 0x3ee   : > { %v8098_v37 = vadd.f32 %v8097_v54, %v8096_v46 }
 0x3ef   : > { %8288 = vmatpush3.bf16.msra.mxu0 %v9104_v26  ;;  %v8095_v26 = vadd.f32 %v8094_v53, %v8093_v44 }
 0x3f0   : > { %8289 = vmatprep.subr.bf16.mxu0 %v9105_v45 }
 0x3f3   : > { %8290 = vmatpush3.bf16.msra.mxu0 %v9106_v50 }
 0x3f6   : > { %3687 = vmatmul.mubr.bf16.vlgmr.msra.gmra.mxu0 %v1118_v51  ;;  %v8027_v34 = vpop.f32.mrf.mxu0 }
 0x3f8   : > { %v8028_v10 = vpop.f32.mrf.mxu0 }
 0x3f9   : > { %v8029_v52 = vadd.f32 %v8028_v10, %v8027_v34 }
 0x3fa   : > { %v8030_v41 = vpop.f32.mrf.mxu0 }
 0x3fb   : > { %v1631_v18 = vadd.f32 %v8029_v52, %v1455_v15 }
 0x3fc   : > { %v8031_v47 = vpop.f32.mrf.mxu0 }
 0x3fd   : > { %v8032_v20 = vadd.f32 %v8031_v47, %v8030_v41  ;;  %v1803_v2 = vadd.f32 %v8051_v36, %v1631_v18 }
 0x3ff   : > { %v1632_v58 = vadd.f32 %v8032_v20, %v1458_v5 }
 0x401   : > { %v1804_v45 = vadd.f32 %v8054_v23, %v1632_v58 }
 0x407   : > { %v8137_v40 = vpop.f32.mrf.mxu1 }
 0x409   : > { %v8138_v56 = vpop.f32.mrf.mxu1 }
 0x40a   : > { %v8139_v4 = vadd.f32 %v8138_v56, %v8137_v40 }
 0x40b   : > { %v8140_v38 = vpop.f32.mrf.mxu1 }
 0x40d   : > { %v8141_v12 = vpop.f32.mrf.mxu1 }
 0x416   : > { %v8071_v9 = vpop.f32.mrf.mxu0 }
 0x418   : > { %v8072_v51 = vpop.f32.mrf.mxu0 }
 0x419   : > { %v8073_v7 = vadd.f32 %v8072_v51, %v8071_v9  ;;  %v8142_v9 = vadd.f32 %v8141_v12, %v8140_v38 }
 0x41a   : > { %v8074_v55 = vpop.f32.mrf.mxu0 }
 0x41b   : > { %v1975_v24 = vadd.f32 %v8073_v7, %v1803_v2  ;;  %v3878_v7 = vpop.permute.xlu1 %3877 }
 0x41c   : > { %v8075_v48 = vpop.f32.mrf.mxu0 }
 0x41d   : > { %v8076_v25 = vadd.f32 %v8075_v48, %v8074_v55  ;;  %v2147_v30 = vadd.f32 %v8095_v26, %v1975_v24 }
 0x41f   : > { %v1976_v28 = vadd.f32 %v8076_v25, %v1804_v45 }
 0x421   : > { %v2148_v34 = vadd.f32 %v8098_v37, %v1976_v28  ;;  %v6054_v37 = vld [vmem:[%s11328_s12 + $0x18] sm:$0xff] }
 0x427   : > { %v8181_v27 = vpop.f32.mrf.mxu1 }
 0x429   : > { %v8182_v32 = vpop.f32.mrf.mxu1 }
 0x42a   : > { %v8183_v48 = vadd.f32 %v8182_v32, %v8181_v27 }
 0x42b   : > { %v8184_v61 = vpop.f32.mrf.mxu1 }
 0x42d   : > { %v8185_v13 = vpop.f32.mrf.mxu1 }
 0x436   : > { %v8115_v21 = vpop.f32.mrf.mxu0 }
 0x438   : > { %v8116_v49 = vpop.f32.mrf.mxu0 }
 0x439   : > { %v8117_v50 = vadd.f32 %v8116_v49, %v8115_v21 }
 0x43a   : > { %v8118_v59 = vpop.f32.mrf.mxu0 }
 0x43b   : > { %v2319_v31 = vadd.f32 %v8117_v50, %v2147_v30 }
 0x43c   : > { %v8119_v29 = vpop.f32.mrf.mxu0 }
 0x43d   : > { %v8120_v17 = vadd.f32 %v8119_v29, %v8118_v59  ;;  %v2491_v39 = vadd.f32 %v8139_v4, %v2319_v31  ;;  %v8186_v29 = vadd.f32 %v8185_v13, %v8184_v61  ;;  %v3871_v31 = vld [vmem:[%s11324_s8] sm:$0xff] }
 0x43f   : > { %v2320_v3 = vadd.f32 %v8120_v17, %v2148_v34  ;;  %v3872_v17 = vld [vmem:[%s11324_s8 + $0x8] sm:$0xff] }
 0x441   : > { %v2492_v21 = vadd.f32 %v8142_v9, %v2320_v3 }
 0x447   : > { %v8225_v14 = vpop.f32.mrf.mxu1 }
 0x449   : > { %v8226_v57 = vpop.f32.mrf.mxu1 }
 0x44b   : > { %v8228_v8 = vpop.f32.mrf.mxu1 }
 0x44d   : > { %v8229_v60 = vpop.f32.mrf.mxu1 }
 0x44e   : > { %v8230_v16 = vadd.f32 %v8229_v60, %v8228_v8 }
 0x456   : > { %v8159_v42 = vpop.f32.mrf.mxu0 }
 0x458   : > { %v8160_v62 = vpop.f32.mrf.mxu0 }
 0x459   : > { %v8161_v10 = vadd.f32 %v8160_v62, %v8159_v42  ;;  %v8227_v62 = vadd.f32 %v8226_v57, %v8225_v14 }
 0x45a   : > { %v8162_v19 = vpop.f32.mrf.mxu0 }
 0x45b   : > { %v2663_v44 = vadd.f32 %v8161_v10, %v2491_v39 }
 0x45c   : > { %v8163_v11 = vpop.f32.mrf.mxu0 }
 0x45d   : > { %v8164_v53 = vadd.f32 %v8163_v11, %v8162_v19  ;;  %v2835_v46 = vadd.f32 %v8183_v48, %v2663_v44  ;;  %v6053_v48 = vld [vmem:[%s11328_s12 + $0x10] sm:$0xff] }
 0x45f   : > { %v2664_v63 = vadd.f32 %v8164_v53, %v2492_v21  ;;  %v3874_v53 = vld [vmem:[%s11325_s9 + $0x8] sm:$0xff]  ;;  %v9107_v21 = vld [vmem:[%s11326_s10] sm:$0xff]  }
 0x460   : > { %8529 = vmatprep.mubr.msk.bf16.mxu0 %vm4170_vm6, %v9107_v21  ;;  %v10567_v21 = vld [vmem:[%s11327_s11 + $0x118] sm:$0xff]  }
 0x461   : > { %v2836_v43 = vadd.f32 %v8186_v29, %v2664_v63 }
 0x467   : > { %v8269_v35 = vpop.f32.mrf.mxu1 }
 0x469   : > { %v8270_v41 = vpop.f32.mrf.mxu1 }
 0x46a   : > { %v8271_v33 = vadd.f32 %v8270_v41, %v8269_v35  ;;  %v3873_v35 = vld [vmem:[%s11325_s9] sm:$0xff] }
 0x46b   : > { %v8272_v51 = vpop.f32.mrf.mxu1 }
 0x46d   : > { %v8273_v54 = vpop.f32.mrf.mxu1 }
 0x46e   : > { %v8274_v14 = vadd.f32 %v8273_v54, %v8272_v51  ;;  %v6051_v51 = vld [vmem:[%s11328_s12] sm:$0xff] }
 0x476   : > { %v8203_v0 = vpop.f32.mrf.mxu0 }
 0x478   : > { %v8204_v22 = vpop.f32.mrf.mxu0 }
 0x479   : > { %v8205_v49 = vadd.f32 %v8204_v22, %v8203_v0 }
 0x47a   : > { %v8206_v6 = vpop.f32.mrf.mxu0 }
 0x47b   : > { %v3007_v40 = vadd.f32 %v8205_v49, %v2835_v46 }
 0x47c   : > { %v8207_v1 = vpop.f32.mrf.mxu0 }
 0x47d   : > { %v8208_v56 = vadd.f32 %v8207_v1, %v8206_v6  ;;  %v3179_v12 = vadd.f32 %v8227_v62, %v3007_v40  ;;  %v3883_v6 = vpop.permute.xlu1 %3882 }
 0x47f   : > { %v3008_v38 = vadd.f32 %v8208_v56, %v2836_v43 }
 0x481   : > { %v3180_v18 = vadd.f32 %v8230_v16, %v3008_v38 }
 0x487   : > { %v8313_v42 = vpop.f32.mrf.mxu1 }
 0x489   : > { %v8314_v19 = vpop.f32.mrf.mxu1 }
 0x48a   : > { %v8315_v57 = vadd.f32 %v8314_v19, %v8313_v42 }
 0x48b   : > { %v8316_v20 = vpop.f32.mrf.mxu1 }
 0x48d   : > { %v8317_v2 = vpop.f32.mrf.mxu1 }
 0x48e   : > { %v8318_v25 = vadd.f32 %v8317_v2, %v8316_v20  ;;  %v9116_v2 = vld [vmem:[%s11326_s10 + $0x48] sm:$0xff]  }
 0x496   : > { %v8247_v47 = vpop.f32.mrf.mxu0 }
 0x498   : > { %v8248_v55 = vpop.f32.mrf.mxu0 }
 0x499   : > { %v8249_v52 = vadd.f32 %v8248_v55, %v8247_v47  ;;  %v6052_v55 = vld [vmem:[%s11328_s12 + $0x8] sm:$0xff] }
 0x49a   : > { %v8250_v59 = vpop.f32.mrf.mxu0 }
 0x49b   : > { %v3351_v11 = vadd.f32 %v8249_v52, %v3179_v12 }
 0x49c   : > { %v8251_v15 = vpop.f32.mrf.mxu0 }
 0x49d   : > { %v8252_v27 = vadd.f32 %v8251_v15, %v8250_v59  ;;  %v3523_v61 = vadd.f32 %v8271_v33, %v3351_v11 }
 0x49f   : > { %v3352_v5 = vadd.f32 %v8252_v27, %v3180_v18 }
 0x4a1   : > { %v3524_v23 = vadd.f32 %v8274_v14, %v3352_v5  ;;  %v9108_v5 = vld [vmem:[%s11326_s10 + $0x8] sm:$0xff]   ;;  %v9113_v14 = vld [vmem:[%s11326_s10 + $0x30] sm:$0xff]  }
 0x4b6   : > { %v8291_v32 = vpop.f32.mrf.mxu0 }
 0x4b8   : > { %v8292_v0 = vpop.f32.mrf.mxu0 }
 0x4b9   : > { %v8293_v13 = vadd.f32 %v8292_v0, %v8291_v32  ;;  %v9139_v0 = vld [vmem:[%s11327_s11 + $0xd8] sm:$0xff]  }
 0x4ba   : > { %v8294_v36 = vpop.f32.mrf.mxu0 }
 0x4bb   : > { %v3695_v58 = vadd.f32 %v8293_v13, %v3523_v61  ;;  %v9109_v61 = vld [vmem:[%s11326_s10 + $0x10] sm:$0xff]   ;;  %v9110_v13 = vld [vmem:[%s11326_s10 + $0x18] sm:$0xff]  }
 0x4bc   : > { %v8295_v22 = vpop.f32.mrf.mxu0 }
 0x4bd   : > { %v8296_v24 = vadd.f32 %v8295_v22, %v8294_v36  ;;  %v3867_v8 = vadd.f32 %v8315_v57, %v3695_v58  ;;  %v9111_v36 = vld [vmem:[%s11326_s10 + $0x20] sm:$0xff]   ;;  %v9114_v57 = vld [vmem:[%s11326_s10 + $0x38] sm:$0xff]   ;;  %v9117_v22 = vld [vmem:[%s11326_s10 + $0x50] sm:$0xff]  }
 0x4be   : > { %v9115_v58 = vld [vmem:[%s11326_s10 + $0x40] sm:$0xff]  }
 0x4bf   : > { %v3696_v26 = vadd.f32 %v8296_v24, %v3524_v23  ;;  %v3885_v45 = vadd.f32 %v3878_v7, %v3867_v8  ;;  %v9112_v7 = vld [vmem:[%s11326_s10 + $0x28] sm:$0xff]   ;;  %v9118_v23 = vld [vmem:[%s11326_s10 + $0x58] sm:$0xff]   ;;  %v9119_v24 = vld [vmem:[%s11326_s10 + $0x60] sm:$0xff]  }
 0x4c0   : > { %v9120_v8 = vld [vmem:[%s11326_s10 + $0x68] sm:$0xff]  }
 0x4c1   : > { %v3888_v50 = vsel %vm3887_vm5, %v3885_v45, 0.0  ;;  %v3868_v60 = vadd.f32 %v8318_v25, %v3696_v26  ;;  %v9121_v25 = vld [vmem:[%s11326_s10 + $0x70] sm:$0xff]   ;;  %v9122_v26 = vld [vmem:[%s11326_s10 + $0x78] sm:$0xff]  }
 0x4c2   : > { %3889 = vadd.xlane.f32.xlu1 %v3888_v50  ;;  %v9124_v50 = vld [vmem:[%s11326_s10 + $0x88] sm:$0xff]  }
 0x4c3   : > { %v3886_v28 = vadd.f32 %v3883_v6, %v3868_v60  ;;  %v9125_v60 = vld [vmem:[%s11326_s10 + $0x90] sm:$0xff]   ;;  %v9140_v6 = vld [vmem:[%s11327_s11 + $0x38] sm:$0xff]  }
 0x4c4   : > { %8593 = vmatprep.subr.bf16.mxu1 %v9140_v6 }
 0x4c5   : > { %v3891_v30 = vsel %vm3887_vm5, %v3886_v28, 0.0  ;;  %8594 = vmatpush3.bf16.msra.mxu1 %v9140_v6  ;;  %v9156_v6 = vld [vmem:[%s11327_s11 + $0x68] sm:$0xff]  }
 0x4c6   : > { %3892 = vadd.xlane.f32.xlu0 %v3891_v30  ;;  %v9126_v30 = vld [vmem:[%s11326_s10 + $0x98] sm:$0xff]  }
 0x4d3   : > { %3929 = vperm.xlu1 %8825, %v3873_v35   ;;  %v9127_v35 = vld [vmem:[%s11326_s10 + $0xa0] sm:$0xff]  }
 0x4d7   : > { %6080 = vperm.xlu1 %8825, %v6054_v37   ;;  %v9142_v37 = vld [vmem:[%s11327_s11 + $0x28] sm:$0xff]  }
 0x4dc   : > { %3917 = vperm.xlu0 %8824, %v3871_v31   ;;  %v9143_v31 = vld [vmem:[%s11327_s11 + $0x20] sm:$0xff]  }
 0x4e0   : > { %3922 = vperm.xlu0 %8824, %v3872_v17   ;;  %v9128_v17 = vld [vmem:[%s11326_s10 + $0xa8] sm:$0xff]  }
 0x54b   : > { %v3890_v1 = vpop.xlane.xlu1 %3889 }
 0x54c   : > { %v3895_v4 = vmul.f32 0.015625, %v3890_v1  ;;  %v9129_v1 = vld [vmem:[%s11326_s10 + $0xb0] sm:$0xff]  }
 0x54e   : > { %v3897_v34 = vsub.f32 %v3885_v45, %v3895_v4  ;;  %v9123_v45 = vld [vmem:[%s11326_s10 + $0x80] sm:$0xff]   ;;  %v9144_v4 = vld [vmem:[%s11327_s11 + $0x18] sm:$0xff]  }
 0x54f   : > { %v3893_v10 = vpop.xlane.xlu0 %3892  ;;  %v3930_v15 = vpop.permute.xlu1 %3929 }
 0x550   : > { %v3896_v41 = vmul.f32 0.015625, %v3893_v10  ;;  %v3899_v47 = vmul.f32 %v3897_v34, %v3897_v34  ;;  %v9130_v10 = vld [vmem:[%s11326_s10 + $0xb8] sm:$0xff]  }
 0x552   : > { %v3898_v3 = vsub.f32 %v3886_v28, %v3896_v41  ;;  %v3901_v39 = vsel %vm3887_vm5, %v3899_v47, 0.0  ;;  %v9141_v28 = vld [vmem:[%s11327_s11 + $0x30] sm:$0xff]   ;;  %v9131_v41 = vld [vmem:[%s11326_s10 + $0xc0] sm:$0xff]   ;;  %v9132_v47 = vld [vmem:[%s11326_s10 + $0xc8] sm:$0xff]  }
 0x553   : > { %3902 = vadd.xlane.f32.xlu0 %v3901_v39  ;;  %8595 = vmatprep.subr.bf16.mxu1 %v9141_v28  ;;  %v9134_v39 = vld [vmem:[%s11326_s10 + $0xd8] sm:$0xff]  }
 0x554   : > { %v3900_v9 = vmul.f32 %v3898_v3, %v3898_v3  ;;  %8596 = vmatpush3.bf16.msra.mxu1 %v9141_v28 }
 0x555   : > { %8597 = vmatprep.subr.bf16.mxu1 %v9142_v37 }
 0x556   : > { %v3904_v44 = vsel %vm3887_vm5, %v3900_v9, 0.0  ;;  %v9135_v9 = vld [vmem:[%s11326_s10 + $0xe0] sm:$0xff]  }
 0x557   : > { %3905 = vadd.xlane.f32.xlu0 %v3904_v44  ;;  %v3918_v49 = vpop.permute.xlu0 %3917  ;;  %v9136_v44 = vld [vmem:[%s11326_s10 + $0xe8] sm:$0xff]  }
 0x558   : > { %8598 = vmatpush3.bf16.msra.mxu1 %v9142_v37 }
 0x559   : > { %8599 = vmatprep.subr.bf16.mxu1 %v9143_v31 }
 0x55b   : > { %v3923_v63 = vpop.permute.xlu0 %3922 }
 0x55c   : > { %8600 = vmatpush3.bf16.msra.mxu1 %v9143_v31  ;;  %v9157_v31 = vld [vmem:[%s11327_s11 + $0x60] sm:$0xff]  }
 0x55d   : > { %8605 = vmatprep.subr.bf16.mxu1 %v9144_v4 }
 0x56d   : > { %3934 = vperm.xlu0 %8824, %v3874_v53   ;;  %v9137_v53 = vld [vmem:[%s11326_s10 + $0xf0] sm:$0xff]  }
 0x571   : > { %6065 = vperm.xlu0 %8824, %v6051_v51   ;;  %v9154_v51 = vld [vmem:[%s11327_s11 + $0xc8] sm:$0xff]  }
 0x575   : > { %6070 = vperm.xlu0 %8824, %v6052_v55   ;;  %v9138_v55 = vld [vmem:[%s11326_s10 + $0xf8] sm:$0xff]  }
 0x579   : > { %6075 = vperm.xlu0 %8824, %v6053_v48   ;;  %v9163_v48 = vld [vmem:[%s11327_s11 + $0xc0] sm:$0xff]  }
 0x5dc   : > { %v3903_v46 = vpop.xlane.xlu0 %3902 }
 0x5dd   : > { %v3907_v54 = vmul.f32 0.015625, %v3903_v46 }
 0x5df   : > { %v3909_v59 = vadd.f32 1e-05, %v3907_v54 }
 0x5e0   : > { %v3906_v29 = vpop.xlane.xlu0 %3905 }
 0x5e1   : > { %9205 = vrsqrt.f32 %v3909_v59  ;;  %v3908_v40 = vmul.f32 0.015625, %v3906_v29 }
 0x5e3   : > { %v3910_v56 = vadd.f32 1e-05, %v3908_v40 }
 0x5e5   : > { %9207 = vrsqrt.f32 %v3910_v56 }
 0x5e8   : > { %v3935_v16 = vpop.permute.xlu0 %3934 }
 0x5ee   : > { %v9206_v42 = vpop.eup %9205 }
 0x5ef   : > { %v3913_v62 = vmul.f32 %v9206_v42, %v3897_v34  ;;  %v9145_v34 = vld [vmem:[%s11327_s11 + $0xd0] sm:$0xff]  }
 0x5f1   : > { %v3925_v43 = vmul.f32 %v3918_v49, %v3913_v62 }
 0x5f2   : > { %v9208_v52 = vpop.eup %9207 }
 0x5f3   : > { %v3914_v38 = vmul.f32 %v9208_v52, %v3898_v3  ;;  %v3937_v12 = vadd.f32 %v3930_v15, %v3925_v43  ;;  %v9133_v3 = vld [vmem:[%s11326_s10 + $0xd0] sm:$0xff]  }
 0x5f4   : > { %v9146_v43 = vld [vmem:[%s11327_s11 + $0x10] sm:$0xff]  }
 0x5f5   : > { %v3926_v19 = vmul.f32 %v3923_v63, %v3914_v38  ;;  %v3941_v27 = vmul.f32 0.01, %v3937_v12  ;;  %vm3939_vm7 = vcmp.gt.f32.partialorder %v3937_v12, 0.0 }
 0x5f7   : > { %v3938_v11 = vadd.f32 %v3935_v16, %v3926_v19  ;;  %v3943_v33 = vsel %vm3939_vm7, %v3937_v12, %v3941_v27  ;;  %v9147_v12 = vld [vmem:[%s11327_s11 + $0x8] sm:$0xff]  }
 0x5f9   : > { %vm3940_vm8 = vcmp.gt.f32.partialorder %v3938_v11, 0.0  ;;  %v3942_v32 = vmul.f32 0.01, %v3938_v11 }
 0x5fb   : > { %v3944_v18 = vsel %vm3940_vm8, %v3938_v11, %v3942_v32  ;;  %v9148_v11 = vld [vmem:[%s11327_s11] sm:$0xff]  }
 0x5fc   : > { %v4009_v20 = vpack.c.bf16 %v3944_v18, %v3943_v33  ;;  %v9149_v33 = vld [vmem:[%s11327_s11 + $0x58] sm:$0xff]  }
 0x5fe   : > { %8527 = vmatprep.subr.bf16.mxu0 %v4009_v20 }
 0x5ff   : > { %8528 = vmatpush3.bf16.msra.mxu0 %v4009_v20 }
 0x600   : > { %8665 = vmatprep.subr.bf16.mxu0 %v9139_v0 }
 0x602   : > { %8530 = vmatmul.mubr.msk.bf16.vlgmr.msra.gmra.mxu0 %vm4170_vm6, %v9108_v5 }
 0x603   : > { %8533 = vmatprep.mubr.msk.bf16.mxu0 %vm4170_vm6, %v9109_v61  ;;  %8666 = vmatpush3.bf16.msra.mxu0 %v9139_v0  ;;  %v9150_v61 = vld [vmem:[%s11327_s11 + $0x50] sm:$0xff]  }
 0x604   : > { %8667 = vmatprep.subr.bf16.mxu0 %v9145_v34 }
 0x607   : > { %8668 = vmatpush3.bf16.msra.mxu0 %v9145_v34  ;;  %v9158_v34 = vld [vmem:[%s11327_s11 + $0x98] sm:$0xff]  }
 0x608   : > { %8669 = vmatprep.subr.bf16.mxu0 %v9154_v51 }
 0x60a   : > { %8534 = vmatmul.mubr.msk.bf16.gmra.mxu0 %vm4170_vm6, %v9110_v13 }
 0x60b   : > { %8537 = vmatprep.mubr.msk.bf16.mxu0 %vm4170_vm6, %v9111_v36  ;;  %8670 = vmatpush3.bf16.msra.mxu0 %v9154_v51 }
 0x60c   : > { %8671 = vmatprep.subr.bf16.mxu0 %v9163_v48 }
 0x60f   : > { %8672 = vmatpush3.bf16.msra.mxu0 %v9163_v48 }
 0x610   : > { %8689 = vmatprep.subr.bf16.mxu0 %v10567_v21 }
 0x612   : > { %8538 = vmatmul.mubr.msk.bf16.gmra.mxu0 %vm4170_vm6, %v9112_v7  ;;  %v9151_v7 = vld [vmem:[%s11327_s11 + $0x48] sm:$0xff]  }
 0x613   : > { %8541 = vmatprep.mubr.msk.bf16.mxu0 %vm4170_vm6, %v9113_v14 }
 0x61a   : > { %8542 = vmatmul.mubr.msk.bf16.gmra.mxu0 %vm4170_vm6, %v9114_v57 }
 0x61b   : > { %8545 = vmatprep.mubr.msk.bf16.mxu0 %vm4170_vm6, %v9115_v58  ;;  %v9152_v58 = vld [vmem:[%s11327_s11 + $0x40] sm:$0xff]  }
 0x622   : > { %8546 = vmatmul.mubr.msk.bf16.gmra.mxu0 %vm4170_vm6, %v9116_v2 }
 0x623   : > { %8549 = vmatprep.mubr.msk.bf16.mxu0 %vm4170_vm6, %v9117_v22 }
 0x62a   : > { %8550 = vmatmul.mubr.msk.bf16.gmra.mxu0 %vm4170_vm6, %v9118_v23  ;;  %v9153_v23 = vld [vmem:[%s11327_s11 + $0x78] sm:$0xff]  }
 0x62b   : > { %8553 = vmatprep.mubr.msk.bf16.mxu0 %vm4170_vm6, %v9119_v24 }
 0x632   : > { %8554 = vmatmul.mubr.msk.bf16.gmra.mxu0 %vm4170_vm6, %v9120_v8 }
 0x633   : > { %8557 = vmatprep.mubr.msk.bf16.mxu0 %vm4170_vm6, %v9121_v25 }
 0x63a   : > { %8558 = vmatmul.mubr.msk.bf16.gmra.mxu0 %vm4170_vm6, %v9122_v26 }
 0x63b   : > { %8561 = vmatprep.mubr.msk.bf16.mxu0 %vm4170_vm6, %v9123_v45  ;;  %v9155_v45 = vld [vmem:[%s11327_s11 + $0x70] sm:$0xff]  }
 0x642   : > { %8562 = vmatmul.mubr.msk.bf16.gmra.mxu0 %vm4170_vm6, %v9124_v50 }
 0x643   : > { %8565 = vmatprep.mubr.msk.bf16.mxu0 %vm4170_vm6, %v9125_v60 }
 0x64a   : > { %8566 = vmatmul.mubr.msk.bf16.gmra.mxu0 %vm4170_vm6, %v9126_v30 }
 0x64b   : > { %8569 = vmatprep.mubr.msk.bf16.mxu0 %vm4170_vm6, %v9127_v35 }
 0x652   : > { %8570 = vmatmul.mubr.msk.bf16.gmra.mxu0 %vm4170_vm6, %v9128_v17 }
 0x653   : > { %8573 = vmatprep.mubr.msk.bf16.mxu0 %vm4170_vm6, %v9129_v1  ;;  %v9170_v1 = vld [vmem:[%s11327_s11 + $0x110] sm:$0xff]  }
 0x65a   : > { %8574 = vmatmul.mubr.msk.bf16.gmra.mxu0 %vm4170_vm6, %v9130_v10 }
 0x65b   : > { %8577 = vmatprep.mubr.msk.bf16.mxu0 %vm4170_vm6, %v9131_v41  ;;  %v9172_v41 = vld [vmem:[%s11327_s11 + $0x108] sm:$0xff]  }
 0x662   : > { %8578 = vmatmul.mubr.msk.bf16.gmra.mxu0 %vm4170_vm6, %v9132_v47 }
 0x663   : > { %8581 = vmatprep.mubr.msk.bf16.mxu0 %vm4170_vm6, %v9133_v3 }
 0x66a   : > { %8582 = vmatmul.mubr.msk.bf16.gmra.mxu0 %vm4170_vm6, %v9134_v39 }
 0x66b   : > { %8585 = vmatprep.mubr.msk.bf16.mxu0 %vm4170_vm6, %v9135_v9  ;;  %v9159_v9 = vld [vmem:[%s11327_s11 + $0x90] sm:$0xff]  }
 0x672   : > { %8586 = vmatmul.mubr.msk.bf16.gmra.mxu0 %vm4170_vm6, %v9136_v44 }
 0x673   : > { %8589 = vmatprep.mubr.msk.bf16.mxu0 %vm4170_vm6, %v9137_v53  ;;  %v9174_v53 = vld [vmem:[%s11327_s11 + $0x100] sm:$0xff]  }
 0x67a   : > { %8590 = vmatmul.mubr.msk.bf16.gmra.mxu0 %vm4170_vm6, %v9138_v55  ;;  %v9160_v55 = vld [vmem:[%s11327_s11 + $0x88] sm:$0xff]  }
 0x6c2   : > { %v8531_v49 = vpop.f32.mrf.mxu0 }
 0x6c4   : > { %v4301_v63 = vpop.f32.mrf.mxu0 }
 0x6c6   : > { %v8532_v46 = vpop.f32.mrf.mxu0 }
 0x6c7   : > { %v4557_v5 = vpack.c.bf16 %v8532_v46, %v8531_v49 }
 0x6c8   : > { %v4304_v54 = vpop.f32.mrf.mxu0 }
 0x6c9   : > { %v4556_v15 = vpack.c.bf16 %v4304_v54, %v4301_v63  ;;  %v9161_v54 = vld [vmem:[%s11327_s11 + $0x80] sm:$0xff]  }
 0x6ca   : > { %v8535_v59 = vpop.f32.mrf.mxu0 }
 0x6cc   : > { %v4317_v29 = vpop.f32.mrf.mxu0 }
 0x6ce   : > { %v8536_v40 = vpop.f32.mrf.mxu0 }
 0x6cf   : > { %v4559_v62 = vpack.c.bf16 %v8536_v40, %v8535_v59 }
 0x6d0   : > { %v4320_v56 = vpop.f32.mrf.mxu0 }
 0x6d1   : > { %v4558_v42 = vpack.c.bf16 %v4320_v56, %v4317_v29  ;;  %v9178_v29 = vld [vmem:[%s11327_s11 + $0x150] sm:$0xff]   ;;  %v9162_v56 = vld [vmem:[%s11327_s11 + $0xb8] sm:$0xff]  }
 0x6d2   : > { %v8539_v52 = vpop.f32.mrf.mxu0 }
 0x6d3   : > { %8601 = vmatprep.mubr.msk.bf16.mxu1 %vm3887_vm5, %v4558_v42 }
 0x6d4   : > { %8602 = vmatmul.mubr.msk.bf16.vlgmr.msra.gmra.mxu1 %vm3887_vm5, %v4559_v62  ;;  %v4333_v38 = vpop.f32.mrf.mxu0  ;;  %v9180_v62 = vld [vmem:[%s11327_s11 + $0x148] sm:$0xff]  }
 0x6d5   : > { %8606 = vmatpush3.bf16.msra.mxu1 %v9144_v4  ;;  %8613 = vmatprep.mubr.msk.bf16.mxu1 %vm3887_vm5, %v4556_v15 }
 0x6d6   : > { %8607 = vmatprep.subr.bf16.mxu1 %v9146_v43  ;;  %v8540_v19 = vpop.f32.mrf.mxu0 }
 0x6d7   : > { %v4561_v26 = vpack.c.bf16 %v8540_v19, %v8539_v52  ;;  %v9182_v19 = vld [vmem:[%s11327_s11 + $0x140] sm:$0xff]  }
 0x6d8   : > { %v4336_v16 = vpop.f32.mrf.mxu0 }
 0x6d9   : > { %8608 = vmatpush3.bf16.msra.mxu1 %v9146_v43  ;;  %v4560_v0 = vpack.c.bf16 %v4336_v16, %v4333_v38  ;;  %v9164_v38 = vld [vmem:[%s11327_s11 + $0xb0] sm:$0xff]  }
 0x6da   : > { %8609 = vmatprep.subr.bf16.mxu1 %v9147_v12  ;;  %v10582_v27 = vpop.f32.mrf.mxu0 }
 0x6dc   : > { %v4349_v32 = vpop.f32.mrf.mxu0 }
 0x6dd   : > { %8610 = vmatpush3.bf16.msra.mxu1 %v9147_v12 }
 0x6de   : > { %8611 = vmatprep.subr.bf16.mxu1 %v9148_v11  ;;  %v10587_v18 = vpop.f32.mrf.mxu0 }
 0x6df   : > { %v4563_v39 = vpack.c.bf16 %v10587_v18, %v10582_v27 }
 0x6e0   : > { %v4352_v20 = vpop.f32.mrf.mxu0 }
 0x6e1   : > { %8612 = vmatpush3.bf16.msra.mxu1 %v9148_v11  ;;  %v4562_v25 = vpack.c.bf16 %v4352_v20, %v4349_v32  ;;  %v9165_v11 = vld [vmem:[%s11327_s11 + $0xa8] sm:$0xff]   ;;  %v9184_v32 = vld [vmem:[%s11327_s11 + $0x198] sm:$0xff]  }
 0x6e2   : > { %8617 = vmatprep.subr.bf16.mxu1 %v9149_v33  ;;  %v10592_v13 = vpop.f32.mrf.mxu0 }
 0x6e4   : > { %8614 = vmatmul.mubr.msk.bf16.vlgmr.msra.gmra.mxu1 %vm3887_vm5, %v4557_v5  ;;  %v4365_v36 = vpop.f32.mrf.mxu0 }
 0x6e5   : > { %8618 = vmatpush3.bf16.msra.mxu1 %v9149_v33  ;;  %8625 = vmatprep.mubr.msk.bf16.mxu1 %vm3887_vm5, %v4560_v0  ;;  %v9166_v0 = vld [vmem:[%s11327_s11 + $0xa0] sm:$0xff]  }
 0x6e6   : > { %8619 = vmatprep.subr.bf16.mxu1 %v9150_v61  ;;  %v10599_v14 = vpop.f32.mrf.mxu0 }
 0x6e7   : > { %v4565_v15 = vpack.c.bf16 %v10599_v14, %v10592_v13  ;;  %v9188_v14 = vld [vmem:[%s11327_s11 + $0x188] sm:$0xff]  }
 0x6e8   : > { %v4368_v57 = vpop.f32.mrf.mxu0 }
 0x6e9   : > { %8620 = vmatpush3.bf16.msra.mxu1 %v9150_v61  ;;  %v4564_v3 = vpack.c.bf16 %v4368_v57, %v4365_v36  ;;  %v9186_v61 = vld [vmem:[%s11327_s11 + $0x190] sm:$0xff]   ;;  %v9167_v36 = vld [vmem:[%s11327_s11 + $0xf8] sm:$0xff]  }
 0x6ea   : > { %8621 = vmatprep.subr.bf16.mxu1 %v9151_v7  ;;  %v10604_v2 = vpop.f32.mrf.mxu0 }
 0x6ec   : > { %v10606_v22 = vpop.f32.mrf.mxu0 }
 0x6ed   : > { %8622 = vmatpush3.bf16.msra.mxu1 %v9151_v7 }
 0x6ee   : > { %8623 = vmatprep.subr.bf16.mxu1 %v9152_v58  ;;  %v10611_v24 = vpop.f32.mrf.mxu0 }
 0x6f0   : > { %v10613_v8 = vpop.f32.mrf.mxu0 }
 0x6f1   : > { %8624 = vmatpush3.bf16.msra.mxu1 %v9152_v58  ;;  %v4566_v52 = vpack.c.bf16 %v10613_v8, %v10606_v22  ;;  %v4567_v22 = vpack.c.bf16 %v10611_v24, %v10604_v2  ;;  %v9171_v2 = vld [vmem:[%s11327_s11 + $0xe8] sm:$0xff]  }
 0x6f2   : > { %8629 = vmatprep.subr.bf16.mxu1 %v9153_v23  ;;  %v8555_v50 = vpop.f32.mrf.mxu0 }
 0x6f4   : > { %8626 = vmatmul.mubr.msk.bf16.vlgmr.msra.gmra.mxu1 %vm3887_vm5, %v4561_v26  ;;  %v4397_v60 = vpop.f32.mrf.mxu0 }
 0x6f5   : > { %8630 = vmatpush3.bf16.msra.mxu1 %v9153_v23  ;;  %8637 = vmatprep.mubr.msk.bf16.mxu1 %vm3887_vm5, %v4562_v25  ;;  %v9169_v23 = vld [vmem:[%s11327_s11 + $0xf0] sm:$0xff]   ;;  %v9190_v25 = vld [vmem:[%s11327_s11 + $0x180] sm:$0xff]  }
 0x6f6   : > { %8631 = vmatprep.subr.bf16.mxu1 %v9155_v45  ;;  %v8556_v28 = vpop.f32.mrf.mxu0 }
 0x6f7   : > { %v4569_v30 = vpack.c.bf16 %v8556_v28, %v8555_v50  ;;  %v9173_v28 = vld [vmem:[%s11327_s11 + $0xe0] sm:$0xff]  }
 0x6f8   : > { %v4400_v35 = vpop.f32.mrf.mxu0 }
 0x6f9   : > { %8632 = vmatpush3.bf16.msra.mxu1 %v9155_v45  ;;  %v4568_v37 = vpack.c.bf16 %v4400_v35, %v4397_v60  ;;  %v9192_v45 = vld [vmem:[%s11327_s11 + $0x1d8] sm:$0xff]   ;;  %v9194_v35 = vld [vmem:[%s11327_s11 + $0x1d0] sm:$0xff]  }
 0x6fa   : > { %8633 = vmatprep.subr.bf16.mxu1 %v9156_v6  ;;  %v10626_v17 = vpop.f32.mrf.mxu0 }
 0x6fb   : > { %8673 = vmatprep.mubr.msk.bf16.mxu0 %vm3887_vm5, %v4568_v37 }
 0x6fc   : > { %v10632_v4 = vpop.f32.mrf.mxu0  ;;  %8674 = vmatmul.mubr.msk.bf16.vlgmr.msra.gmra.mxu0 %vm3887_vm5, %v4569_v30 }
 0x6fd   : > { %8634 = vmatpush3.bf16.msra.mxu1 %v9156_v6  ;;  %8690 = vmatpush3.bf16.msra.mxu0 %v10567_v21  ;;  %v9176_v21 = vld [vmem:[%s11327_s11 + $0x158] sm:$0xff]  }
 0x6fe   : > { %8635 = vmatprep.subr.bf16.mxu1 %v9157_v31  ;;  %v10639_v10 = vpop.f32.mrf.mxu0  ;;  %8691 = vmatprep.subr.bf16.mxu0 %v9170_v1 }
 0x700   : > { %v10644_v47 = vpop.f32.mrf.mxu0 }
 0x701   : > { %8636 = vmatpush3.bf16.msra.mxu1 %v9157_v31  ;;  %8692 = vmatpush3.bf16.msra.mxu0 %v9170_v1  ;;  %v4570_v58 = vpack.c.bf16 %v10644_v47, %v10632_v4  ;;  %v9175_v31 = vld [vmem:[%s11327_s11 + $0x138] sm:$0xff]   ;;  %v9196_v4 = vld [vmem:[%s11327_s11 + $0x1c8] sm:$0xff]   ;;  %v4571_v47 = vpack.c.bf16 %v10639_v10, %v10626_v17 }
 0x702   : > { %8641 = vmatprep.subr.bf16.mxu1 %v9158_v34  ;;  %v8563_v44 = vpop.f32.mrf.mxu0  ;;  %8693 = vmatprep.subr.bf16.mxu0 %v9172_v41  ;;  %v9179_v17 = vld [vmem:[%s11327_s11 + $0x128] sm:$0xff]  }
 0x704   : > { %8638 = vmatmul.mubr.msk.bf16.vlgmr.msra.gmra.mxu1 %vm3887_vm5, %v4563_v39  ;;  %v4429_v51 = vpop.f32.mrf.mxu0 }
 0x705   : > { %8642 = vmatpush3.bf16.msra.mxu1 %v9158_v34  ;;  %8649 = vmatprep.mubr.msk.bf16.mxu1 %vm3887_vm5, %v4564_v3  ;;  %v9177_v3 = vld [vmem:[%s11327_s11 + $0x130] sm:$0xff]  }
 0x706   : > { %8643 = vmatprep.subr.bf16.mxu1 %v9159_v9  ;;  %8694 = vmatpush3.bf16.msra.mxu0 %v9172_v41  ;;  %v8564_v48 = vpop.f32.mrf.mxu0 }
 0x707   : > { %8695 = vmatprep.subr.bf16.mxu0 %v9174_v53  ;;  %v4573_v63 = vpack.c.bf16 %v8564_v48, %v8563_v44  ;;  %v9181_v48 = vld [vmem:[%s11327_s11 + $0x120] sm:$0xff]  }
 0x708   : > { %v4432_v49 = vpop.f32.mrf.mxu0 }
 0x709   : > { %8644 = vmatpush3.bf16.msra.mxu1 %v9159_v9  ;;  %v4572_v46 = vpack.c.bf16 %v4432_v49, %v4429_v51  ;;  %v9198_v9 = vld [vmem:[%s11327_s11 + $0x1c0] sm:$0xff]  }
 0x70a   : > { %8645 = vmatprep.subr.bf16.mxu1 %v9160_v55  ;;  %8696 = vmatpush3.bf16.msra.mxu0 %v9174_v53  ;;  %v10665_v59 = vpop.f32.mrf.mxu0 }
 0x70b   : > { %8697 = vmatprep.mubr.msk.bf16.mxu0 %vm3887_vm5, %v4572_v46  ;;  %8713 = vmatprep.subr.bf16.mxu0 %v9176_v21  ;;  %v9185_v46 = vld [vmem:[%s11327_s11 + $0x170] sm:$0xff]  }
 0x70c   : > { %v10671_v40 = vpop.f32.mrf.mxu0 }
 0x70d   : > { %8646 = vmatpush3.bf16.msra.mxu1 %v9160_v55  ;;  %8698 = vmatmul.mubr.msk.bf16.vlgmr.msra.gmra.mxu0 %vm3887_vm5, %v4573_v63 }
 0x70e   : > { %8647 = vmatprep.subr.bf16.mxu1 %v9161_v54  ;;  %8714 = vmatpush3.bf16.msra.mxu0 %v9176_v21  ;;  %v10677_v42 = vpop.f32.mrf.mxu0  ;;  %v9183_v21 = vld [vmem:[%s11327_s11 + $0x178] sm:$0xff]  }
 0x70f   : > { %8715 = vmatprep.subr.bf16.mxu0 %v9178_v29  ;;  %v4575_v63 = vpack.c.bf16 %v10677_v42, %v10665_v59  ;;  %v9189_v59 = vld [vmem:[%s11327_s11 + $0x160] sm:$0xff]   ;;  %v9193_v42 = vld [vmem:[%s11327_s11 + $0x1b0] sm:$0xff]  }
 0x710   : > { %v10682_v43 = vpop.f32.mrf.mxu0 }
 0x711   : > { %8648 = vmatpush3.bf16.msra.mxu1 %v9161_v54  ;;  %v4574_v41 = vpack.c.bf16 %v10682_v43, %v10671_v40  ;;  %v9187_v54 = vld [vmem:[%s11327_s11 + $0x168] sm:$0xff]  }
 0x712   : > { %8653 = vmatprep.subr.bf16.mxu1 %v9162_v56  ;;  %8716 = vmatpush3.bf16.msra.mxu0 %v9178_v29  ;;  %v8571_v12 = vpop.f32.mrf.mxu0  ;;  %v9191_v29 = vld [vmem:[%s11327_s11 + $0x1b8] sm:$0xff]   ;;  %v9195_v43 = vld [vmem:[%s11327_s11 + $0x1a8] sm:$0xff]  }
 0x713   : > { %8717 = vmatprep.subr.bf16.mxu0 %v9180_v62 }
 0x714   : > { %8650 = vmatmul.mubr.msk.bf16.vlgmr.msra.gmra.mxu1 %vm3887_vm5, %v4565_v15  ;;  %v4461_v16 = vpop.f32.mrf.mxu0  ;;  %v9197_v15 = vld [vmem:[%s11327_s11 + $0x1a0] sm:$0xff]  }
 0x715   : > { %8654 = vmatpush3.bf16.msra.mxu1 %v9162_v56  ;;  %8661 = vmatprep.mubr.msk.bf16.mxu1 %vm3887_vm5, %v4566_v52 }
 0x716   : > { %8655 = vmatprep.subr.bf16.mxu1 %v9164_v38  ;;  %8718 = vmatpush3.bf16.msra.mxu0 %v9180_v62  ;;  %v8572_v27 = vpop.f32.mrf.mxu0 }
 0x717   : > { %8719 = vmatprep.subr.bf16.mxu0 %v9182_v19  ;;  %v4577_v18 = vpack.c.bf16 %v8572_v27, %v8571_v12  ;;  %v9199_v12 = vld [vmem:[%s11327_s11 + $0x1f8] sm:$0xff]   ;;  %v9200_v27 = vld [vmem:[%s11327_s11 + $0x1f0] sm:$0xff]  }
 0x718   : > { %v4464_v33 = vpop.f32.mrf.mxu0 }
 0x719   : > { %8656 = vmatpush3.bf16.msra.mxu1 %v9164_v38  ;;  %v4576_v20 = vpack.c.bf16 %v4464_v33, %v4461_v16  ;;  %v9202_v33 = vld [vmem:[%s11327_s11 + $0x1e0] sm:$0xff]  }
 0x71a   : > { %8657 = vmatprep.subr.bf16.mxu1 %v9165_v11  ;;  %8720 = vmatpush3.bf16.msra.mxu0 %v9182_v19  ;;  %v10705_v5 = vpop.f32.mrf.mxu0 }
 0x71b   : > { %8721 = vmatprep.mubr.msk.bf16.mxu0 %vm3887_vm5, %v4576_v20  ;;  %8737 = vmatprep.subr.bf16.mxu0 %v9184_v32 }
 0x71c   : > { %v10711_v13 = vpop.f32.mrf.mxu0 }
 0x71d   : > { %8658 = vmatpush3.bf16.msra.mxu1 %v9165_v11  ;;  %8722 = vmatmul.mubr.msk.bf16.vlgmr.msra.gmra.mxu0 %vm3887_vm5, %v4577_v18 }
 0x71e   : > { %8659 = vmatprep.subr.bf16.mxu1 %v9166_v0  ;;  %8738 = vmatpush3.bf16.msra.mxu0 %v9184_v32  ;;  %v10717_v7 = vpop.f32.mrf.mxu0  ;;  %v9201_v32 = vld [vmem:[%s11327_s11 + $0x1e8] sm:$0xff]  }
 0x71f   : > { %8739 = vmatprep.subr.bf16.mxu0 %v9186_v61  ;;  %v4579_v56 = vpack.c.bf16 %v10717_v7, %v10705_v5 }
 0x720   : > { %v10722_v57 = vpop.f32.mrf.mxu0 }
 0x721   : > { %8660 = vmatpush3.bf16.msra.mxu1 %v9166_v0  ;;  %v4578_v49 = vpack.c.bf16 %v10722_v57, %v10711_v13 }
 0x722   : > { %8677 = vmatprep.subr.bf16.mxu1 %v9167_v36  ;;  %8740 = vmatpush3.bf16.msra.mxu0 %v9186_v61  ;;  %v8579_v8 = vpop.f32.mrf.mxu0 }
 0x723   : > { %8741 = vmatprep.subr.bf16.mxu0 %v9188_v14 }
 0x724   : > { %8662 = vmatmul.mubr.msk.bf16.vlgmr.msra.gmra.mxu1 %vm3887_vm5, %v4567_v22  ;;  %v4493_v26 = vpop.f32.mrf.mxu0 }
 0x725   : > { %8678 = vmatpush3.bf16.msra.mxu1 %v9167_v36  ;;  %8685 = vmatprep.mubr.msk.bf16.mxu1 %vm3887_vm5, %v4570_v58 }
 0x726   : > { %8679 = vmatprep.subr.bf16.mxu1 %v9169_v23  ;;  %8742 = vmatpush3.bf16.msra.mxu0 %v9188_v14  ;;  %v8580_v24 = vpop.f32.mrf.mxu0 }
 0x727   : > { %8743 = vmatprep.subr.bf16.mxu0 %v9190_v25  ;;  %v4581_v60 = vpack.c.bf16 %v8580_v24, %v8579_v8 }
 0x728   : > { %v4496_v50 = vpop.f32.mrf.mxu0 }
 0x729   : > { %8680 = vmatpush3.bf16.msra.mxu1 %v9169_v23  ;;  %v4580_v6 = vpack.c.bf16 %v4496_v50, %v4493_v26 }
 0x72a   : > { %8681 = vmatprep.subr.bf16.mxu1 %v9171_v2  ;;  %8744 = vmatpush3.bf16.msra.mxu0 %v9190_v25  ;;  %v10745_v30 = vpop.f32.mrf.mxu0 }
 0x72b   : > { %8745 = vmatprep.mubr.msk.bf16.mxu0 %vm3887_vm5, %v4580_v6  ;;  %8761 = vmatprep.subr.bf16.mxu0 %v9192_v45 }
 0x72c   : > { %v10751_v37 = vpop.f32.mrf.mxu0 }
 0x72d   : > { %8682 = vmatpush3.bf16.msra.mxu1 %v9171_v2  ;;  %8746 = vmatmul.mubr.msk.bf16.vlgmr.msra.gmra.mxu0 %vm3887_vm5, %v4581_v60 }
 0x72e   : > { %8683 = vmatprep.subr.bf16.mxu1 %v9173_v28  ;;  %8762 = vmatpush3.bf16.msra.mxu0 %v9192_v45  ;;  %v10757_v1 = vpop.f32.mrf.mxu0 }
 0x72f   : > { %8763 = vmatprep.subr.bf16.mxu0 %v9194_v35  ;;  %v4583_v11 = vpack.c.bf16 %v10757_v1, %v10745_v30 }
 0x730   : > { %v4512_v34 = vpop.f32.mrf.mxu0 }
 0x731   : > { %8684 = vmatpush3.bf16.msra.mxu1 %v9173_v28  ;;  %v4582_v40 = vpack.c.bf16 %v4512_v34, %v10751_v37 }
 0x732   : > { %8701 = vmatprep.subr.bf16.mxu1 %v9175_v31  ;;  %8764 = vmatpush3.bf16.msra.mxu0 %v9194_v35  ;;  %v8587_v39 = vpop.f32.mrf.mxu0 }
 0x733   : > { %8765 = vmatprep.subr.bf16.mxu0 %v9196_v4 }
 0x734   : > { %8686 = vmatmul.mubr.msk.bf16.vlgmr.msra.gmra.mxu1 %vm3887_vm5, %v4571_v47  ;;  %v4525_v44 = vpop.f32.mrf.mxu0 }
 0x735   : > { %8702 = vmatpush3.bf16.msra.mxu1 %v9175_v31  ;;  %8709 = vmatprep.mubr.msk.bf16.mxu1 %vm3887_vm5, %v4574_v41 }
 0x736   : > { %8703 = vmatprep.subr.bf16.mxu1 %v9177_v3  ;;  %8766 = vmatpush3.bf16.msra.mxu0 %v9196_v4  ;;  %v8588_v10 = vpop.f32.mrf.mxu0 }
 0x737   : > { %8767 = vmatprep.subr.bf16.mxu0 %v9198_v9  ;;  %v4585_v51 = vpack.c.bf16 %v8588_v10, %v8587_v39 }
 0x738   : > { %v4528_v53 = vpop.f32.mrf.mxu0 }
 0x739   : > { %8704 = vmatpush3.bf16.msra.mxu1 %v9177_v3  ;;  %v4584_v55 = vpack.c.bf16 %v4528_v53, %v4525_v44 }
 0x73a   : > { %8705 = vmatprep.subr.bf16.mxu1 %v9179_v17  ;;  %8768 = vmatpush3.bf16.msra.mxu0 %v9198_v9  ;;  %v8591_v62 = vpop.f32.mrf.mxu0 }
 0x73b   : > { %8769 = vmatprep.mubr.msk.bf16.mxu0 %vm3887_vm5, %v4584_v55 }
 0x73c   : > { %v4541_v52 = vpop.f32.mrf.mxu0 }
 0x73d   : > { %8706 = vmatpush3.bf16.msra.mxu1 %v9179_v17  ;;  %8770 = vmatmul.mubr.msk.bf16.vlgmr.msra.gmra.mxu0 %vm3887_vm5, %v4585_v51 }
 0x73e   : > { %8707 = vmatprep.subr.bf16.mxu1 %v9181_v48  ;;  %v8592_v38 = vpop.f32.mrf.mxu0 }
 0x73f   : > { %v4587_v18 = vpack.c.bf16 %v8592_v38, %v8591_v62 }
 0x740   : > { %v4544_v19 = vpop.f32.mrf.mxu0 }
 0x741   : > { %8708 = vmatpush3.bf16.msra.mxu1 %v9181_v48  ;;  %v4586_v16 = vpack.c.bf16 %v4544_v19, %v4541_v52 }
 0x742   : > { %8725 = vmatprep.subr.bf16.mxu1 %v9183_v21 }
 0x744   : > { %8710 = vmatmul.mubr.msk.bf16.vlgmr.msra.gmra.mxu1 %vm3887_vm5, %v4575_v63 }
 0x745   : > { %8726 = vmatpush3.bf16.msra.mxu1 %v9183_v21  ;;  %8733 = vmatprep.mubr.msk.bf16.mxu1 %vm3887_vm5, %v4578_v49 }
 0x746   : > { %8727 = vmatprep.subr.bf16.mxu1 %v9185_v46 }
 0x749   : > { %8728 = vmatpush3.bf16.msra.mxu1 %v9185_v46 }
 0x74a   : > { %8729 = vmatprep.subr.bf16.mxu1 %v9187_v54 }
 0x74d   : > { %8730 = vmatpush3.bf16.msra.mxu1 %v9187_v54 }
 0x74e   : > { %8731 = vmatprep.subr.bf16.mxu1 %v9189_v59 }
 0x751   : > { %8732 = vmatpush3.bf16.msra.mxu1 %v9189_v59 }
 0x752   : > { %8749 = vmatprep.subr.bf16.mxu1 %v9191_v29 }
 0x754   : > { %8734 = vmatmul.mubr.msk.bf16.vlgmr.msra.gmra.mxu1 %vm3887_vm5, %v4579_v56 }
 0x755   : > { %8750 = vmatpush3.bf16.msra.mxu1 %v9191_v29  ;;  %8757 = vmatprep.mubr.msk.bf16.mxu1 %vm3887_vm5, %v4582_v40 }
 0x756   : > { %8751 = vmatprep.subr.bf16.mxu1 %v9193_v42 }
 0x759   : > { %8752 = vmatpush3.bf16.msra.mxu1 %v9193_v42 }
 0x75a   : > { %8753 = vmatprep.subr.bf16.mxu1 %v9195_v43 }
 0x75d   : > { %8754 = vmatpush3.bf16.msra.mxu1 %v9195_v43 }
 0x75e   : > { %8755 = vmatprep.subr.bf16.mxu1 %v9197_v15 }
 0x761   : > { %8756 = vmatpush3.bf16.msra.mxu1 %v9197_v15 }
 0x762   : > { %8773 = vmatprep.subr.bf16.mxu1 %v9199_v12 }
 0x764   : > { %8758 = vmatmul.mubr.msk.bf16.vlgmr.msra.gmra.mxu1 %vm3887_vm5, %v4583_v11 }
 0x765   : > { %8774 = vmatpush3.bf16.msra.mxu1 %v9199_v12  ;;  %8781 = vmatprep.mubr.msk.bf16.mxu1 %vm3887_vm5, %v4586_v16 }
 0x766   : > { %8775 = vmatprep.subr.bf16.mxu1 %v9200_v27 }
 0x769   : > { %8776 = vmatpush3.bf16.msra.mxu1 %v9200_v27 }
 0x76a   : > { %8777 = vmatprep.subr.bf16.mxu1 %v9201_v32 }
 0x76d   : > { %8778 = vmatpush3.bf16.msra.mxu1 %v9201_v32 }
 0x76e   : > { %8779 = vmatprep.subr.bf16.mxu1 %v9202_v33 }
 0x771   : > { %8780 = vmatpush3.bf16.msra.mxu1 %v9202_v33 }
 0x774   : > { %8782 = vmatmul.mubr.msk.bf16.vlgmr.msra.gmra.mxu1 %vm3887_vm5, %v4587_v18 }
 0x794   : > { %v8603_v20 = vpop.f32.mrf.mxu1 }
 0x796   : > { %v4669_v0 = vpop.f32.mrf.mxu1 }
 0x798   : > { %v8604_v5 = vpop.f32.mrf.mxu1 }
 0x79a   : > { %v4672_v61 = vpop.f32.mrf.mxu1 }
 0x7a4   : > { %v8615_v13 = vpop.f32.mrf.mxu1 }
 0x7a5   : > { %v4757_v55 = vadd.f32 %v8615_v13, %v8603_v20 }
 0x7a6   : > { %v4748_v36 = vpop.f32.mrf.mxu1 }
 0x7a7   : > { %v4749_v48 = vadd.f32 %v4748_v36, %v4669_v0 }
 0x7a8   : > { %v8616_v7 = vpop.f32.mrf.mxu1 }
 0x7a9   : > { %v4760_v54 = vadd.f32 %v8616_v7, %v8604_v5 }
 0x7aa   : > { %v4751_v14 = vpop.f32.mrf.mxu1 }
 0x7ab   : > { %v4752_v59 = vadd.f32 %v4751_v14, %v4672_v61 }
 0x7b4   : > { %v8627_v57 = vpop.f32.mrf.mxu1 }
 0x7b5   : > { %v4853_v49 = vadd.f32 %v8627_v57, %v4757_v55 }
 0x7b6   : > { %v4836_v58 = vpop.f32.mrf.mxu1 }
 0x7b7   : > { %v4851_v63 = vadd.f32 %v4836_v58, %v4749_v48 }
 0x7b8   : > { %v8628_v22 = vpop.f32.mrf.mxu1 }
 0x7b9   : > { %v4854_v42 = vadd.f32 %v8628_v22, %v4760_v54 }
 0x7ba   : > { %v4839_v23 = vpop.f32.mrf.mxu1 }
 0x7bb   : > { %v4852_v62 = vadd.f32 %v4839_v23, %v4752_v59 }
 0x7bc   : > { %v8675_v30 = vpop.f32.mrf.mxu0 }
 0x7be   : > { %v5204_v37 = vpop.f32.mrf.mxu0 }
 0x7c0   : > { %v8676_v1 = vpop.f32.mrf.mxu0 }
 0x7c2   : > { %v5207_v34 = vpop.f32.mrf.mxu0 }
 0x7c4   : > { %v8639_v8 = vpop.f32.mrf.mxu1 }
 0x7c5   : > { %v4945_v29 = vadd.f32 %v8639_v8, %v4853_v49 }
 0x7c6   : > { %v4928_v25 = vpop.f32.mrf.mxu1 }
 0x7c7   : > { %v4943_v40 = vadd.f32 %v4928_v25, %v4851_v63 }
 0x7c8   : > { %v8640_v26 = vpop.f32.mrf.mxu1 }
 0x7c9   : > { %v4946_v12 = vadd.f32 %v8640_v26, %v4854_v42 }
 0x7ca   : > { %v4931_v2 = vpop.f32.mrf.mxu1 }
 0x7cb   : > { %v4944_v19 = vadd.f32 %v4931_v2, %v4852_v62 }
 0x7cd   : > { %v8699_v47 = vpop.f32.mrf.mxu0 }
 0x7cf   : > { %v5388_v39 = vpop.f32.mrf.mxu0 }
 0x7d1   : > { %v8700_v44 = vpop.f32.mrf.mxu0 }
 0x7d3   : > { %v5391_v10 = vpop.f32.mrf.mxu0 }
 0x7d4   : > { %v8651_v24 = vpop.f32.mrf.mxu1 }
 0x7d5   : > { %v5037_v43 = vadd.f32 %v8651_v24, %v4945_v29 }
 0x7d6   : > { %v5020_v45 = vpop.f32.mrf.mxu1 }
 0x7d7   : > { %v5035_v52 = vadd.f32 %v5020_v45, %v4943_v40 }
 0x7d8   : > { %v8652_v50 = vpop.f32.mrf.mxu1 }
 0x7d9   : > { %v5038_v27 = vadd.f32 %v8652_v50, %v4946_v12 }
 0x7da   : > { %v5023_v60 = vpop.f32.mrf.mxu1 }
 0x7db   : > { %v5036_v32 = vadd.f32 %v5023_v60, %v4944_v19 }
 0x7dd   : > { %v8723_v51 = vpop.f32.mrf.mxu0 }
 0x7df   : > { %v5572_v46 = vpop.f32.mrf.mxu0 }
 0x7e1   : > { %v8724_v15 = vpop.f32.mrf.mxu0 }
 0x7e3   : > { %v5575_v33 = vpop.f32.mrf.mxu0 }
 0x7e4   : > { %v8663_v6 = vpop.f32.mrf.mxu1 }
 0x7e5   : > { %v5129_v16 = vadd.f32 %v8663_v6, %v5037_v43 }
 0x7e6   : > { %v5112_v28 = vpop.f32.mrf.mxu1 }
 0x7e7   : > { %v5127_v11 = vadd.f32 %v5112_v28, %v5035_v52  ;;  %v5221_v20 = vadd.f32 %v8675_v30, %v5129_v16 }
 0x7e8   : > { %v8664_v35 = vpop.f32.mrf.mxu1 }
 0x7e9   : > { %v5219_v0 = vadd.f32 %v5204_v37, %v5127_v11  ;;  %v5130_v5 = vadd.f32 %v8664_v35, %v5038_v27 }
 0x7ea   : > { %v5115_v31 = vpop.f32.mrf.mxu1 }
 0x7eb   : > { %v5128_v61 = vadd.f32 %v5115_v31, %v5036_v32  ;;  %v5222_v57 = vadd.f32 %v8676_v1, %v5130_v5 }
 0x7ed   : > { %v8747_v13 = vpop.f32.mrf.mxu0  ;;  %v5220_v58 = vadd.f32 %v5207_v34, %v5128_v61  ;;  %v6081_v61 = vpop.permute.xlu1 %6080 }
 0x7ef   : > { %v5756_v22 = vpop.f32.mrf.mxu0 }
 0x7f1   : > { %v8748_v50 = vpop.f32.mrf.mxu0 }
 0x7f4   : > { %v8687_v4 = vpop.f32.mrf.mxu1 }
 0x7f5   : > { %v5313_v36 = vadd.f32 %v8687_v4, %v5221_v20  ;;  %v5759_v4 = vpop.f32.mrf.mxu0 }
 0x7f6   : > { %v5296_v41 = vpop.f32.mrf.mxu1 }
 0x7f7   : > { %v5311_v7 = vadd.f32 %v5296_v41, %v5219_v0  ;;  %v5405_v23 = vadd.f32 %v8699_v47, %v5313_v36  ;;  %v6066_v47 = vpop.permute.xlu0 %6065 }
 0x7f8   : > { %v8688_v3 = vpop.f32.mrf.mxu1 }
 0x7f9   : > { %v5403_v8 = vadd.f32 %v5388_v39, %v5311_v7  ;;  %v5314_v25 = vadd.f32 %v8688_v3, %v5222_v57  ;;  %v6055_v57 = vld [vmem:[%s11329_s13] sm:$0xff] }
 0x7fa   : > { %v5299_v9 = vpop.f32.mrf.mxu1 }
 0x7fb   : > { %v5312_v26 = vadd.f32 %v5299_v9, %v5220_v58  ;;  %v5406_v6 = vadd.f32 %v8700_v44, %v5314_v25  ;;  %v6057_v58 = vld [vmem:[%s11329_s13 + $0x10] sm:$0xff]  ;;  %v6059_v25 = vld [vmem:[%s11330_s14] sm:$0xff] }
 0x7fd   : > { %v5404_v28 = vadd.f32 %v5391_v10, %v5312_v26  ;;  %v8771_v55 = vpop.f32.mrf.mxu0 }
 0x7ff   : > { %v5940_v63 = vpop.f32.mrf.mxu0 }
 0x801   : > { %v8772_v59 = vpop.f32.mrf.mxu0 }
 0x804   : > { %v8711_v17 = vpop.f32.mrf.mxu1 }
 0x805   : > { %v5497_v24 = vadd.f32 %v8711_v17, %v5405_v23  ;;  %v6056_v23 = vld [vmem:[%s11329_s13 + $0x8] sm:$0xff] }
 0x806   : > { %v5480_v53 = vpop.f32.mrf.mxu1 }
 0x807   : > { %v5495_v45 = vadd.f32 %v5480_v53, %v5403_v8  ;;  %v5589_v30 = vadd.f32 %v8723_v51, %v5497_v24  ;;  %v6060_v8 = vld [vmem:[%s11330_s14 + $0x8] sm:$0xff] }
 0x808   : > { %v8712_v21 = vpop.f32.mrf.mxu1 }
 0x809   : > { %v5587_v35 = vadd.f32 %v5572_v46, %v5495_v45  ;;  %v5498_v37 = vadd.f32 %v8712_v21, %v5406_v6  ;;  %v6071_v46 = vpop.permute.xlu0 %6070 }
 0x80a   : > { %v5483_v56 = vpop.f32.mrf.mxu1 }
 0x80b   : > { %v5496_v31 = vadd.f32 %v5483_v56, %v5404_v28  ;;  %v5590_v39 = vadd.f32 %v8724_v15, %v5498_v37 }
 0x80d   : > { %v5588_v3 = vadd.f32 %v5575_v33, %v5496_v31  ;;  %v6076_v27 = vpop.permute.xlu0 %6075 }
 0x814   : > { %v8735_v38 = vpop.f32.mrf.mxu1 }
 0x815   : > { %v5681_v1 = vadd.f32 %v8735_v38, %v5589_v30  ;;  %v5943_v38 = vpop.f32.mrf.mxu0 }
 0x816   : > { %v5664_v18 = vpop.f32.mrf.mxu1 }
 0x817   : > { %v5679_v34 = vadd.f32 %v5664_v18, %v5587_v35  ;;  %v5773_v48 = vadd.f32 %v8747_v13, %v5681_v1 }
 0x818   : > { %v8736_v14 = vpop.f32.mrf.mxu1 }
 0x819   : > { %v5771_v17 = vadd.f32 %v5756_v22, %v5679_v34  ;;  %v5682_v53 = vadd.f32 %v8736_v14, %v5590_v39  ;;  %v6058_v22 = vld [vmem:[%s11329_s13 + $0x18] sm:$0xff] }
 0x81a   : > { %v5667_v2 = vpop.f32.mrf.mxu1 }
 0x81b   : > { %v5680_v49 = vadd.f32 %v5667_v2, %v5588_v3  ;;  %v5774_v21 = vadd.f32 %v8748_v50, %v5682_v53 }
 0x81d   : > { %v5772_v54 = vadd.f32 %v5759_v4, %v5680_v49 }
 0x824   : > { %v8759_v60 = vpop.f32.mrf.mxu1 }
 0x825   : > { %v5865_v44 = vadd.f32 %v8759_v60, %v5773_v48  ;;  %v6061_v48 = vld [vmem:[%s11330_s14 + $0x10] sm:$0xff] }
 0x826   : > { %v5848_v41 = vpop.f32.mrf.mxu1 }
 0x827   : > { %v5863_v10 = vadd.f32 %v5848_v41, %v5771_v17  ;;  %v5957_v40 = vadd.f32 %v8771_v55, %v5865_v44 }
 0x828   : > { %v8760_v9 = vpop.f32.mrf.mxu1 }
 0x829   : > { %v5955_v56 = vadd.f32 %v5940_v63, %v5863_v10  ;;  %v5866_v42 = vadd.f32 %v8760_v9, %v5774_v21  ;;  %v6062_v9 = vld [vmem:[%s11330_s14 + $0x18] sm:$0xff] }
 0x82a   : > { %v5851_v51 = vpop.f32.mrf.mxu1 }
 0x82b   : > { %v5864_v62 = vadd.f32 %v5851_v51, %v5772_v54  ;;  %v5958_v19 = vadd.f32 %v8772_v59, %v5866_v42 }
 0x82d   : > { %v5956_v16 = vadd.f32 %v5943_v38, %v5864_v62  ;;  %v9226_v38 = vmov 1966171168  }
 0x834   : > { %v8783_v29 = vpop.f32.mrf.mxu1 }
 0x835   : > { %v6049_v52 = vadd.f32 %v8783_v29, %v5957_v40 }
 0x836   : > { %v6032_v43 = vpop.f32.mrf.mxu1 }
 0x837   : > { %v6047_v15 = vadd.f32 %v6032_v43, %v5955_v56  ;;  %v6085_v0 = vadd.f32 %v6076_v27, %v6049_v52 }
 0x838   : > { %v8784_v12 = vpop.f32.mrf.mxu1 }
 0x839   : > { %v6083_v11 = vadd.f32 %v6066_v47, %v6047_v15  ;;  %v6050_v33 = vadd.f32 %v8784_v12, %v5958_v19  ;;  %v6093_v13 = vsel %vm4170_vm6, %v6085_v0, 0.0  ;;  %v6200_v15 = vlaneseq }
 0x83a   : > { %v6035_v32 = vpop.f32.mrf.mxu1  ;;  %v6207_v12 = vunpack.c.l.s4 %v9226_v38  ;;  %v6605_v38 = vld [vmem:[%s11331_s15 + $0x1f8] sm:$0xff] }
 0x83b   : > { %v6048_v18 = vadd.f32 %v6035_v32, %v5956_v16  ;;  %v6087_v20 = vsel %vm4170_vm6, %v6083_v11, 0.0  ;;  %v6086_v7 = vadd.f32 %v6081_v61, %v6050_v33  ;;  %v10867_v27 = vshrl.u32 %v6200_v15, 7  ;;  %8483 = vmatprep.subr.mxu1 %v6605_v38 }
 0x83c   : > { %6088 = vadd.xlane.f32.xlu0 %v6087_v20  ;;  %vm10873_vm10 = vcmp.lt.s32.totalorder %v6200_v15, 16  ;;  %vm6231_vm14 = vcmp.ge.s32.totalorder %v6200_v15, 16  ;;  %vm6232_vm15 = vcmp.lt.s32.totalorder %v6200_v15, 32  ;;  %vm6239_vm1 = vcmp.ge.s32.totalorder %v6200_v15, 32 }
 0x83d   : > { %v6084_v5 = vadd.f32 %v6071_v46, %v6048_v18  ;;  %v6096_v14 = vsel %vm4170_vm6, %v6086_v7, 0.0  ;;  %vm11182_vm0 = vmand %vm6231_vm14, %vm6232_vm15  ;;  %vm6240_vm2 = vcmp.lt.s32.totalorder %v6200_v15, 48  ;;  %vm6247_vm4 = vcmp.ge.s32.totalorder %v6200_v15, 48 }
 0x83e   : > { %vm11190_vm3 = vmand %vm6239_vm1, %vm6240_vm2  ;;  %vm6269_vm7 = vcmp.ge.s32.totalorder %v6200_v15, 64  ;;  %vm6270_vm8 = vcmp.lt.s32.totalorder %v6200_v15, 80  ;;  %vm6292_vm14 = vcmp.ge.s32.totalorder %v6200_v15, 96  ;;  %vm6293_vm15 = vcmp.lt.s32.totalorder %v6200_v15, 112 }
 0x83f   : > { %v6090_v36 = vsel %vm4170_vm6, %v6084_v5, 0.0  ;;  %vm6300_vm1 = vcmp.ge.s32.totalorder %v6200_v15, 112  ;;  %vm6301_vm2 = vcmp.lt.s32.totalorder %v6200_v15, 128 }
 0x840   : > { %6094 = vadd.xlane.f32.xlu0 %v6093_v13  ;;  %6091 = vadd.xlane.f32.xlu1 %v6090_v36 }
 0x844   : > { %6097 = vadd.xlane.f32.xlu0 %v6096_v14  ;;  %v6571_v14 = vld [vmem:[%s11331_s15 + $0xe8] sm:$0xff] }
 0x851   : > { %6142 = vperm.xlu1 %8825, %v6055_v57  }
 0x855   : > { %6152 = vperm.xlu1 %8825, %v6057_v58  }
 0x859   : > { %6157 = vperm.xlu1 %8825, %v6058_v22  }
 0x85a   : > { %6147 = vperm.xlu0 %8824, %v6056_v23  }
 0x85d   : > { %6171 = vperm.xlu1 %8825, %v6060_v8  }
 0x85e   : > { %6166 = vperm.xlu0 %8824, %v6059_v25  }
 0x8c5   : > { %v6089_v26 = vpop.xlane.xlu0 %6088 }
 0x8c6   : > { %v6100_v2 = vmul.f32 0.0625, %v6089_v26 }
 0x8c8   : > { %v6104_v60 = vsub.f32 %v6083_v11, %v6100_v2  ;;  %v6208_v11 = vunpack.c.0.s8 %v6207_v12 }
 0x8c9   : > { %v6095_v24 = vpop.xlane.xlu0 %6094  ;;  %v6092_v45 = vpop.xlane.xlu1 %6091 }
 0x8ca   : > { %v6102_v50 = vmul.f32 0.0625, %v6095_v24  ;;  %v6101_v28 = vmul.f32 0.0625, %v6092_v45  ;;  %v6108_v1 = vmul.f32 %v6104_v60, %v6104_v60  ;;  %v10870_v13 = vsub.s32 %v6208_v11, %v10867_v27 }
 0x8cc   : > { %v6106_v6 = vsub.f32 %v6085_v0, %v6102_v50  ;;  %v6105_v31 = vsub.f32 %v6084_v5, %v6101_v28  ;;  %v6112_v55 = vsel %vm4170_vm6, %v6108_v1, 0.0 }
 0x8cd   : > { %v6098_v30 = vpop.xlane.xlu0 %6097  ;;  %v6143_v17 = vpop.permute.xlu1 %6142 }
 0x8ce   : > { %v6103_v35 = vmul.f32 0.0625, %v6098_v30  ;;  %v6110_v37 = vmul.f32 %v6106_v6, %v6106_v6  ;;  %v6109_v39 = vmul.f32 %v6105_v31, %v6105_v31 }
 0x8d0   : > { %v6107_v4 = vsub.f32 %v6086_v7, %v6103_v35  ;;  %v6118_v41 = vsel %vm4170_vm6, %v6110_v37, 0.0  ;;  %v6115_v3 = vsel %vm4170_vm6, %v6109_v39, 0.0 }
 0x8d1   : > { %6119 = vadd.xlane.f32.xlu1 %v6118_v41  ;;  %v6153_v53 = vpop.permute.xlu1 %6152 }
 0x8d2   : > { %v6111_v34 = vmul.f32 %v6107_v4, %v6107_v4 }
 0x8d4   : > { %v6121_v47 = vsel %vm4170_vm6, %v6111_v34, 0.0  ;;  %vm6248_vm6 = vcmp.lt.s32.totalorder %v6200_v15, 64 }
 0x8d5   : > { %6113 = vadd.xlane.f32.xlu1 %v6112_v55  ;;  %6122 = vadd.xlane.f32.xlu0 %v6121_v47  ;;  %v6158_v49 = vpop.permute.xlu1 %6157  ;;  %v6148_v63 = vpop.permute.xlu0 %6147 }
 0x8d9   : > { %6116 = vadd.xlane.f32.xlu0 %v6115_v3  ;;  %v6172_v44 = vpop.permute.xlu1 %6171  ;;  %v6167_v10 = vpop.permute.xlu0 %6166 }
 0x8e6   : > { %6181 = vperm.xlu1 %8825, %v6062_v9  }
 0x8ef   : > { %6176 = vperm.xlu0 %8824, %v6061_v48  }
 0x95a   : > { %v6120_v51 = vpop.xlane.xlu1 %6119 }
 0x95b   : > { %v6126_v46 = vmul.f32 0.0625, %v6120_v51 }
 0x95d   : > { %v6130_v21 = vadd.f32 1e-05, %v6126_v46 }
 0x95e   : > { %v6123_v54 = vpop.xlane.xlu0 %6122  ;;  %v6114_v59 = vpop.xlane.xlu1 %6113 }
 0x95f   : > { %9209 = vrsqrt.f32 %v6130_v21  ;;  %v6127_v29 = vmul.f32 0.0625, %v6123_v54  ;;  %v6124_v40 = vmul.f32 0.0625, %v6114_v59 }
 0x961   : > { %v6131_v56 = vadd.f32 1e-05, %v6127_v29  ;;  %v6128_v42 = vadd.f32 1e-05, %v6124_v40 }
 0x962   : > { %v6117_v62 = vpop.xlane.xlu0 %6116  ;;  %v6182_v58 = vpop.permute.xlu1 %6181 }
 0x963   : > { %9211 = vrsqrt.f32 %v6131_v56  ;;  %v6125_v43 = vmul.f32 0.0625, %v6117_v62 }
 0x964   : > { %9213 = vrsqrt.f32 %v6128_v42 }
 0x965   : > { %v6129_v52 = vadd.f32 1e-05, %v6125_v43 }
 0x967   : > { %9215 = vrsqrt.f32 %v6129_v52  ;;  %v6573_v52 = vld [vmem:[%s11331_s15 + $0xf8] sm:$0xff] }
 0x968   : > { %8448 = vmatprep.subr.mxu0 %v6573_v52  ;;  %v6579_v52 = vld [vmem:[%s11331_s15 + $0x128] sm:$0xff] }
 0x96a   : > { %v6177_v18 = vpop.permute.xlu0 %6176 }
 0x96c   : > { %v9210_v19 = vpop.eup %9209 }
 0x96d   : > { %v6138_v16 = vmul.f32 %v9210_v19, %v6106_v6 }
 0x96f   : > { %v6162_v32 = vmul.f32 %v6153_v53, %v6138_v16 }
 0x970   : > { %v9212_v33 = vpop.eup %9211 }
 0x971   : > { %v9214_v20 = vpop.eup %9213  ;;  %v6139_v0 = vmul.f32 %v9212_v33, %v6107_v4  ;;  %v6186_v5 = vadd.f32 %v6177_v18, %v6162_v32  ;;  %v6557_v32 = vld [vmem:[%s11331_s15 + $0x78] sm:$0xff]  ;;  %v6572_v18 = vld [vmem:[%s11331_s15 + $0xf0] sm:$0xff] }
 0x972   : > { %v6136_v61 = vmul.f32 %v9214_v20, %v6104_v60  ;;  %v6589_v33 = vld [vmem:[%s11331_s15 + $0x178] sm:$0xff]  ;;  %8449 = vmatpush3.msra.mxu0 %v6557_v32  ;;  %v6604_v20 = vld [vmem:[%s11331_s15 + $0x1f0] sm:$0xff]  ;;  %v6578_v32 = vld [vmem:[%s11331_s15 + $0x120] sm:$0xff] }
 0x973   : > { %v6163_v36 = vmul.f32 %v6158_v49, %v6139_v0  ;;  %vm6190_vm9 = vcmp.gt.f32.partialorder %v6186_v5, 0.0  ;;  %v6194_v7 = vmul.f32 0.01, %v6186_v5  ;;  %8484 = vmatpush3.msra.mxu1 %v6589_v33  ;;  %v6556_v0 = vld [vmem:[%s11331_s15 + $0x70] sm:$0xff]  ;;  %8450 = vmatprep.subr.mxu0 %v6572_v18  ;;  %v6561_v33 = vld [vmem:[%s11331_s15 + $0x98] sm:$0xff] }
 0x974   : > { %v9216_v57 = vpop.eup %9215  ;;  %v6160_v22 = vmul.f32 %v6143_v17, %v6136_v61  ;;  %8485 = vmatprep.subr.mxu1 %v6604_v20  ;;  %8451 = vmatpush3.msra.mxu0 %v6556_v0  ;;  %v6593_v18 = vld [vmem:[%s11331_s15 + $0x198] sm:$0xff] }
 0x975   : > { %v6137_v23 = vmul.f32 %v9216_v57, %v6105_v31  ;;  %v6187_v8 = vadd.f32 %v6182_v58, %v6163_v36  ;;  %v6198_v25 = vsel %vm6190_vm9, %v6186_v5, %v6194_v7  ;;  %v6588_v7 = vld [vmem:[%s11331_s15 + $0x170] sm:$0xff]  ;;  %v6603_v57 = vld [vmem:[%s11331_s15 + $0x1e8] sm:$0xff]  ;;  %8452 = vmatprep.subr.mxu0 %v6571_v14  ;;  %v6545_v20 = vld [vmem:[%s11331_s15 + $0x18] sm:$0xff] }
 0x976   : > { %v6391_v26 = vrot.slane %v6198_v25, %v10870_v13  ;;  %v6184_v2 = vadd.f32 %v6167_v10, %v6160_v22  ;;  %6383 = vst.msk [vmem:[#allocation2 + $0x2] sm:$0x1] %vm10873_vm10, %v6198_v25  ;;  %v6421_v6 = vcombine.high %v6198_v25, %v6198_v25  ;;  %8486 = vmatpush3.msra.mxu1 %v6588_v7  ;;  %v6555_v58 = vld [vmem:[%s11331_s15 + $0x68] sm:$0xff]  ;;  %v6544_v7 = vld [vmem:[%s11331_s15 + $0x10] sm:$0xff]  ;;  %vm11210_vm9 = vmand %vm6247_vm4, %vm6248_vm6  ;;  %vm9235_vm4 = vmmov 0  }
 0x977   : > { %vm6191_vm11 = vcmp.gt.f32.partialorder %v6187_v8, 0.0  ;;  %v6195_v24 = vmul.f32 0.01, %v6187_v8  ;;  %v6161_v45 = vmul.f32 %v6148_v63, %v6137_v23  ;;  %v6587_v22 = vld [vmem:[%s11331_s15 + $0x168] sm:$0xff]  ;;  %8487 = vmatprep.subr.mxu1 %v6603_v57  ;;  %v6570_v23 = vld [vmem:[%s11331_s15 + $0xe0] sm:$0xff]  ;;  %8453 = vmatpush3.msra.mxu0 %v6555_v58  ;;  %v6576_v14 = vld [vmem:[%s11331_s15 + $0x110] sm:$0xff] }
 0x978   : > { %v6392_v50 = vcombine.high %v6391_v26, %v6391_v26  ;;  %vm6188_vm12 = vcmp.gt.f32.partialorder %v6184_v2, 0.0  ;;  %v6192_v28 = vmul.f32 0.01, %v6184_v2  ;;  %v6399_v31 = vrot.slane %v6391_v26, %v10870_v13  ;;  %8488 = vmatpush3.msra.mxu1 %v6587_v22  ;;  %8454 = vmatprep.subr.mxu0 %v6570_v23  ;;  %v6559_v57 = vld [vmem:[%s11331_s15 + $0x88] sm:$0xff] }
 0x979   : > { %v6199_v60 = vsel %vm6191_vm11, %v6187_v8, %v6195_v24  ;;  %v6185_v30 = vadd.f32 %v6172_v44, %v6161_v45  ;;  %v6428_v55 = vrot.slane %v6421_v6, %v10870_v13  ;;  %v6602_v8 = vld [vmem:[%s11331_s15 + $0x1e0] sm:$0xff]  ;;  %v6569_v45 = vld [vmem:[%s11331_s15 + $0xd8] sm:$0xff]  ;;  %v6591_v58 = vld [vmem:[%s11331_s15 + $0x188] sm:$0xff]  ;;  %vm6284_vm11 = vcmp.ge.s32.totalorder %v6200_v15, 80 }
 0x97a   : > { %v6470_v35 = vrot.slane %v6199_v60, %v10870_v13  ;;  %v6406_v37 = vrot.slane %v6392_v50, %v10870_v13  ;;  %6462 = vst.msk [vmem:[#allocation2 + $0x3] sm:$0x1] %vm10873_vm10, %v6199_v60  ;;  %v6196_v4 = vsel %vm6188_vm12, %v6184_v2, %v6192_v28  ;;  %v6500_v34 = vcombine.high %v6199_v60, %v6199_v60  ;;  %v6554_v2 = vld [vmem:[%s11331_s15 + $0x60] sm:$0xff]  ;;  %v6601_v50 = vld [vmem:[%s11331_s15 + $0x1d8] sm:$0xff]  ;;  %v6543_v22 = vld [vmem:[%s11331_s15 + $0x8] sm:$0xff] }
 0x97b   : > { %vm6189_vm13 = vcmp.gt.f32.partialorder %v6185_v30, 0.0  ;;  %v6193_v41 = vmul.f32 0.01, %v6185_v30  ;;  %6204 = vst.msk [vmem:[#allocation2] sm:$0x1] %vm10873_vm10, %v6196_v4  ;;  %v6411_v39 = vcombine.high %v6399_v31, %v6399_v31  ;;  %v6212_v48 = vrot.slane %v6196_v4, %v10870_v13  ;;  %v6586_v24 = vld [vmem:[%s11331_s15 + $0x160] sm:$0xff]  ;;  %8489 = vmatprep.subr.mxu1 %v6602_v8  ;;  %8455 = vmatpush3.msra.mxu0 %v6554_v2 }
 0x97c   : > { %6407 = vrot.lane.b32.xlu0 %v6406_v37, %s9227_s3  ;;  %v6471_v1 = vcombine.high %v6470_v35, %v6470_v35  ;;  %v6478_v9 = vrot.slane %v6470_v35, %v10870_v13  ;;  %v10897_v17 = vrot.slane %v6428_v55, %v10870_v13  ;;  %v6507_v63 = vrot.slane %v6500_v34, %v10870_v13  ;;  %v6553_v60 = vld [vmem:[%s11331_s15 + $0x58] sm:$0xff]  ;;  %v6600_v31 = vld [vmem:[%s11331_s15 + $0x1d0] sm:$0xff]  ;;  %v6599_v34 = vld [vmem:[%s11331_s15 + $0x1c8] sm:$0xff] }
 0x97d   : > { %v6197_v47 = vsel %vm6189_vm13, %v6185_v30, %v6193_v41  ;;  %v6213_v49 = vcombine.high %v6212_v48, %v6212_v48  ;;  %v6220_v46 = vrot.slane %v6212_v48, %v10870_v13  ;;  %v6251_v40 = vcombine.high %v6196_v4, %v6196_v4  ;;  %v6585_v6 = vld [vmem:[%s11331_s15 + $0x158] sm:$0xff]  ;;  %8490 = vmatpush3.msra.mxu1 %v6586_v24  ;;  %v6552_v4 = vld [vmem:[%s11331_s15 + $0x50] sm:$0xff]  ;;  %v6566_v48 = vld [vmem:[%s11331_s15 + $0xc0] sm:$0xff] }
 0x97e   : > { %v6485_v3 = vrot.slane %v6471_v1, %v10870_v13  ;;  %6304 = vst.msk [vmem:[#allocation2 + $0x1] sm:$0x1] %vm10873_vm10, %v6197_v47  ;;  %v6490_v53 = vcombine.high %v6478_v9, %v6478_v9  ;;  %v6312_v44 = vrot.slane %v6197_v47, %v10870_v13  ;;  %v10908_v51 = vrot.slane %v6507_v63, %v10870_v13  ;;  %v6584_v41 = vld [vmem:[%s11331_s15 + $0x150] sm:$0xff]  ;;  %v6567_v1 = vld [vmem:[%s11331_s15 + $0xc8] sm:$0xff]  ;;  %v6558_v8 = vld [vmem:[%s11331_s15 + $0x80] sm:$0xff] }
 0x97f   : > { %v10905_v10 = vrot.slane %v6213_v49, %v10870_v13  ;;  %v6235_v54 = vcombine.high %v6220_v46, %v6220_v46  ;;  %v6416_v56 = vcombine.high %v6406_v37, %v6406_v37  ;;  %v10923_v62 = vrot.slane %v6251_v40, %v10870_v13  ;;  %8456 = vmatprep.subr.mxu0 %v6569_v45  ;;  %v6568_v37 = vld [vmem:[%s11331_s15 + $0xd0] sm:$0xff]  ;;  %v6583_v9 = vld [vmem:[%s11331_s15 + $0x148] sm:$0xff]  ;;  %v6582_v49 = vld [vmem:[%s11331_s15 + $0x140] sm:$0xff] }
 0x980   : > { %6412 = vrot.lane.b32.xlu0 %v6411_v39, %s9228_s26  ;;  %6486 = vrot.lane.b32.xlu1 %v6485_v3, %s9227_s3  ;;  %v6313_v21 = vcombine.high %v6312_v44, %v6312_v44  ;;  %v6320_v29 = vrot.slane %v6312_v44, %v10870_v13  ;;  %v6342_v43 = vcombine.high %v6197_v47, %v6197_v47  ;;  %v6549_v46 = vld [vmem:[%s11331_s15 + $0x38] sm:$0xff]  ;;  %v6548_v40 = vld [vmem:[%s11331_s15 + $0x30] sm:$0xff]  ;;  %v9234_v24 = vmov 0.0   ;;  %vm11214_vm10 = vmand %vm6269_vm7, %vm6270_vm8 }
 0x981   : > { %v10935_v12 = vrot.slane %v10923_v62, %v10870_v13  ;;  %v6495_v19 = vcombine.high %v6485_v3, %v6485_v3  ;;  %v6440_v16 = vcombine.high %v6428_v55, %v6428_v55  ;;  %v6519_v36 = vcombine.high %v6507_v63, %v6507_v63  ;;  %8491 = vmatprep.subr.mxu1 %v6601_v50  ;;  %v6551_v3 = vld [vmem:[%s11331_s15 + $0x48] sm:$0xff]  ;;  %v6574_v2 = vld [vmem:[%s11331_s15 + $0x100] sm:$0xff] }
 0x982   : > { %v10916_v59 = vrot.slane %v6313_v21, %v10870_v13  ;;  %v6332_v42 = vcombine.high %v6320_v29, %v6320_v29  ;;  %v10938_v11 = vrot.slane %v6342_v43, %v10870_v13  ;;  %v6452_v25 = vcombine.high %v10897_v17, %v10897_v17  ;;  %8457 = vmatpush3.msra.mxu0 %v6553_v60  ;;  %v6564_v21 = vld [vmem:[%s11331_s15 + $0xb0] sm:$0xff]  ;;  %v6547_v43 = vld [vmem:[%s11331_s15 + $0x28] sm:$0xff] }
 0x983   : > { %v10959_v5 = vrot.slane %v6440_v16, %v10870_v13  ;;  %v10993_v26 = vrot.slane %v6519_v36, %v10870_v13  ;;  %v6243_v28 = vcombine.high %v10905_v10, %v10905_v10  ;;  %v6531_v30 = vcombine.high %v10908_v51, %v10908_v51  ;;  %8492 = vmatpush3.msra.mxu1 %v6585_v6  ;;  %v6594_v16 = vld [vmem:[%s11331_s15 + $0x1a0] sm:$0xff]  ;;  %v6592_v36 = vld [vmem:[%s11331_s15 + $0x190] sm:$0xff]  ;;  %v6575_v23 = vld [vmem:[%s11331_s15 + $0x108] sm:$0xff] }
 0x984   : > { %6436 = vrot.lane.b32.xlu0 %v10897_v17, %s9229_s27  ;;  %6491 = vrot.lane.b32.xlu1 %v6490_v53, %s9228_s26  ;;  %v10963_v61 = vrot.slane %v10938_v11, %v10870_v13  ;;  %v6273_v35 = vcombine.high %v10923_v62, %v10923_v62  ;;  %v6337_v47 = vcombine.high %v10916_v59, %v10916_v59  ;;  %v6598_v17 = vld [vmem:[%s11331_s15 + $0x1c0] sm:$0xff]  ;;  %v6595_v62 = vld [vmem:[%s11331_s15 + $0x1a8] sm:$0xff]  ;;  %vm6285_vm12 = vcmp.lt.s32.totalorder %v6200_v15, 96 }
 0x985   : > { %8458 = vmatprep.subr.mxu0 %v6568_v37  ;;  %8493 = vmatprep.subr.mxu1 %v6600_v31  ;;  %v6361_v39 = vcombine.high %v10938_v11, %v10938_v11  ;;  %v6550_v53 = vld [vmem:[%s11331_s15 + $0x40] sm:$0xff]  ;;  %v6288_v63 = vcombine.high %v10935_v12, %v10935_v12  ;;  %v6457_v38 = vcombine.high %v10959_v5, %v10959_v5  ;;  %vm11228_vm13 = vmand %vm6284_vm11, %vm6285_vm12  ;;  %vm6853_vm7 = vcmask 32768  }
 0x986   : > { %v6280_v55 = vrot.slane %v6273_v35, %v10870_v13  ;;  %8459 = vmatpush3.msra.mxu0 %v6552_v4  ;;  %8494 = vmatpush3.msra.mxu1 %v6584_v41  ;;  %v6373_v29 = vcombine.high %v10963_v61, %v10963_v61  ;;  %v6546_v11 = vld [vmem:[%s11331_s15 + $0x20] sm:$0xff]  ;;  %v6536_v0 = vcombine.high %v10993_v26, %v10993_v26 }
 0x987   : > { %8460 = vmatprep.subr.mxu0 %v6567_v1  ;;  %8495 = vmatprep.subr.mxu1 %v6599_v34  ;;  %v6368_v44 = vrot.slane %v6361_v39, %v10870_v13  ;;  %v6581_v13 = vld [vmem:[%s11331_s15 + $0x138] sm:$0xff] }
 0x988   : > { %6228 = vrot.lane.b32.xlu0 %v10905_v10, %s9227_s3  ;;  %6515 = vrot.lane.b32.xlu1 %v10908_v51, %s9229_s27  ;;  %v6565_v10 = vld [vmem:[%s11331_s15 + $0xb8] sm:$0xff] }
 0x989   : > { %8461 = vmatpush3.msra.mxu0 %v6551_v3  ;;  %8496 = vmatpush3.msra.mxu1 %v6583_v9  ;;  %v6597_v51 = vld [vmem:[%s11331_s15 + $0x1b8] sm:$0xff] }
 0x98a   : > { %8462 = vmatprep.subr.mxu0 %v6566_v48  ;;  %8497 = vmatprep.subr.mxu1 %v6598_v17 }
 0x98b   : > { %8463 = vmatpush3.msra.mxu0 %v6550_v53  ;;  %8498 = vmatpush3.msra.mxu1 %v6582_v49 }
 0x98c   : > { %6236 = vrot.lane.b32.xlu0 %v6235_v54, %s9228_s26  ;;  %6328 = vrot.lane.b32.xlu1 %v10916_v59, %s9227_s3  ;;  %s9231_s3 = smov 80   ;;  %v6596_v54 = vld [vmem:[%s11331_s15 + $0x1b0] sm:$0xff]  ;;  %v6296_v59 = vcombine.high %v6280_v55, %v6280_v55 }
 0x98d   : > { %8464 = vmatprep.subr.mxu0 %v6565_v10  ;;  %8499 = vmatprep.subr.mxu1 %v6597_v51 }
 0x98e   : > { %8465 = vmatpush3.msra.mxu0 %v6549_v46  ;;  %8500 = vmatpush3.msra.mxu1 %v6581_v13 }
 0x98f   : > { %8466 = vmatprep.subr.mxu0 %v6564_v21  ;;  %8501 = vmatprep.subr.mxu1 %v6596_v54 }
 0x990   : > { %6417 = vrot.lane.b32.xlu0 %v6416_v56, %s9230_s1  ;;  %6333 = vrot.lane.b32.xlu1 %v6332_v42, %s9228_s26  ;;  %v6580_v56 = vld [vmem:[%s11331_s15 + $0x130] sm:$0xff]  ;;  %v6563_v42 = vld [vmem:[%s11331_s15 + $0xa8] sm:$0xff]  ;;  %s9233_s26 = smov 112  }
 0x991   : > { %8467 = vmatpush3.msra.mxu0 %v6548_v40  ;;  %8502 = vmatpush3.msra.mxu1 %v6580_v56  ;;  %v6614_v56 = vsub.s32 1, %v10867_v27 }
 0x992   : > { %8468 = vmatprep.subr.mxu0 %v6563_v42  ;;  %8503 = vmatprep.subr.mxu1 %v6595_v62  ;;  %v6622_v42 = vsub.s32 3, %v10867_v27  ;;  %v6610_v62 = vsub.s32 0, %v10867_v27 }
 0x993   : > { %8469 = vmatpush3.msra.mxu0 %v6547_v43  ;;  %8504 = vmatpush3.msra.mxu1 %v6579_v52  ;;  %v6618_v43 = vsub.s32 2, %v10867_v27  ;;  %v6776_v27 = vld [vmem:[%s11333_s17 + $0x28] sm:$0xff] }
 0x994   : > { %6266 = vrot.lane.b32.xlu0 %v10935_v12, %s9229_s27  ;;  %6496 = vrot.lane.b32.xlu1 %v6495_v19, %s9230_s1  ;;  %v6378_v12 = vcombine.high %v6368_v44, %v6368_v44  ;;  %v6562_v19 = vld [vmem:[%s11331_s15 + $0xa0] sm:$0xff] }
 0x995   : > { %8470 = vmatprep.subr.mxu0 %v6562_v19  ;;  %8505 = vmatprep.subr.mxu1 %v6594_v16 }
 0x996   : > { %8471 = vmatpush3.msra.mxu0 %v6546_v11  ;;  %8506 = vmatpush3.msra.mxu1 %v6578_v32  ;;  %v6778_v11 = vld [vmem:[%s11333_s17 + $0x38] sm:$0xff]  ;;  %v6777_v32 = vld [vmem:[%s11333_s17 + $0x30] sm:$0xff] }
 0x997   : > { %8472 = vmatprep.subr.mxu0 %v6561_v33  ;;  %8507 = vmatprep.subr.mxu1 %v6593_v18  ;;  %v6775_v33 = vld [vmem:[%s11333_s17 + $0x20] sm:$0xff]  ;;  %v6774_v18 = vld [vmem:[%s11333_s17 + $0x18] sm:$0xff] }
 0x998   : > { %6448 = vrot.lane.b32.xlu0 %v10959_v5, %s9231_s3  ;;  %6357 = vrot.lane.b32.xlu1 %v10963_v61, %s9229_s27  ;;  %v6577_v5 = vld [vmem:[%s11331_s15 + $0x118] sm:$0xff]  ;;  %v6560_v61 = vld [vmem:[%s11331_s15 + $0x90] sm:$0xff] }
 0x999   : > { %8473 = vmatpush3.msra.mxu0 %v6545_v20  ;;  %8508 = vmatpush3.msra.mxu1 %v6577_v5  ;;  %v6773_v20 = vld [vmem:[%s11333_s17 + $0x10] sm:$0xff]  ;;  %v6771_v5 = vld [vmem:[%s11333_s17] sm:$0xff] }
 0x99a   : > { %8474 = vmatprep.subr.mxu0 %v6560_v61  ;;  %8509 = vmatprep.subr.mxu1 %v6592_v36 }
 0x99b   : > { %8475 = vmatpush3.msra.mxu0 %v6544_v7  ;;  %8510 = vmatpush3.msra.mxu1 %v6576_v14  ;;  %v6606_v7 = vld [vmem:[%s11332_s16] sm:$0x1] }
 0x99c   : > { %6453 = vrot.lane.b32.xlu0 %v6452_v25, %s9232_s22  ;;  %6527 = vrot.lane.b32.xlu1 %v10993_v26, %s9231_s3  ;;  %v6590_v25 = vld [vmem:[%s11331_s15 + $0x180] sm:$0xff] }
 0x99d   : > { %8476 = vmatprep.subr.mxu0 %v6559_v57  ;;  %v6542_v26 = vld [vmem:[%s11331_s15] sm:$0xff]  ;;  %8511 = vmatprep.subr.mxu1 %v6591_v58 }
 0x99e   : > { %8477 = vmatpush3.msra.mxu0 %v6543_v22  ;;  %8512 = vmatpush3.msra.mxu1 %v6575_v23 }
 0x99f   : > { %8478 = vmatprep.subr.mxu0 %v6558_v8  ;;  %8513 = vmatprep.subr.mxu1 %v6590_v25 }
 0x9a0   : > { %6244 = vrot.lane.b32.xlu0 %v6243_v28, %s9230_s1  ;;  %6532 = vrot.lane.b32.xlu1 %v6531_v30, %s9232_s22 }
 0x9a1   : > { %8479 = vmatpush3.msra.mxu0 %v6542_v26  ;;  %8514 = vmatpush3.msra.mxu1 %v6574_v2  ;;  %v6779_v2 = vld [vmem:[%s11334_s18] sm:$0x1] }
 0x9a2   : > { %8785 = vmatprep.subr.mxu0 %v9234_v24 }
 0x9a4   : > { %6281 = vrot.lane.b32.xlu0 %v6280_v55, %s9231_s3  ;;  %6338 = vrot.lane.b32.xlu1 %v6337_v47, %s9230_s1 }
 0x9a8   : > { %6289 = vrot.lane.b32.xlu0 %v6288_v63, %s9232_s22  ;;  %6369 = vrot.lane.b32.xlu1 %v6368_v44, %s9231_s3 }
 0x9ac   : > { %6297 = vrot.lane.b32.xlu0 %v6296_v59, %s9233_s26  ;;  %6374 = vrot.lane.b32.xlu1 %v6373_v29, %s9232_s22 }
 0x9b0   : > { %6458 = vrot.lane.b32.xlu0 %v6457_v38, %s9233_s26  ;;  %6379 = vrot.lane.b32.xlu1 %v6378_v12, %s9233_s26 }
 0x9b4   : > { %6537 = vrot.lane.b32.xlu1 %v6536_v0, %s9233_s26  ;;  %v6772_v0 = vld [vmem:[%s11333_s17 + $0x8] sm:$0xff] }
 0x9ee   : > { %v6408_v50 = vpop.permute.xlu0 %6407 }
 0x9ef   : > { %6410 = vst.msk [vmem:[#allocation2 + $0x2] sm:$0x1] %vm11182_vm0, %v6408_v50 }
 0x9f2   : > { %v6413_v6 = vpop.permute.xlu0 %6412  ;;  %v6487_v28 = vpop.permute.xlu1 %6486 }
 0x9f3   : > { %6415 = vst.msk [vmem:[#allocation2 + $0x2] sm:$0x1] %vm11190_vm3, %v6413_v6 }
 0x9f4   : > { %6489 = vst.msk [vmem:[#allocation2 + $0x3] sm:$0x1] %vm11182_vm0, %v6487_v28 }
 0x9f6   : > { %v6437_v30 = vpop.permute.xlu0 %6436  ;;  %v6492_v35 = vpop.permute.xlu1 %6491 }
 0x9f7   : > { %6494 = vst.msk [vmem:[#allocation2 + $0x3] sm:$0x1] %vm11190_vm3, %v6492_v35 }
 0x9fa   : > { %v6229_v37 = vpop.permute.xlu0 %6228  ;;  %v6516_v31 = vpop.permute.xlu1 %6515 }
 0x9fb   : > { %6234 = vst.msk [vmem:[#allocation2] sm:$0x1] %vm11182_vm0, %v6229_v37 }
 0x9fe   : > { %v6237_v4 = vpop.permute.xlu0 %6236  ;;  %v6329_v41 = vpop.permute.xlu1 %6328 }
 0x9ff   : > { %6242 = vst.msk [vmem:[#allocation2] sm:$0x1] %vm11190_vm3, %v6237_v4 }
 0xa00   : > { %6331 = vst.msk [vmem:[#allocation2 + $0x1] sm:$0x1] %vm11182_vm0, %v6329_v41  ;;  %vm11238_vm0 = vmand %vm6292_vm14, %vm6293_vm15 }
 0xa02   : > { %v6418_v55 = vpop.permute.xlu0 %6417  ;;  %v6334_v47 = vpop.permute.xlu1 %6333 }
 0xa03   : > { %6420 = vst.msk [vmem:[#allocation2 + $0x2] sm:$0x1] %vm11210_vm9, %v6418_v55 }
 0xa04   : > { %6336 = vst.msk [vmem:[#allocation2 + $0x1] sm:$0x1] %vm11190_vm3, %v6334_v47  ;;  %vm6302_vm3 = vmand %vm6300_vm1, %vm6301_vm2 }
 0xa05   : > { %6439 = vst.msk [vmem:[#allocation2 + $0x2] sm:$0x1] %vm11214_vm10, %v6437_v30 }
 0xa06   : > { %v6267_v39 = vpop.permute.xlu0 %6266  ;;  %v6497_v3 = vpop.permute.xlu1 %6496 }
 0xa07   : > { %6499 = vst.msk [vmem:[#allocation2 + $0x3] sm:$0x1] %vm11210_vm9, %v6497_v3 }
 0xa08   : > { %6518 = vst.msk [vmem:[#allocation2 + $0x3] sm:$0x1] %vm11214_vm10, %v6516_v31 }
 0xa0a   : > { %v6449_v48 = vpop.permute.xlu0 %6448  ;;  %v6358_v17 = vpop.permute.xlu1 %6357 }
 0xa0b   : > { %6451 = vst.msk [vmem:[#allocation2 + $0x2] sm:$0x1] %vm11228_vm13, %v6449_v48 }
 0xa0e   : > { %v6454_v49 = vpop.permute.xlu0 %6453  ;;  %v6528_v63 = vpop.permute.xlu1 %6527 }
 0xa0f   : > { %6456 = vst.msk [vmem:[#allocation2 + $0x2] sm:$0x1] %vm11238_vm0, %v6454_v49 }
 0xa10   : > { %6530 = vst.msk [vmem:[#allocation2 + $0x3] sm:$0x1] %vm11228_vm13, %v6528_v63 }
 0xa12   : > { %v6245_v44 = vpop.permute.xlu0 %6244  ;;  %v6533_v10 = vpop.permute.xlu1 %6532 }
 0xa13   : > { %6250 = vst.msk [vmem:[#allocation2] sm:$0x1] %vm11210_vm9, %v6245_v44 }
 0xa14   : > { %6535 = vst.msk [vmem:[#allocation2 + $0x3] sm:$0x1] %vm11238_vm0, %v6533_v10 }
 0xa15   : > { %6272 = vst.msk [vmem:[#allocation2] sm:$0x1] %vm11214_vm10, %v6267_v39 }
 0xa16   : > { %v6282_v51 = vpop.permute.xlu0 %6281  ;;  %v6339_v46 = vpop.permute.xlu1 %6338 }
 0xa17   : > { %6287 = vst.msk [vmem:[#allocation2] sm:$0x1] %vm11228_vm13, %v6282_v51 }
 0xa18   : > { %6341 = vst.msk [vmem:[#allocation2 + $0x1] sm:$0x1] %vm11210_vm9, %v6339_v46 }
 0xa19   : > { %6360 = vst.msk [vmem:[#allocation2 + $0x1] sm:$0x1] %vm11214_vm10, %v6358_v17 }
 0xa1a   : > { %v6290_v13 = vpop.permute.xlu0 %6289  ;;  %v6370_v21 = vpop.permute.xlu1 %6369 }
 0xa1b   : > { %6295 = vst.msk [vmem:[#allocation2] sm:$0x1] %vm11238_vm0, %v6290_v13 }
 0xa1c   : > { %6372 = vst.msk [vmem:[#allocation2 + $0x1] sm:$0x1] %vm11228_vm13, %v6370_v21 }
 0xa1e   : > { %v6298_v54 = vpop.permute.xlu0 %6297  ;;  %v6375_v59 = vpop.permute.xlu1 %6374 }
 0xa1f   : > { %6303 = vst.msk [vmem:[#allocation2] sm:$0x1] %vm6302_vm3, %v6298_v54 }
 0xa20   : > { %6377 = vst.msk [vmem:[#allocation2 + $0x1] sm:$0x1] %vm11238_vm0, %v6375_v59 }
 0xa22   : > { %v6459_v29 = vpop.permute.xlu0 %6458  ;;  %v6380_v40 = vpop.permute.xlu1 %6379 }
 0xa23   : > { %6461 = vst.msk [vmem:[#allocation2 + $0x2] sm:$0x1] %vm6302_vm3, %v6459_v29  ;;  %6382 = vst.msk [vmem:[#allocation2 + $0x1] sm:$0x1] %vm6302_vm3, %v6380_v40 }
 0xa26   : > { %v6538_v15 = vpop.permute.xlu1 %6537 }
 0xa27   : > { %6540 = vst.msk [vmem:[#allocation2 + $0x3] sm:$0x1] %vm6302_vm3, %v6538_v15 }
 0xa2e   : > { %v6541_v52 = vld [vmem:[#allocation2] sm:$0xf] }
 0xa2f   : > { %v6615_v38 = vrot.slane %v6541_v52, %v6614_v56  ;;  %v6623_v12 = vrot.slane %v6541_v52, %v6622_v42  ;;  %v6611_v19 = vrot.slane %v6541_v52, %v6610_v62  ;;  %v6619_v16 = vrot.slane %v6541_v52, %v6618_v43 }
 0xa31   : > { %6692 = vmatprep.mubr.f32.mxu0 %v6615_v38  ;;  %6762 = vmatprep.mubr.f32.mxu1 %v6623_v12 }
 0xa32   : > { %6693 = vmatmul.mubr.f32.vlgmr.msra.gmra.mxu0 %v6611_v19  ;;  %6763 = vmatmul.mubr.f32.vlgmr.msra.gmra.mxu1 %v6619_v16 }
 0xa33   : > { %8786 = vmatpush3.msra.mxu0 %v6778_v11  ;;  %8801 = vmatprep.mubr.msk.f32.mxu0 %vm9235_vm4, %v9234_v24 }
 0xa34   : > { %8787 = vmatprep.subr.mxu0 %v9234_v24 }
 0xa35   : > { %8788 = vmatpush3.msra.mxu0 %v6777_v32 }
 0xa36   : > { %8789 = vmatprep.subr.mxu0 %v9234_v24 }
 0xa37   : > { %8790 = vmatpush3.msra.mxu0 %v6776_v27 }
 0xa38   : > { %8791 = vmatprep.subr.mxu0 %v9234_v24 }
 0xa39   : > { %8792 = vmatpush3.msra.mxu0 %v6775_v33 }
 0xa3a   : > { %8793 = vmatprep.subr.mxu0 %v9234_v24 }
 0xa3b   : > { %8794 = vmatpush3.msra.mxu0 %v6774_v18 }
 0xa3c   : > { %8795 = vmatprep.subr.mxu0 %v9234_v24 }
 0xa3d   : > { %8796 = vmatpush3.msra.mxu0 %v6773_v20 }
 0xa3e   : > { %8797 = vmatprep.subr.mxu0 %v9234_v24 }
 0xa3f   : > { %8798 = vmatpush3.msra.mxu0 %v6772_v0 }
 0xa40   : > { %8799 = vmatprep.subr.mxu0 %v9234_v24 }
 0xa41   : > { %8800 = vmatpush3.msra.mxu0 %v6771_v5 }
 0xaf2   : > { %v8480_v61 = vpop.f32.mrf.mxu0  ;;  %v8515_v36 = vpop.f32.mrf.mxu1 }
 0xaf4   : > { %v8481_v14 = vpop.f32.mrf.mxu0  ;;  %v8516_v57 = vpop.f32.mrf.mxu1 }
 0xaf5   : > { %v8482_v58 = vadd.f32 %v8481_v14, %v8480_v61  ;;  %v8517_v23 = vadd.f32 %v8516_v57, %v8515_v36 }
 0xaf7   : > { %v6695_v22 = vadd.f32 %v8482_v58, %v6606_v7 }
 0xaf9   : > { %v6765_v8 = vadd.f32 %v8517_v23, %v6695_v22 }
 0xafb   : > { %vm6768_vm6 = vcmp.gt.f32.partialorder %v6765_v8, 0.0  ;;  %v6769_v25 = vmul.f32 0.01, %v6765_v8 }
 0xafd   : > { %v6770_v26 = vsel %vm6768_vm6, %v6765_v8, %v6769_v25 }
 0xafe   : > { %8802 = vmatmul.mubr.msk.f32.vlgmr.msra.gmra.mxu0 %vm3887_vm5, %v6770_v26 }
 0xbbe   : > { %v6849_v24 = vpop.f32.mrf.mxu0 }
 0xbbf   : > { %v6850_v45 = vadd.f32 %v6849_v24, %v6779_v2 }
 0xbc0   : > { %v8803_v50 = vpop.f32.mrf.mxu0 }
 0xbc1   : > { %6854 = vst.msk [vmem:[%s598_s21] sm:$0x1] %vm6853_vm7, %v6850_v45 }
 0xbc2 PF: > { %s29_s0 = sadd.s32 1, %s9223_s0  }
 0xbc3   : > { %p26_p4 = scmp.ge.s32.totalorder %s29_s0, 4  }
 0xbc5   :  { %28 = sbr.rel (!%p26_p4) target bundleno = 5 (0x5), region = 156 }

</bundles_post_ra>
